<compile_context>
chip_gen: v5e
topology: v5e:2x2
jax: 0.10.0
libtpu: 0.0.40
codegen_flags: <defaults>
</compile_context>

<pallas_src>
import jax
import jax.numpy as jnp
from jax.experimental import pallas as pl
from jax.experimental.pallas import tpu as pltpu

# -------------------- model hyper-parameters --------------------
SHAPE = (1, 16, 16)          # (C, H, W)  -> flattened_size = 256
NHID = 16                    # latent dim of the VAE bottleneck
LATENT = 128                 # encoder output ("representation") size
HIDDEN = 400                 # MLP hidden width (logical)
HIDDEN_PAD = 512             # lane-aligned padded hidden width
HEAD_PAD = 128               # lane-aligned fused mean/logvar head width
BN_EPS = 1e-5                # nn.BatchNorm1d default eps
LEAKY_SLOPE = 0.01           # nn.LeakyReLU default negative_slope
NORM_MEAN = 0.1307           # decoder invTrans Normalize mean
INV_NORM_STD = 1.0 / 0.3081  # multiply instead of divide


def _bn_train(h):
    """BatchNorm1d, training mode, gamma=1, beta=0 (batch statistics).

    Uses var = E[h^2] - mu^2 (one fewer full-width subtract than E[(h-mu)^2]).
    Zero-padded feature columns stay exactly zero through this normalization.
    """
    mu = jnp.mean(h, axis=0, keepdims=True)
    var = jnp.maximum(jnp.mean(h * h, axis=0, keepdims=True) - mu * mu, 0.0)
    return (h - mu) * jax.lax.rsqrt(var + BN_EPS)


def _mm(a_f32_or_bf16, w_ref, b_ref):
    """bf16 x bf16 matmul with f32 accumulation, f32 bias add."""
    a = a_f32_or_bf16.astype(jnp.bfloat16)
    return jnp.dot(a, w_ref[...], preferred_element_type=jnp.float32) + b_ref[...]


def vae_kernel(x_ref, eps_ref,
               we1_ref, be1_ref, we2_ref, be2_ref,
               wml_ref, bml_ref,
               wd1_ref, bd1_ref, wd2_ref, bd2_ref, wd3_ref, bd3_ref,
               recon_ref, ml_ref):
    # ---------------- encoder ----------------
    # Flatten -> Linear(D, 400[->512]) -> BatchNorm1d -> LeakyReLU
    h = _mm(x_ref[...], we1_ref, be1_ref)                 # (B, 512) f32
    h = _bn_train(h)
    h = jnp.where(h > 0, h, LEAKY_SLOPE * h)
    # MLP([400, 128], last_activation=True): Linear -> BN -> ReLU
    h = _mm(h, we2_ref, be2_ref)                          # (B, 128) f32
    h = _bn_train(h)
    h = jnp.maximum(h, 0.0)

    # ---------------- fused mean / logvar head ----------------
    # cols [0:16) = calc_mean, cols [16:32) = calc_logvar, rest zero-padded.
    ml = _mm(h, wml_ref, bml_ref)                         # (B, 128) f32
    ml_ref[...] = ml                                      # single lane-dense store

    mean = ml[:, :NHID]
    logvar = ml[:, NHID:2 * NHID]

    # ---------------- reparameterization (spec: sigma = 0.5*exp(logvar)) ----
    z = mean + eps_ref[...] * (0.5 * jnp.exp(logvar))     # (B, 16) f32

    # ---------------- decoder ----------------
    # MLP([nhid, 400, 400, D], last_activation=False) -> Sigmoid -> Normalize
    d = _mm(z, wd1_ref, bd1_ref)                          # (B, 512)
    d = jnp.maximum(_bn_train(d), 0.0)
    d = _mm(d, wd2_ref, bd2_ref)                          # (B, 512)
    d = jnp.maximum(_bn_train(d), 0.0)
    d = _mm(d, wd3_ref, bd3_ref)                          # (B, 256)
    d = jax.nn.sigmoid(d)
    recon_ref[...] = (d - NORM_MEAN) * INV_NORM_STD


def init_params(key, flat_dim):
    """Deterministic init. Weights stored (in, out) bf16 zero-padded to lane
    multiples; biases stay f32 (added after f32 accumulation)."""

    def _linear(k, fan_in, fan_out):
        w = jax.random.normal(k, (fan_in, fan_out), jnp.float32) / jnp.sqrt(float(fan_in))
        b = jnp.zeros((1, fan_out), jnp.float32)
        return w, b

    keys = jax.random.split(key, 7)
    we1, be1 = _linear(keys[0], flat_dim, HIDDEN)     # (256, 400)
    we2, be2 = _linear(keys[1], HIDDEN, LATENT)       # (400, 128)
    wm,  bm  = _linear(keys[2], LATENT, NHID)         # (128, 16)
    wlv, blv = _linear(keys[3], LATENT, NHID)         # (128, 16)
    wd1, bd1 = _linear(keys[4], NHID, HIDDEN)         # (16, 400)
    wd2, bd2 = _linear(keys[5], HIDDEN, HIDDEN)       # (400, 400)
    wd3, bd3 = _linear(keys[6], HIDDEN, flat_dim)     # (400, 256)

    ph = HIDDEN_PAD - HIDDEN

    def pad_cols(w, b):
        return jnp.pad(w, ((0, 0), (0, ph))), jnp.pad(b, ((0, 0), (0, ph)))

    def pad_rows(w):
        return jnp.pad(w, ((0, ph), (0, 0)))

    we1_p, be1_p = pad_cols(we1, be1)                 # (256, 512), (1, 512)
    we2_p = pad_rows(we2)                             # (512, 128)
    # fused + lane-padded mean/logvar head
    wml = jnp.pad(jnp.concatenate([wm, wlv], axis=1),
                  ((0, 0), (0, HEAD_PAD - 2 * NHID))) # (128, 128)
    bml = jnp.pad(jnp.concatenate([bm, blv], axis=1),
                  ((0, 0), (0, HEAD_PAD - 2 * NHID))) # (1, 128)
    wd1_p, bd1_p = pad_cols(wd1, bd1)                 # (16, 512), (1, 512)
    wd2_p, bd2_p = pad_cols(pad_rows(wd2), bd2)       # (512, 512), (1, 512)
    wd3_p = pad_rows(wd3)                             # (512, 256)

    bf = lambda w: w.astype(jnp.bfloat16)
    return (bf(we1_p), be1_p,
            bf(we2_p), be2,
            bf(wml), bml,
            bf(wd1_p), bd1_p,
            bf(wd2_p), bd2_p,
            bf(wd3_p), bd3)


def vae_forward(x, eps, params):
    """x: (B, C, H, W) f32. Returns (recon (B,C,H,W), mean (B,NHID), logvar (B,NHID))."""
    B = x.shape[0]
    D = x.shape[1] * x.shape[2] * x.shape[3]
    x_flat = x.reshape(B, D).astype(jnp.bfloat16)     # matches nn.Flatten on NCHW
    args = (x_flat, eps) + params

    vmem = pl.BlockSpec(memory_space=pltpu.MemorySpace.VMEM)
    # Whole model fits comfortably in VMEM (~1.3 MB of bf16 weights + <1 MB
    # activations at B=8), so a single grid point with no tiling is optimal.
    # NOTE: if B is ever scaled up, set pltpu.CompilerParams(vmem_limit_bytes=...)
    # (v7x has 64 MiB VMEM) and consider a feature-dim parallel grid.
    recon_flat, ml = pl.pallas_call(
        vae_kernel,
        out_shape=(
            jax.ShapeDtypeStruct((B, D), jnp.float32),
            jax.ShapeDtypeStruct((B, HEAD_PAD), jnp.float32),
        ),
        in_specs=[vmem] * len(args),
        out_specs=(vmem, vmem),
    )(*args)

    mean = ml[:, :NHID]
    logvar = ml[:, NHID:2 * NHID]
    return recon_flat.reshape(x.shape), mean, logvar


if __name__ == "__main__":
    key = jax.random.PRNGKey(0)
    k_x, k_eps, k_params = jax.random.split(key, 3)

    B = 8
    C, H, W = SHAPE
    x = jax.random.normal(k_x, (B, C, H, W), jnp.float32)
    # TODO(synk): torch.randn inside forward() is non-deterministic; here the
    # reparameterization noise eps is passed in as a fixed input instead.
    eps = jax.random.normal(k_eps, (B, NHID), jnp.float32)

    params = init_params(k_params, C * H * W)

    recon, mean, logvar = vae_forward(x, eps, params)
    jax.block_until_ready((recon, mean, logvar))

    assert recon.shape == (B, C, H, W)
    assert mean.shape == (B, NHID)
    assert logvar.shape == (B, NHID)
    assert bool(jnp.all(jnp.isfinite(recon)))
    print("KERNEL_OK")
</pallas_src>

<mosaic_0001>
module attributes {stable_mosaic.version = 11 : i64} {
  func.func @vae_kernel(%arg0: memref<8x256xbf16, #tpu.memory_space<vmem>>, %arg1: memref<8x16xf32, #tpu.memory_space<vmem>>, %arg2: memref<256x512xbf16, #tpu.memory_space<vmem>>, %arg3: memref<1x512xf32, #tpu.memory_space<vmem>>, %arg4: memref<512x128xbf16, #tpu.memory_space<vmem>>, %arg5: memref<1x128xf32, #tpu.memory_space<vmem>>, %arg6: memref<128x128xbf16, #tpu.memory_space<vmem>>, %arg7: memref<1x128xf32, #tpu.memory_space<vmem>>, %arg8: memref<16x512xbf16, #tpu.memory_space<vmem>>, %arg9: memref<1x512xf32, #tpu.memory_space<vmem>>, %arg10: memref<512x512xbf16, #tpu.memory_space<vmem>>, %arg11: memref<1x512xf32, #tpu.memory_space<vmem>>, %arg12: memref<512x256xbf16, #tpu.memory_space<vmem>>, %arg13: memref<1x256xf32, #tpu.memory_space<vmem>>, %arg14: memref<8x256xf32, #tpu.memory_space<vmem>>, %arg15: memref<8x128xf32, #tpu.memory_space<vmem>>) attributes {dimension_semantics = [], scalar_prefetch = 0 : i64, scratch_operands = 0 : i64, tpu.core_type = #tpu.core_type<tc>} {
    %c0 = arith.constant 0 : index
    %c0_0 = arith.constant 0 : index
    %0 = vector.load %arg0[%c0, %c0_0] : memref<8x256xbf16, #tpu.memory_space<vmem>>, vector<8x256xbf16>
    %c0_1 = arith.constant 0 : index
    %c0_2 = arith.constant 0 : index
    %1 = vector.load %arg2[%c0_1, %c0_2] : memref<256x512xbf16, #tpu.memory_space<vmem>>, vector<256x512xbf16>
    %cst = arith.constant dense<0.000000e+00> : vector<8x512xf32>
    %2 = tpu.matmul %0, %1, %cst {dimension_numbers = #tpu.dot_dimension_numbers<[1], [0], [0], [1], [0, 0, 1, 1], [], []>} : vector<8x256xbf16>, vector<256x512xbf16>, vector<8x512xf32> -> vector<8x512xf32>
    %c0_3 = arith.constant 0 : index
    %c0_4 = arith.constant 0 : index
    %3 = vector.load %arg3[%c0_3, %c0_4] : memref<1x512xf32, #tpu.memory_space<vmem>>, vector<1x512xf32>
    %4 = vector.broadcast %3 : vector<1x512xf32> to vector<8x512xf32>
    %5 = arith.addf %2, %4 : vector<8x512xf32>
    %cst_5 = arith.constant dense<0.000000e+00> : vector<512xf32>
    %6 = vector.multi_reduction <add>, %5, %cst_5 [0] : vector<8x512xf32> to vector<512xf32>
    %7 = vector.shape_cast %6 : vector<512xf32> to vector<1x512xf32>
    %cst_6 = arith.constant 8.000000e+00 : f32
    %8 = vector.broadcast %cst_6 : f32 to vector<1x512xf32>
    %9 = arith.divf %7, %8 : vector<1x512xf32>
    %10 = arith.mulf %5, %5 : vector<8x512xf32>
    %cst_7 = arith.constant dense<0.000000e+00> : vector<512xf32>
    %11 = vector.multi_reduction <add>, %10, %cst_7 [0] : vector<8x512xf32> to vector<512xf32>
    %12 = vector.shape_cast %11 : vector<512xf32> to vector<1x512xf32>
    %cst_8 = arith.constant 8.000000e+00 : f32
    %13 = vector.broadcast %cst_8 : f32 to vector<1x512xf32>
    %14 = arith.divf %12, %13 : vector<1x512xf32>
    %15 = arith.mulf %9, %9 : vector<1x512xf32>
    %16 = arith.subf %14, %15 : vector<1x512xf32>
    %cst_9 = arith.constant 0.000000e+00 : f32
    %17 = vector.broadcast %cst_9 : f32 to vector<1x512xf32>
    %18 = arith.maximumf %16, %17 : vector<1x512xf32>
    %19 = vector.broadcast %9 : vector<1x512xf32> to vector<8x512xf32>
    %20 = arith.subf %5, %19 : vector<8x512xf32>
    %cst_10 = arith.constant 9.99999974E-6 : f32
    %21 = vector.broadcast %cst_10 : f32 to vector<1x512xf32>
    %22 = arith.addf %18, %21 : vector<1x512xf32>
    %23 = math.rsqrt %22 : vector<1x512xf32>
    %24 = vector.broadcast %23 : vector<1x512xf32> to vector<8x512xf32>
    %25 = arith.mulf %20, %24 : vector<8x512xf32>
    %cst_11 = arith.constant 0.000000e+00 : f32
    %26 = vector.broadcast %cst_11 : f32 to vector<8x512xf32>
    %27 = arith.cmpf ogt, %25, %26 : vector<8x512xf32>
    %cst_12 = arith.constant 0.00999999977 : f32
    %28 = vector.broadcast %cst_12 : f32 to vector<8x512xf32>
    %29 = arith.mulf %28, %25 : vector<8x512xf32>
    %30 = arith.select %27, %25, %29 : vector<8x512xi1>, vector<8x512xf32>
    %31 = arith.truncf %30 : vector<8x512xf32> to vector<8x512xbf16>
    %c0_13 = arith.constant 0 : index
    %c0_14 = arith.constant 0 : index
    %32 = vector.load %arg4[%c0_13, %c0_14] : memref<512x128xbf16, #tpu.memory_space<vmem>>, vector<512x128xbf16>
    %cst_15 = arith.constant dense<0.000000e+00> : vector<8x128xf32>
    %33 = tpu.matmul %31, %32, %cst_15 {dimension_numbers = #tpu.dot_dimension_numbers<[1], [0], [0], [1], [0, 0, 1, 1], [], []>} : vector<8x512xbf16>, vector<512x128xbf16>, vector<8x128xf32> -> vector<8x128xf32>
    %c0_16 = arith.constant 0 : index
    %c0_17 = arith.constant 0 : index
    %34 = vector.load %arg5[%c0_16, %c0_17] : memref<1x128xf32, #tpu.memory_space<vmem>>, vector<1x128xf32>
    %35 = vector.broadcast %34 : vector<1x128xf32> to vector<8x128xf32>
    %36 = arith.addf %33, %35 : vector<8x128xf32>
    %cst_18 = arith.constant dense<0.000000e+00> : vector<128xf32>
    %37 = vector.multi_reduction <add>, %36, %cst_18 [0] : vector<8x128xf32> to vector<128xf32>
    %38 = vector.shape_cast %37 : vector<128xf32> to vector<1x128xf32>
    %cst_19 = arith.constant 8.000000e+00 : f32
    %39 = vector.broadcast %cst_19 : f32 to vector<1x128xf32>
    %40 = arith.divf %38, %39 : vector<1x128xf32>
    %41 = arith.mulf %36, %36 : vector<8x128xf32>
    %cst_20 = arith.constant dense<0.000000e+00> : vector<128xf32>
    %42 = vector.multi_reduction <add>, %41, %cst_20 [0] : vector<8x128xf32> to vector<128xf32>
    %43 = vector.shape_cast %42 : vector<128xf32> to vector<1x128xf32>
    %cst_21 = arith.constant 8.000000e+00 : f32
    %44 = vector.broadcast %cst_21 : f32 to vector<1x128xf32>
    %45 = arith.divf %43, %44 : vector<1x128xf32>
    %46 = arith.mulf %40, %40 : vector<1x128xf32>
    %47 = arith.subf %45, %46 : vector<1x128xf32>
    %cst_22 = arith.constant 0.000000e+00 : f32
    %48 = vector.broadcast %cst_22 : f32 to vector<1x128xf32>
    %49 = arith.maximumf %47, %48 : vector<1x128xf32>
    %50 = vector.broadcast %40 : vector<1x128xf32> to vector<8x128xf32>
    %51 = arith.subf %36, %50 : vector<8x128xf32>
    %cst_23 = arith.constant 9.99999974E-6 : f32
    %52 = vector.broadcast %cst_23 : f32 to vector<1x128xf32>
    %53 = arith.addf %49, %52 : vector<1x128xf32>
    %54 = math.rsqrt %53 : vector<1x128xf32>
    %55 = vector.broadcast %54 : vector<1x128xf32> to vector<8x128xf32>
    %56 = arith.mulf %51, %55 : vector<8x128xf32>
    %cst_24 = arith.constant 0.000000e+00 : f32
    %57 = vector.broadcast %cst_24 : f32 to vector<8x128xf32>
    %58 = arith.maximumf %56, %57 : vector<8x128xf32>
    %59 = arith.truncf %58 : vector<8x128xf32> to vector<8x128xbf16>
    %c0_25 = arith.constant 0 : index
    %c0_26 = arith.constant 0 : index
    %60 = vector.load %arg6[%c0_25, %c0_26] : memref<128x128xbf16, #tpu.memory_space<vmem>>, vector<128x128xbf16>
    %cst_27 = arith.constant dense<0.000000e+00> : vector<8x128xf32>
    %61 = tpu.matmul %59, %60, %cst_27 {dimension_numbers = #tpu.dot_dimension_numbers<[1], [0], [0], [1], [0, 0, 1, 1], [], []>} : vector<8x128xbf16>, vector<128x128xbf16>, vector<8x128xf32> -> vector<8x128xf32>
    %c0_28 = arith.constant 0 : index
    %c0_29 = arith.constant 0 : index
    %62 = vector.load %arg7[%c0_28, %c0_29] : memref<1x128xf32, #tpu.memory_space<vmem>>, vector<1x128xf32>
    %63 = vector.broadcast %62 : vector<1x128xf32> to vector<8x128xf32>
    %64 = arith.addf %61, %63 : vector<8x128xf32>
    %c0_30 = arith.constant 0 : index
    %c0_31 = arith.constant 0 : index
    %65 = vector.load %arg15[%c0_30, %c0_31] : memref<8x128xf32, #tpu.memory_space<vmem>>, vector<8x128xf32>
    tpu.vector_store %arg15[%c0_30, %c0_31], %64 {strides = array<i32>} : memref<8x128xf32, #tpu.memory_space<vmem>>, vector<8x128xf32>,
    %66 = vector.extract_strided_slice %64 {offsets = [0, 0], sizes = [8, 16], strides = [1, 1]} : vector<8x128xf32> to vector<8x16xf32>
    %67 = vector.extract_strided_slice %64 {offsets = [0, 16], sizes = [8, 16], strides = [1, 1]} : vector<8x128xf32> to vector<8x16xf32>
    %c0_32 = arith.constant 0 : index
    %c0_33 = arith.constant 0 : index
    %68 = vector.load %arg1[%c0_32, %c0_33] : memref<8x16xf32, #tpu.memory_space<vmem>>, vector<8x16xf32>
    %69 = math.exp %67 : vector<8x16xf32>
    %cst_34 = arith.constant 5.000000e-01 : f32
    %70 = vector.broadcast %cst_34 : f32 to vector<8x16xf32>
    %71 = arith.mulf %70, %69 : vector<8x16xf32>
    %72 = arith.mulf %68, %71 : vector<8x16xf32>
    %73 = arith.addf %66, %72 : vector<8x16xf32>
    %74 = arith.truncf %73 : vector<8x16xf32> to vector<8x16xbf16>
    %c0_35 = arith.constant 0 : index
    %c0_36 = arith.constant 0 : index
    %75 = vector.load %arg8[%c0_35, %c0_36] : memref<16x512xbf16, #tpu.memory_space<vmem>>, vector<16x512xbf16>
    %cst_37 = arith.constant dense<0.000000e+00> : vector<8x512xf32>
    %76 = tpu.matmul %74, %75, %cst_37 {dimension_numbers = #tpu.dot_dimension_numbers<[1], [0], [0], [1], [0, 0, 1, 1], [], []>} : vector<8x16xbf16>, vector<16x512xbf16>, vector<8x512xf32> -> vector<8x512xf32>
    %c0_38 = arith.constant 0 : index
    %c0_39 = arith.constant 0 : index
    %77 = vector.load %arg9[%c0_38, %c0_39] : memref<1x512xf32, #tpu.memory_space<vmem>>, vector<1x512xf32>
    %78 = vector.broadcast %77 : vector<1x512xf32> to vector<8x512xf32>
    %79 = arith.addf %76, %78 : vector<8x512xf32>
    %cst_40 = arith.constant dense<0.000000e+00> : vector<512xf32>
    %80 = vector.multi_reduction <add>, %79, %cst_40 [0] : vector<8x512xf32> to vector<512xf32>
    %81 = vector.shape_cast %80 : vector<512xf32> to vector<1x512xf32>
    %cst_41 = arith.constant 8.000000e+00 : f32
    %82 = vector.broadcast %cst_41 : f32 to vector<1x512xf32>
    %83 = arith.divf %81, %82 : vector<1x512xf32>
    %84 = arith.mulf %79, %79 : vector<8x512xf32>
    %cst_42 = arith.constant dense<0.000000e+00> : vector<512xf32>
    %85 = vector.multi_reduction <add>, %84, %cst_42 [0] : vector<8x512xf32> to vector<512xf32>
    %86 = vector.shape_cast %85 : vector<512xf32> to vector<1x512xf32>
    %cst_43 = arith.constant 8.000000e+00 : f32
    %87 = vector.broadcast %cst_43 : f32 to vector<1x512xf32>
    %88 = arith.divf %86, %87 : vector<1x512xf32>
    %89 = arith.mulf %83, %83 : vector<1x512xf32>
    %90 = arith.subf %88, %89 : vector<1x512xf32>
    %cst_44 = arith.constant 0.000000e+00 : f32
    %91 = vector.broadcast %cst_44 : f32 to vector<1x512xf32>
    %92 = arith.maximumf %90, %91 : vector<1x512xf32>
    %93 = vector.broadcast %83 : vector<1x512xf32> to vector<8x512xf32>
    %94 = arith.subf %79, %93 : vector<8x512xf32>
    %cst_45 = arith.constant 9.99999974E-6 : f32
    %95 = vector.broadcast %cst_45 : f32 to vector<1x512xf32>
    %96 = arith.addf %92, %95 : vector<1x512xf32>
    %97 = math.rsqrt %96 : vector<1x512xf32>
    %98 = vector.broadcast %97 : vector<1x512xf32> to vector<8x512xf32>
    %99 = arith.mulf %94, %98 : vector<8x512xf32>
    %cst_46 = arith.constant 0.000000e+00 : f32
    %100 = vector.broadcast %cst_46 : f32 to vector<8x512xf32>
    %101 = arith.maximumf %99, %100 : vector<8x512xf32>
    %102 = arith.truncf %101 : vector<8x512xf32> to vector<8x512xbf16>
    %c0_47 = arith.constant 0 : index
    %c0_48 = arith.constant 0 : index
    %103 = vector.load %arg10[%c0_47, %c0_48] : memref<512x512xbf16, #tpu.memory_space<vmem>>, vector<512x512xbf16>
    %cst_49 = arith.constant dense<0.000000e+00> : vector<8x512xf32>
    %104 = tpu.matmul %102, %103, %cst_49 {dimension_numbers = #tpu.dot_dimension_numbers<[1], [0], [0], [1], [0, 0, 1, 1], [], []>} : vector<8x512xbf16>, vector<512x512xbf16>, vector<8x512xf32> -> vector<8x512xf32>
    %c0_50 = arith.constant 0 : index
    %c0_51 = arith.constant 0 : index
    %105 = vector.load %arg11[%c0_50, %c0_51] : memref<1x512xf32, #tpu.memory_space<vmem>>, vector<1x512xf32>
    %106 = vector.broadcast %105 : vector<1x512xf32> to vector<8x512xf32>
    %107 = arith.addf %104, %106 : vector<8x512xf32>
    %cst_52 = arith.constant dense<0.000000e+00> : vector<512xf32>
    %108 = vector.multi_reduction <add>, %107, %cst_52 [0] : vector<8x512xf32> to vector<512xf32>
    %109 = vector.shape_cast %108 : vector<512xf32> to vector<1x512xf32>
    %cst_53 = arith.constant 8.000000e+00 : f32
    %110 = vector.broadcast %cst_53 : f32 to vector<1x512xf32>
    %111 = arith.divf %109, %110 : vector<1x512xf32>
    %112 = arith.mulf %107, %107 : vector<8x512xf32>
    %cst_54 = arith.constant dense<0.000000e+00> : vector<512xf32>
    %113 = vector.multi_reduction <add>, %112, %cst_54 [0] : vector<8x512xf32> to vector<512xf32>
    %114 = vector.shape_cast %113 : vector<512xf32> to vector<1x512xf32>
    %cst_55 = arith.constant 8.000000e+00 : f32
    %115 = vector.broadcast %cst_55 : f32 to vector<1x512xf32>
    %116 = arith.divf %114, %115 : vector<1x512xf32>
    %117 = arith.mulf %111, %111 : vector<1x512xf32>
    %118 = arith.subf %116, %117 : vector<1x512xf32>
    %cst_56 = arith.constant 0.000000e+00 : f32
    %119 = vector.broadcast %cst_56 : f32 to vector<1x512xf32>
    %120 = arith.maximumf %118, %119 : vector<1x512xf32>
    %121 = vector.broadcast %111 : vector<1x512xf32> to vector<8x512xf32>
    %122 = arith.subf %107, %121 : vector<8x512xf32>
    %cst_57 = arith.constant 9.99999974E-6 : f32
    %123 = vector.broadcast %cst_57 : f32 to vector<1x512xf32>
    %124 = arith.addf %120, %123 : vector<1x512xf32>
    %125 = math.rsqrt %124 : vector<1x512xf32>
    %126 = vector.broadcast %125 : vector<1x512xf32> to vector<8x512xf32>
    %127 = arith.mulf %122, %126 : vector<8x512xf32>
    %cst_58 = arith.constant 0.000000e+00 : f32
    %128 = vector.broadcast %cst_58 : f32 to vector<8x512xf32>
    %129 = arith.maximumf %127, %128 : vector<8x512xf32>
    %130 = arith.truncf %129 : vector<8x512xf32> to vector<8x512xbf16>
    %c0_59 = arith.constant 0 : index
    %c0_60 = arith.constant 0 : index
    %131 = vector.load %arg12[%c0_59, %c0_60] : memref<512x256xbf16, #tpu.memory_space<vmem>>, vector<512x256xbf16>
    %cst_61 = arith.constant dense<0.000000e+00> : vector<8x256xf32>
    %132 = tpu.matmul %130, %131, %cst_61 {dimension_numbers = #tpu.dot_dimension_numbers<[1], [0], [0], [1], [0, 0, 1, 1], [], []>} : vector<8x512xbf16>, vector<512x256xbf16>, vector<8x256xf32> -> vector<8x256xf32>
    %c0_62 = arith.constant 0 : index
    %c0_63 = arith.constant 0 : index
    %133 = vector.load %arg13[%c0_62, %c0_63] : memref<1x256xf32, #tpu.memory_space<vmem>>, vector<1x256xf32>
    %134 = vector.broadcast %133 : vector<1x256xf32> to vector<8x256xf32>
    %135 = arith.addf %132, %134 : vector<8x256xf32>
    %136 = arith.negf %135 : vector<8x256xf32>
    %137 = math.exp %136 : vector<8x256xf32>
    %cst_64 = arith.constant 1.000000e+00 : f32
    %138 = vector.broadcast %cst_64 : f32 to vector<8x256xf32>
    %139 = arith.addf %138, %137 : vector<8x256xf32>
    %140 = arith.divf %138, %139 : vector<8x256xf32>
    %cst_65 = arith.constant 1.307000e-01 : f32
    %141 = vector.broadcast %cst_65 : f32 to vector<8x256xf32>
    %142 = arith.subf %140, %141 : vector<8x256xf32>
    %cst_66 = arith.constant 3.24569941 : f32
    %143 = vector.broadcast %cst_66 : f32 to vector<8x256xf32>
    %144 = arith.mulf %142, %143 : vector<8x256xf32>
    %c0_67 = arith.constant 0 : index
    %c0_68 = arith.constant 0 : index
    %145 = vector.load %arg14[%c0_67, %c0_68] : memref<8x256xf32, #tpu.memory_space<vmem>>, vector<8x256xf32>
    tpu.vector_store %arg14[%c0_67, %c0_68], %144 {strides = array<i32>} : memref<8x256xf32, #tpu.memory_space<vmem>>, vector<8x256xf32>,
    return
  }
}

</mosaic_0001>

<bundles_post_ra>
// kernel: tpu_custom_call.1
= control target key start
LH: loop header
LB: loop body
LE: loop exit
PB: predicated region body
PF: predicated region fallthrough
CT: control target
= control target key end

     0   :  { %21 = vsyncpa [#allocation3], 0  ;;  %s5541_s0 = inlined_call_operand.hbm [shape: bf16[8,256], index: 0, kind: input, shape index: {}]   ;;  %s5542_s1 = inlined_call_operand.hbm [shape: f32[8,16], index: 1, kind: input, shape index: {}]   ;;  %s5543_s2 = inlined_call_operand.hbm [shape: bf16[256,512], index: 2, kind: input, shape index: {}]   ;;  %s5544_s3 = inlined_call_operand.hbm [shape: f32[1,512], index: 3, kind: input, shape index: {}]   ;;  %s5545_s4 = inlined_call_operand.hbm [shape: bf16[512,128], index: 4, kind: input, shape index: {}]   ;;  %s5546_s5 = inlined_call_operand.hbm [shape: f32[1,128], index: 5, kind: input, shape index: {}]   ;;  %s5547_s6 = inlined_call_operand.hbm [shape: bf16[128,128], index: 6, kind: input, shape index: {}]   ;;  %s5548_s7 = inlined_call_operand.hbm [shape: f32[1,128], index: 7, kind: input, shape index: {}]   ;;  %s5549_s8 = inlined_call_operand.hbm [shape: bf16[16,512], index: 8, kind: input, shape index: {}]   ;;  %s5550_s9 = inlined_call_operand.vmem [shape: f32[1,512], index: 9, kind: input, shape index: {}]   ;;  %s5551_s10 = inlined_call_operand.hbm [shape: bf16[512,512], index: 10, kind: input, shape index: {}]   ;;  %s5552_s11 = inlined_call_operand.vmem [shape: f32[1,512], index: 11, kind: input, shape index: {}]   ;;  %s5553_s12 = inlined_call_operand.hbm [shape: bf16[512,256], index: 12, kind: input, shape index: {}]   ;;  %s5554_s13 = inlined_call_operand.vmem [shape: f32[1,256], index: 13, kind: input, shape index: {}]   ;;  %s5555_s14 = inlined_call_operand.hbm [shape: f32[8,256], index: 14, kind: output, shape index: {0}]   ;;  %s5556_s15 = inlined_call_operand.hbm [shape: f32[8,128], index: 15, kind: output, shape index: {1}]  }
   0x1   :  { %22 = vsyncpa [#allocation6], 0 }
   0x2   :  { %23 = vsyncpa [#allocation9], 0 }
   0x3   :  { %24 = vsyncpa [#allocation12], 0 }
   0x4   :  { %25 = vsyncpa [#allocation15], 0 }
   0x5   :  { %26 = vsyncpa [#allocation18], 0 }
   0x6   :  { %27 = vsyncpa [#allocation4], 0  ;;  %s45_s20 = sshll.u32 %s5542_s1, 4  ;;  %s46_s20 = int_to_ptr.hbm [resolvable:$true] %s45_s20 }
   0x7   :  { %28 = vsyncpa [#allocation22], 0  ;;  %s5117_s21 = smov [#allocation5]   ;;  %s69_s25 = sshll.u32 %s5544_s3, 4  ;;  %s70_s25 = int_to_ptr.hbm [resolvable:$true] %s69_s25 }
   0x8   :  { %s47_s22 = sshll.u32 %s5117_s21, 4  ;;  %s5118_s26 = smov [#allocation8]   ;;  %s48_s22 = int_to_ptr.vmem [resolvable:$true] %s47_s22 }
   0x9   :  { %50 = dma.hbm_to_vmem [thread:$0]  %s46_s20, 128, %s48_s22, [#allocation6]  }
   0xa   :  { %s71_s27 = sshll.u32 %s5118_s26, 4  ;;  %s93_s30 = sshll.u32 %s5546_s5, 4  ;;  %s72_s27 = int_to_ptr.vmem [resolvable:$true] %s71_s27  ;;  %s94_s30 = int_to_ptr.hbm [resolvable:$true] %s93_s30 }
   0xb   :  { %74 = dma.hbm_to_vmem [thread:$0]  %s70_s25, 64, %s72_s27, [#allocation9]  }
   0xc   :  { %s117_s17 = sshll.u32 %s5548_s7, 4  ;;  %s5119_s18 = smov [#allocation11]   ;;  %s118_s17 = int_to_ptr.hbm [resolvable:$true] %s117_s17 }
   0xd   :  { %s95_s19 = sshll.u32 %s5119_s18, 4  ;;  %s5120_s3 = smov [#allocation14]   ;;  %s96_s19 = int_to_ptr.vmem [resolvable:$true] %s95_s19 }
   0xe   :  { %98 = dma.hbm_to_vmem [thread:$0]  %s94_s30, 16, %s96_s19, [#allocation12]  }
   0xf   :  { %s119_s20 = sshll.u32 %s5120_s3, 4  ;;  %s142_s5 = sshll.u32 %s5551_s10, 4  ;;  %s120_s20 = int_to_ptr.vmem [resolvable:$true] %s119_s20  ;;  %s143_s5 = int_to_ptr.hbm [resolvable:$true] %s142_s5 }
  0x10   :  { %122 = dma.hbm_to_vmem [thread:$0]  %s118_s17, 16, %s120_s20, [#allocation15]  }
  0x11   :  { %s5121_s23 = smov [#allocation17]   ;;  %s34_s7 = sshll.u32 %s5541_s0, 4  ;;  %s35_s7 = int_to_ptr.hbm [resolvable:$true] %s34_s7 }
  0x12   :  { %s144_s24 = sshll.u32 %s5121_s23, 4  ;;  %s5122_s27 = smov 256   ;;  %s145_s24 = int_to_ptr.vmem [resolvable:$true] %s144_s24 }
  0x13   :  { %s5123_s28 = smov 16   ;;  %s5124_s29 = smov [#allocation2]  }
  0x14   :  { %150 = dma.hbm_to_vmem [thread:$0]  %s143_s5, 16384, %s145_s24, [#allocation18], %s5122_s27, %s5122_s27, %s5123_s28  }
  0x15   :  { %s36_s30 = sshll.u32 %s5124_s29, 4  ;;  %s55_s10 = sshll.u32 %s5543_s2, 4  ;;  %s37_s30 = int_to_ptr.vmem [resolvable:$true] %s36_s30  ;;  %s56_s10 = int_to_ptr.hbm [resolvable:$true] %s55_s10 }
  0x16   :  { %39 = dma.hbm_to_vmem [thread:$0]  %s35_s7, 128, %s37_s30, [#allocation3]  }
  0x17   :  { %s79_s0 = sshll.u32 %s5545_s4, 4  ;;  %s5125_s19 = smov [#allocation7]   ;;  %s80_s0 = int_to_ptr.hbm [resolvable:$true] %s79_s0 }
  0x18   :  { %s57_s3 = sshll.u32 %s5125_s19, 4  ;;  %s5126_s20 = smov [#allocation10]   ;;  %s58_s3 = int_to_ptr.vmem [resolvable:$true] %s57_s3 }
  0x19   :  { %63 = dma.hbm_to_vmem [thread:$0]  %s56_s10, 8192, %s58_s3, [#allocation6], %s5122_s27, %s5122_s27, %s5123_s28  }
  0x1a   :  { %s81_s21 = sshll.u32 %s5126_s20, 4  ;;  %s5127_s22 = smov 64   ;;  %s82_s21 = int_to_ptr.vmem [resolvable:$true] %s81_s21 }
  0x1b   :  { %s5128_s2 = smov 4   ;;  %s103_s24 = sshll.u32 %s5547_s6, 4  ;;  %s104_s24 = int_to_ptr.hbm [resolvable:$true] %s103_s24 }
  0x1c   :  { %87 = dma.hbm_to_vmem [thread:$0]  %s80_s0, 4096, %s82_s21, [#allocation9], %s5127_s22, %s5127_s22, %s5128_s2  }
  0x1d   :  { %s5129_s4 = smov [#allocation13]   ;;  %s127_s29 = sshll.u32 %s5549_s8, 4  ;;  %s128_s29 = int_to_ptr.hbm [resolvable:$true] %s127_s29 }
  0x1e   :  { %s105_s25 = sshll.u32 %s5129_s4, 4  ;;  %s5130_s30 = smov [#allocation16]   ;;  %s106_s25 = int_to_ptr.vmem [resolvable:$true] %s105_s25 }
  0x1f   :  { %111 = dma.hbm_to_vmem [thread:$0]  %s104_s24, 1024, %s106_s25, [#allocation12], %s5127_s22, %s5127_s22, %s5128_s2  }
  0x20   :  { %s129_s1 = sshll.u32 %s5130_s30, 4  ;;  %s157_s17 = sshll.u32 %s5553_s12, 4  ;;  %s130_s1 = int_to_ptr.vmem [resolvable:$true] %s129_s1  ;;  %s158_s17 = int_to_ptr.hbm [resolvable:$true] %s157_s17 }
  0x21   :  { %135 = dma.hbm_to_vmem [thread:$0]  %s128_s29, 512, %s130_s1, [#allocation15], %s5122_s27, %s5122_s27, %s5123_s28  }
  0x22   :  { %s5131_s6 = smov [#allocation19]   ;;  %s5132_s0 = smov 128  }
  0x23   :  { %s159_s18 = sshll.u32 %s5131_s6, 4  ;;  %s5133_s19 = smov 8   ;;  %s160_s18 = int_to_ptr.vmem [resolvable:$true] %s159_s18 }
  0x24   :  { %165 = dma.hbm_to_vmem [thread:$0]  %s158_s17, 8192, %s160_s18, [#allocation18], %s5132_s0, %s5132_s0, %s5133_s19  }
  0x25   :  { %5101 = dma.done.wait [#allocation3], 128  }
  0x26   :  { %5102 = vsyncadd [#allocation3], 4294967168 }
  0x27   :  { %5103 = dma.done.wait [#allocation6], 8320  }
  0x28   :  { %5104 = vsyncadd [#allocation6], 4294958976 }
  0x29   :  { %5105 = dma.done.wait [#allocation9], 4160  }
  0x2a   :  { %5106 = vsyncadd [#allocation9], 4294963136 }
  0x2b   :  { %5107 = dma.done.wait [#allocation12], 1040  }
  0x2c   :  { %5108 = vsyncadd [#allocation12], 4294966256 }
  0x2d   :  { %5109 = dma.done.wait [#allocation15], 528  }
  0x2e   :  { %5110 = vsyncadd [#allocation15], 4294966768 }
  0x2f   :  { %5111 = dma.done.wait [#allocation18], 24576  }
  0x30   :  { %5112 = vsyncadd [#allocation18], 4294942720  ;;  %v3334_v0 = vld [vmem:[#allocation7 + $0xe0] sm:$0xf]  ;;  %v4458_v1 = vld [vmem:[#allocation7 + $0xec] sm:$0xf0] }
  0x31   :  { %v3462_v2 = vld [vmem:[#allocation7 + $0x1e0] sm:$0xf]  ;;  %v3335_v3 = vor.u32 %v4458_v1, %v3334_v0  ;;  %v4490_v4 = vld [vmem:[#allocation7 + $0x1ec] sm:$0xf0]  ;;  %v4456_v5 = vld [vmem:[#allocation7 + $0xe4] sm:$0xf] }
  0x32   :  { %v3336_v6 = vld [vmem:[#allocation7 + $0xf0] sm:$0xf0]  ;;  %v3463_v7 = vor.u32 %v4490_v4, %v3462_v2  ;;  %v4488_v9 = vld [vmem:[#allocation7 + $0x1e4] sm:$0xf]  ;;  %v3318_v11 = vld [vmem:[#allocation7 + $0xc0] sm:$0xf] }
  0x33   :  { %v3339_v8 = vor.u32 %v4456_v5, %v3336_v6  ;;  %v3464_v10 = vld [vmem:[#allocation7 + $0x1f0] sm:$0xf0]  ;;  %615 = vmatpush.bf16.msra.mxu0 %v3335_v3  ;;  %v4454_v13 = vld [vmem:[#allocation7 + $0xcc] sm:$0xf0]  ;;  %v3446_v14 = vld [vmem:[#allocation7 + $0x1c0] sm:$0xf] }
  0x34   :  { %v3467_v12 = vor.u32 %v4488_v9, %v3464_v10  ;;  %v4486_v15 = vld [vmem:[#allocation7 + $0x1cc] sm:$0xf0]  ;;  %628 = vmatpush.bf16.msra.mxu1 %v3463_v7  ;;  %v3319_v16 = vor.u32 %v4454_v13, %v3318_v11  ;;  %v4452_v18 = vld [vmem:[#allocation7 + $0xc4] sm:$0xf]  ;;  %v3320_v19 = vld [vmem:[#allocation7 + $0xd0] sm:$0xf0] }
  0x35   :  { %641 = vmatpush.bf16.msra.mxu2 %v3339_v8  ;;  %v3447_v17 = vor.u32 %v4486_v15, %v3446_v14  ;;  %v4484_v20 = vld [vmem:[#allocation7 + $0x1c4] sm:$0xf]  ;;  %v3323_v21 = vor.u32 %v4452_v18, %v3320_v19  ;;  %v3448_v22 = vld [vmem:[#allocation7 + $0x1d0] sm:$0xf0]  ;;  %v3302_v23 = vld [vmem:[#allocation7 + $0xa0] sm:$0xf] }
  0x36   :  { %654 = vmatpush.bf16.msra.mxu3 %v3467_v12  ;;  %v4450_v24 = vld [vmem:[#allocation7 + $0xac] sm:$0xf0]  ;;  %v3451_v25 = vor.u32 %v4484_v20, %v3448_v22  ;;  %v3430_v26 = vld [vmem:[#allocation7 + $0x1a0] sm:$0xf]  ;;  %v4448_v28 = vld [vmem:[#allocation7 + $0xa4] sm:$0xf] }
  0x37   :  { %v4482_v27 = vld [vmem:[#allocation7 + $0x1ac] sm:$0xf0]  ;;  %616 = vmatpush.bf16.msra.mxu0 %v3319_v16  ;;  %v3303_v29 = vor.u32 %v4450_v24, %v3302_v23  ;;  %v3304_v30 = vld [vmem:[#allocation7 + $0xb0] sm:$0xf0]  ;;  %v4480_v31 = vld [vmem:[#allocation7 + $0x1a4] sm:$0xf] }
  0x38   :  { %v3432_v32 = vld [vmem:[#allocation7 + $0x1b0] sm:$0xf0]  ;;  %629 = vmatpush.bf16.msra.mxu1 %v3447_v17  ;;  %v3431_v33 = vor.u32 %v4482_v27, %v3430_v26  ;;  %v3307_v34 = vor.u32 %v4448_v28, %v3304_v30  ;;  %v3286_v35 = vld [vmem:[#allocation7 + $0x80] sm:$0xf]  ;;  %v4446_v36 = vld [vmem:[#allocation7 + $0x8c] sm:$0xf0] }
  0x39   :  { %642 = vmatpush.bf16.msra.mxu2 %v3323_v21  ;;  %v3414_v37 = vld [vmem:[#allocation7 + $0x180] sm:$0xf]  ;;  %v3435_v38 = vor.u32 %v4480_v31, %v3432_v32  ;;  %v4478_v39 = vld [vmem:[#allocation7 + $0x18c] sm:$0xf0]  ;;  %v4444_v40 = vld [vmem:[#allocation7 + $0x84] sm:$0xf]  ;;  %v3287_v44 = vor.u32 %v4446_v36, %v3286_v35 }
  0x3a   :  { %655 = vmatpush.bf16.msra.mxu3 %v3451_v25  ;;  %v3288_v41 = vld [vmem:[#allocation7 + $0x90] sm:$0xf0]  ;;  %v4476_v42 = vld [vmem:[#allocation7 + $0x184] sm:$0xf]  ;;  %v3415_v45 = vor.u32 %v4478_v39, %v3414_v37  ;;  %v3270_v47 = vld [vmem:[#allocation7 + $0x60] sm:$0xf] }
  0x3b   :  { %v3416_v43 = vld [vmem:[#allocation7 + $0x190] sm:$0xf0]  ;;  %617 = vmatpush.bf16.msra.mxu0 %v3303_v29  ;;  %v3291_v46 = vor.u32 %v4444_v40, %v3288_v41  ;;  %v4442_v48 = vld [vmem:[#allocation7 + $0x6c] sm:$0xf0]  ;;  %v3398_v49 = vld [vmem:[#allocation7 + $0x160] sm:$0xf] }
  0x3c   :  { %630 = vmatpush.bf16.msra.mxu1 %v3431_v33  ;;  %v3419_v50 = vor.u32 %v4476_v42, %v3416_v43  ;;  %v4474_v51 = vld [vmem:[#allocation7 + $0x16c] sm:$0xf0]  ;;  %v4440_v52 = vld [vmem:[#allocation7 + $0x64] sm:$0xf]  ;;  %v3272_v53 = vld [vmem:[#allocation7 + $0x70] sm:$0xf0]  ;;  %v3271_v56 = vor.u32 %v4442_v48, %v3270_v47 }
  0x3d   :  { %643 = vmatpush.bf16.msra.mxu2 %v3307_v34  ;;  %v4472_v54 = vld [vmem:[#allocation7 + $0x164] sm:$0xf]  ;;  %v3400_v55 = vld [vmem:[#allocation7 + $0x170] sm:$0xf0]  ;;  %v3399_v57 = vor.u32 %v4474_v51, %v3398_v49  ;;  %v3275_v58 = vor.u32 %v4440_v52, %v3272_v53  ;;  %v3254_v59 = vld [vmem:[#allocation7 + $0x40] sm:$0xf] }
  0x3e   :  { %656 = vmatpush.bf16.msra.mxu3 %v3435_v38  ;;  %v4438_v60 = vld [vmem:[#allocation7 + $0x4c] sm:$0xf0]  ;;  %v3382_v61 = vld [vmem:[#allocation7 + $0x140] sm:$0xf]  ;;  %v3403_v62 = vor.u32 %v4472_v54, %v3400_v55  ;;  %v4436_v0 = vld [vmem:[#allocation7 + $0x44] sm:$0xf] }
  0x3f   :  { %618 = vmatpush.bf16.msra.mxu0 %v3287_v44  ;;  %v4470_v63 = vld [vmem:[#allocation7 + $0x14c] sm:$0xf0]  ;;  %v3256_v1 = vld [vmem:[#allocation7 + $0x50] sm:$0xf0]  ;;  %v4468_v2 = vld [vmem:[#allocation7 + $0x144] sm:$0xf]  ;;  %v3255_v4 = vor.u32 %v4438_v60, %v3254_v59 }
  0x40   :  { %631 = vmatpush.bf16.msra.mxu1 %v3415_v45  ;;  %v3384_v3 = vld [vmem:[#allocation7 + $0x150] sm:$0xf0]  ;;  %v3383_v5 = vor.u32 %v4470_v63, %v3382_v61  ;;  %v3259_v6 = vor.u32 %v4436_v0, %v3256_v1  ;;  %v3238_v7 = vld [vmem:[#allocation7 + $0x20] sm:$0xf]  ;;  %v4434_v8 = vld [vmem:[#allocation7 + $0x2c] sm:$0xf0] }
  0x41   :  { %644 = vmatpush.bf16.msra.mxu2 %v3291_v46  ;;  %v3366_v9 = vld [vmem:[#allocation7 + $0x120] sm:$0xf]  ;;  %v3387_v10 = vor.u32 %v4468_v2, %v3384_v3  ;;  %v4466_v11 = vld [vmem:[#allocation7 + $0x12c] sm:$0xf0]  ;;  %v4432_v12 = vld [vmem:[#allocation7 + $0x24] sm:$0xf]  ;;  %v3239_v16 = vor.u32 %v4434_v8, %v3238_v7 }
  0x42   :  { %657 = vmatpush.bf16.msra.mxu3 %v3419_v50  ;;  %v3240_v13 = vld [vmem:[#allocation7 + $0x30] sm:$0xf0]  ;;  %v4464_v14 = vld [vmem:[#allocation7 + $0x124] sm:$0xf]  ;;  %v3222_v17 = vld [vmem:[#allocation7] sm:$0xf]  ;;  %v3367_v20 = vor.u32 %v4466_v11, %v3366_v9 }
  0x43   :  { %619 = vmatpush.bf16.msra.mxu0 %v3271_v56  ;;  %v3368_v15 = vld [vmem:[#allocation7 + $0x130] sm:$0xf0]  ;;  %v4430_v18 = vld [vmem:[#allocation7 + $0xc] sm:$0xf0]  ;;  %v3350_v19 = vld [vmem:[#allocation7 + $0x100] sm:$0xf]  ;;  %v3243_v21 = vor.u32 %v4432_v12, %v3240_v13 }
  0x44   :  { %632 = vmatpush.bf16.msra.mxu1 %v3399_v57  ;;  %v4462_v22 = vld [vmem:[#allocation7 + $0x10c] sm:$0xf0]  ;;  %v4428_v23 = vld [vmem:[#allocation7 + $0x4] sm:$0xf]  ;;  %v3371_v25 = vor.u32 %v4464_v14, %v3368_v15  ;;  %v3224_v26 = vld [vmem:[#allocation7 + $0x10] sm:$0xf0]  ;;  %v3223_v32 = vor.u32 %v4430_v18, %v3222_v17 }
  0x45   :  { %645 = vmatpush.bf16.msra.mxu2 %v3275_v58  ;;  %v213_v24 = vld [vmem:[#allocation2] sm:$0xff]  ;;  %v4460_v27 = vld [vmem:[#allocation7 + $0x104] sm:$0xf]  ;;  %v3342_v29 = vld [vmem:[#allocation7 + $0xe8] sm:$0xf]  ;;  %v3351_v37 = vor.u32 %v4462_v22, %v3350_v19  ;;  %v3227_v38 = vor.u32 %v4428_v23, %v3224_v26  ;;  %s5135_s8 = smov 112  }
  0x46   :  { %658 = vmatpush.bf16.msra.mxu3 %v3403_v62  ;;  %v3352_v28 = vld [vmem:[#allocation7 + $0x110] sm:$0xf0]  ;;  %v4459_v30 = vld [vmem:[#allocation7 + $0xf4] sm:$0xf0]  ;;  %v3470_v31 = vld [vmem:[#allocation7 + $0x1e8] sm:$0xf]  ;;  %v289_v36 = vunpack.c.l.b16 %v213_v24  ;;  %v290_v41 = vunpack.c.h.b16 %v213_v24 }
  0x47   :  { %620 = vmatpush.bf16.msra.mxu0 %v3255_v4  ;;  %v4491_v33 = vld [vmem:[#allocation7 + $0x1f4] sm:$0xf0]  ;;  %v4457_v34 = vld [vmem:[#allocation7 + $0xec] sm:$0xf]  ;;  %v3344_v35 = vld [vmem:[#allocation7 + $0xf8] sm:$0xf0]  ;;  %v3355_v42 = vor.u32 %v4460_v27, %v3352_v28  ;;  %v3343_v43 = vor.u32 %v4459_v30, %v3342_v29 }
  0x48   :  { %633 = vmatpush.bf16.msra.mxu1 %v3383_v5  ;;  %v4489_v39 = vld [vmem:[#allocation7 + $0x1ec] sm:$0xf]  ;;  %v3472_v40 = vld [vmem:[#allocation7 + $0x1f8] sm:$0xf0]  ;;  %v3471_v44 = vor.u32 %v4491_v33, %v3470_v31  ;;  %v3347_v45 = vor.u32 %v4457_v34, %v3344_v35  ;;  %v3326_v46 = vld [vmem:[#allocation7 + $0xc8] sm:$0xf]  ;;  %v5260_v50 = vpack.c.b16 %v289_v36, %v289_v36  ;;  %v5262_v54 = vpack.c.b16 %v290_v41, %v290_v41 }
  0x49   :  { %646 = vmatpush.bf16.msra.mxu2 %v3259_v6  ;;  %v4455_v47 = vld [vmem:[#allocation7 + $0xd4] sm:$0xf0]  ;;  %v3454_v48 = vld [vmem:[#allocation7 + $0x1c8] sm:$0xf]  ;;  %v3475_v49 = vor.u32 %v4489_v39, %v3472_v40  ;;  %v4453_v52 = vld [vmem:[#allocation7 + $0xcc] sm:$0xf] }
  0x4a   :  { %659 = vmatpush.bf16.msra.mxu3 %v3387_v10  ;;  %v4487_v51 = vld [vmem:[#allocation7 + $0x1d4] sm:$0xf0]  ;;  %v3328_v53 = vld [vmem:[#allocation7 + $0xd8] sm:$0xf0]  ;;  %v4485_v55 = vld [vmem:[#allocation7 + $0x1cc] sm:$0xf]  ;;  %v3327_v57 = vor.u32 %v4455_v47, %v3326_v46 }
  0x4b   :  { %621 = vmatpush.bf16.msra.mxu0 %v3239_v16  ;;  %v3456_v56 = vld [vmem:[#allocation7 + $0x1d8] sm:$0xf0]  ;;  %v3455_v58 = vor.u32 %v4487_v51, %v3454_v48  ;;  %v3331_v59 = vor.u32 %v4453_v52, %v3328_v53  ;;  %v3310_v60 = vld [vmem:[#allocation7 + $0xa8] sm:$0xf]  ;;  %v4451_v61 = vld [vmem:[#allocation7 + $0xb4] sm:$0xf0] }
  0x4c   :  { %634 = vmatpush.bf16.msra.mxu1 %v3367_v20  ;;  %v3438_v62 = vld [vmem:[#allocation7 + $0x1a8] sm:$0xf]  ;;  %v3459_v63 = vor.u32 %v4485_v55, %v3456_v56  ;;  %v4483_v0 = vld [vmem:[#allocation7 + $0x1b4] sm:$0xf0]  ;;  %v4449_v1 = vld [vmem:[#allocation7 + $0xac] sm:$0xf]  ;;  %v3311_v5 = vor.u32 %v4451_v61, %v3310_v60 }
  0x4d   :  { %647 = vmatpush.bf16.msra.mxu2 %v3243_v21  ;;  %v3312_v2 = vld [vmem:[#allocation7 + $0xb8] sm:$0xf0]  ;;  %v4481_v3 = vld [vmem:[#allocation7 + $0x1ac] sm:$0xf]  ;;  %v3439_v6 = vor.u32 %v4483_v0, %v3438_v62  ;;  %v3294_v8 = vld [vmem:[#allocation7 + $0x88] sm:$0xf] }
  0x4e   :  { %660 = vmatpush.bf16.msra.mxu3 %v3371_v25  ;;  %v3440_v4 = vld [vmem:[#allocation7 + $0x1b8] sm:$0xf0]  ;;  %v3315_v7 = vor.u32 %v4449_v1, %v3312_v2  ;;  %v4447_v9 = vld [vmem:[#allocation7 + $0x94] sm:$0xf0]  ;;  %v3422_v10 = vld [vmem:[#allocation7 + $0x188] sm:$0xf] }
  0x4f   :  { %622 = vmatpush.bf16.msra.mxu0 %v3223_v32  ;;  %v3443_v11 = vor.u32 %v4481_v3, %v3440_v4  ;;  %v4479_v12 = vld [vmem:[#allocation7 + $0x194] sm:$0xf0]  ;;  %v4445_v13 = vld [vmem:[#allocation7 + $0x8c] sm:$0xf]  ;;  %v3296_v14 = vld [vmem:[#allocation7 + $0x98] sm:$0xf0]  ;;  %v3295_v17 = vor.u32 %v4447_v9, %v3294_v8 }
  0x50   :  { %635 = vmatpush.bf16.msra.mxu1 %v3351_v37  ;;  %v4477_v15 = vld [vmem:[#allocation7 + $0x18c] sm:$0xf]  ;;  %v3424_v16 = vld [vmem:[#allocation7 + $0x198] sm:$0xf0]  ;;  %v3278_v18 = vld [vmem:[#allocation7 + $0x68] sm:$0xf]  ;;  %v3423_v20 = vor.u32 %v4479_v12, %v3422_v10  ;;  %v3299_v21 = vor.u32 %v4445_v13, %v3296_v14 }
  0x51   :  { %648 = vmatpush.bf16.msra.mxu2 %v3227_v38  ;;  %v4443_v19 = vld [vmem:[#allocation7 + $0x74] sm:$0xf0]  ;;  %v3406_v22 = vld [vmem:[#allocation7 + $0x168] sm:$0xf]  ;;  %v4441_v24 = vld [vmem:[#allocation7 + $0x6c] sm:$0xf]  ;;  %v3427_v25 = vor.u32 %v4477_v15, %v3424_v16 }
  0x52   :  { %661 = vmatpush.bf16.msra.mxu3 %v3355_v42  ;;  %623 = vmatmul.bf16.vlgmr.msra.gmra.mxu0 %v5260_v50  ;;  %v4475_v23 = vld [vmem:[#allocation7 + $0x174] sm:$0xf0]  ;;  %v3280_v26 = vld [vmem:[#allocation7 + $0x78] sm:$0xf0]  ;;  %v4473_v27 = vld [vmem:[#allocation7 + $0x16c] sm:$0xf]  ;;  %v3279_v29 = vor.u32 %v4443_v19, %v3278_v18 }
  0x53   :  { %667 = vmatpush.bf16.msrb.mxu0 %v3343_v43  ;;  %636 = vmatmul.bf16.vlgmr.msra.gmra.mxu1 %v5262_v54  ;;  %v3408_v28 = vld [vmem:[#allocation7 + $0x178] sm:$0xf0]  ;;  %v3407_v30 = vor.u32 %v4475_v23, %v3406_v22  ;;  %v3283_v31 = vor.u32 %v4441_v24, %v3280_v26  ;;  %v3262_v32 = vld [vmem:[#allocation7 + $0x48] sm:$0xf]  ;;  %v4439_v33 = vld [vmem:[#allocation7 + $0x54] sm:$0xf0] }
  0x54   :  { %680 = vmatpush.bf16.msrb.mxu1 %v3471_v44  ;;  %649 = vmatmul.bf16.vlgmr.msra.gmra.mxu2 %v5260_v50  ;;  %v3390_v34 = vld [vmem:[#allocation7 + $0x148] sm:$0xf]  ;;  %v3411_v35 = vor.u32 %v4473_v27, %v3408_v28  ;;  %v4471_v36 = vld [vmem:[#allocation7 + $0x154] sm:$0xf0]  ;;  %v4437_v37 = vld [vmem:[#allocation7 + $0x4c] sm:$0xf]  ;;  %v3263_v41 = vor.u32 %v4439_v33, %v3262_v32 }
  0x55   :  { %693 = vmatpush.bf16.msrb.mxu2 %v3347_v45  ;;  %662 = vmatmul.bf16.vlgmr.msra.gmra.mxu3 %v5262_v54  ;;  %v3264_v38 = vld [vmem:[#allocation7 + $0x58] sm:$0xf0]  ;;  %v4469_v39 = vld [vmem:[#allocation7 + $0x14c] sm:$0xf]  ;;  %v3391_v42 = vor.u32 %v4471_v36, %v3390_v34  ;;  %v3246_v44 = vld [vmem:[#allocation7 + $0x28] sm:$0xf] }
  0x56   :  { %706 = vmatpush.bf16.msrb.mxu3 %v3475_v49  ;;  %v3392_v40 = vld [vmem:[#allocation7 + $0x158] sm:$0xf0]  ;;  %v3267_v43 = vor.u32 %v4437_v37, %v3264_v38  ;;  %v4435_v45 = vld [vmem:[#allocation7 + $0x34] sm:$0xf0]  ;;  %v3374_v46 = vld [vmem:[#allocation7 + $0x128] sm:$0xf] }
  0x57   :  { %668 = vmatpush.bf16.msrb.mxu0 %v3327_v57  ;;  %v3395_v47 = vor.u32 %v4469_v39, %v3392_v40  ;;  %v4467_v48 = vld [vmem:[#allocation7 + $0x134] sm:$0xf0]  ;;  %v4433_v49 = vld [vmem:[#allocation7 + $0x2c] sm:$0xf]  ;;  %v3248_v51 = vld [vmem:[#allocation7 + $0x38] sm:$0xf0]  ;;  %v3247_v55 = vor.u32 %v4435_v45, %v3246_v44 }
  0x58   :  { %681 = vmatpush.bf16.msrb.mxu1 %v3455_v58  ;;  %v4465_v52 = vld [vmem:[#allocation7 + $0x12c] sm:$0xf]  ;;  %v3376_v53 = vld [vmem:[#allocation7 + $0x138] sm:$0xf0]  ;;  %v3375_v56 = vor.u32 %v4467_v48, %v3374_v46  ;;  %v3251_v57 = vor.u32 %v4433_v49, %v3248_v51  ;;  %v3230_v58 = vld [vmem:[#allocation7 + $0x8] sm:$0xf] }
  0x59   :  { %694 = vmatpush.bf16.msrb.mxu2 %v3331_v59  ;;  %v4431_v59 = vld [vmem:[#allocation7 + $0x14] sm:$0xf0]  ;;  %v3358_v60 = vld [vmem:[#allocation7 + $0x108] sm:$0xf]  ;;  %v3379_v61 = vor.u32 %v4465_v52, %v3376_v53  ;;  %v3232_v0 = vld [vmem:[#allocation7 + $0x18] sm:$0xf0] }
  0x5a   :  { %707 = vmatpush.bf16.msrb.mxu3 %v3459_v63  ;;  %v4463_v62 = vld [vmem:[#allocation7 + $0x114] sm:$0xf0]  ;;  %v4429_v63 = vld [vmem:[#allocation7 + $0xc] sm:$0xf]  ;;  %v3360_v2 = vld [vmem:[#allocation7 + $0x118] sm:$0xf0]  ;;  %v3231_v3 = vor.u32 %v4431_v59, %v3230_v58 }
  0x5b   :  { %669 = vmatpush.bf16.msrb.mxu0 %v3311_v5  ;;  %v4461_v1 = vld [vmem:[#allocation7 + $0x10c] sm:$0xf]  ;;  %v3359_v4 = vor.u32 %v4463_v62, %v3358_v60  ;;  %v3235_v5 = vor.u32 %v4429_v63, %v3232_v0  ;;  %v4499_v8 = vld [vmem:[#allocation10 + $0x38] sm:$0xff]  ;;  %v4498_v9 = vld [vmem:[#allocation10 + $0x30] sm:$0xff]  ;;  %s3200_s22 = sshll.u32 %s5556_s15, 4  ;;  %s3189_s4 = sshll.u32 %s5555_s14, 4  ;;  %s3201_s22 = int_to_ptr.hbm [resolvable:$true] %s3200_s22  ;;  %s3190_s4 = int_to_ptr.hbm [resolvable:$true] %s3189_s4 }
  0x5c   :  { %682 = vmatpush.bf16.msrb.mxu1 %v3439_v6  ;;  %v3363_v6 = vor.u32 %v4461_v1, %v3360_v2  ;;  %v5272_v10 = vld [vmem:[#allocation8] sm:$0xf]  ;;  %v4497_v14 = vld [vmem:[#allocation10 + $0x28] sm:$0xff]  ;;  %v4506_v16 = vld [vmem:[#allocation10 + $0x70] sm:$0xff] }
  0x5d   :  { %695 = vmatpush.bf16.msrb.mxu2 %v3315_v7  ;;  %v5134_v7 = vmov 8.0   ;;  %v4507_v12 = vld [vmem:[#allocation10 + $0x78] sm:$0xff]  ;;  %v280_v13 = vperm.slane %v5272_v10, 0  ;;  %v4496_v18 = vld [vmem:[#allocation10 + $0x20] sm:$0xff]  ;;  %v281_v22 = vperm.slane %v5272_v10, 1  ;;  %v4494_v37 = vld [vmem:[#allocation10 + $0x10] sm:$0xff] }
  0x5e   :  { %708 = vmatpush.bf16.msrb.mxu3 %v3443_v11  ;;  %4751 = vrcp.f32 %v5134_v7  ;;  %v4492_v62 = vld [vmem:[#allocation10] sm:$0xff]  ;;  %v4515_v1 = vld [vmem:[#allocation10 + $0xb8] sm:$0xff] }
  0x5f   :  { %670 = vmatpush.bf16.msrb.mxu0 %v3295_v17 }
  0x60   :  { %683 = vmatpush.bf16.msrb.mxu1 %v3423_v20 }
  0x61   :  { %696 = vmatpush.bf16.msrb.mxu2 %v3299_v21  ;;  %v4505_v21 = vld [vmem:[#allocation10 + $0x68] sm:$0xff] }
  0x62   :  { %709 = vmatpush.bf16.msrb.mxu3 %v3427_v25  ;;  %v4495_v25 = vld [vmem:[#allocation10 + $0x18] sm:$0xff] }
  0x63   :  { %671 = vmatpush.bf16.msrb.mxu0 %v3279_v29 }
  0x64   :  { %684 = vmatpush.bf16.msrb.mxu1 %v3407_v30  ;;  %v4752_v11 = vpop.eup %4751  ;;  %v4504_v30 = vld [vmem:[#allocation10 + $0x60] sm:$0xff] }
  0x65   :  { %697 = vmatpush.bf16.msrb.mxu2 %v3283_v31  ;;  %v744_v15 = vmul.f32 8.0, %v4752_v11  ;;  %vm748_vm0 = vweird.f32 %v4752_v11 }
  0x66   :  { %710 = vmatpush.bf16.msrb.mxu3 %v3411_v35 }
  0x67   :  { %672 = vmatpush.bf16.msrb.mxu0 %v3263_v41  ;;  %v745_v19 = vsub.f32 1.0, %v744_v15 }
  0x68   :  { %685 = vmatpush.bf16.msrb.mxu1 %v3391_v42  ;;  %v4503_v42 = vld [vmem:[#allocation10 + $0x58] sm:$0xff] }
  0x69   :  { %698 = vmatpush.bf16.msrb.mxu2 %v3267_v43  ;;  %v746_v26 = vmul.f32 %v4752_v11, %v745_v19  ;;  %v4513_v19 = vld [vmem:[#allocation10 + $0xa8] sm:$0xff] }
  0x6a   :  { %711 = vmatpush.bf16.msrb.mxu3 %v3395_v47  ;;  %v4493_v47 = vld [vmem:[#allocation10 + $0x8] sm:$0xff] }
  0x6b   :  { %673 = vmatpush.bf16.msrb.mxu0 %v3247_v55  ;;  %v747_v38 = vadd.f32 %v4752_v11, %v746_v26 }
  0x6c   :  { %686 = vmatpush.bf16.msrb.mxu1 %v3375_v56  ;;  %v4502_v56 = vld [vmem:[#allocation10 + $0x50] sm:$0xff] }
  0x6d   :  { %699 = vmatpush.bf16.msrb.mxu2 %v3251_v57  ;;  %v5287_v48 = vsel %vm748_vm0, %v4752_v11, %v747_v38  ;;  %v4514_v11 = vld [vmem:[#allocation10 + $0xb0] sm:$0xff] }
  0x6e   :  { %712 = vmatpush.bf16.msrb.mxu3 %v3379_v61 }
  0x6f   :  { %674 = vmatpush.bf16.msrb.mxu0 %v3231_v3 }
  0x70   :  { %687 = vmatpush.bf16.msrb.mxu1 %v3359_v4  ;;  %v4501_v4 = vld [vmem:[#allocation10 + $0x48] sm:$0xff] }
  0x71   :  { %700 = vmatpush.bf16.msrb.mxu2 %v3235_v5 }
  0x72   :  { %713 = vmatpush.bf16.msrb.mxu3 %v3363_v6  ;;  %675 = vmatmul.bf16.vlgmr.msrb.gmra.mxu0 %v5260_v50 }
  0x73   :  { %688 = vmatmul.bf16.vlgmr.msrb.gmra.mxu1 %v5262_v54  ;;  %1126 = vmatpush.bf16.msra.mxu0 %v4499_v8 }
  0x74   :  { %701 = vmatmul.bf16.vlgmr.msrb.gmra.mxu2 %v5260_v50  ;;  %1139 = vmatpush.bf16.msra.mxu1 %v4507_v12 }
  0x75   :  { %714 = vmatmul.bf16.vlgmr.msrb.gmra.mxu3 %v5262_v54  ;;  %1152 = vmatpush.bf16.msra.mxu2 %v4515_v1 }
  0x77   :  { %1127 = vmatpush.bf16.msra.mxu0 %v4498_v9 }
  0x78   :  { %1140 = vmatpush.bf16.msra.mxu1 %v4506_v16  ;;  %v4523_v16 = vld [vmem:[#allocation10 + $0xf8] sm:$0xff] }
  0x79   :  { %1153 = vmatpush.bf16.msra.mxu2 %v4514_v11  ;;  %1165 = vmatpush.bf16.msra.mxu3 %v4523_v16 }
  0x7b   :  { %1128 = vmatpush.bf16.msra.mxu0 %v4497_v14 }
  0x7c   :  { %1141 = vmatpush.bf16.msra.mxu1 %v4505_v21 }
  0x7d   :  { %1154 = vmatpush.bf16.msra.mxu2 %v4513_v19 }
  0x7f   :  { %1129 = vmatpush.bf16.msra.mxu0 %v4496_v18  ;;  %v282_v18 = vperm.slane %v5272_v10, 2 }
  0x80   :  { %1142 = vmatpush.bf16.msra.mxu1 %v4504_v30  ;;  %v4521_v30 = vld [vmem:[#allocation10 + $0xe8] sm:$0xff] }
  0x83   :  { %1130 = vmatpush.bf16.msra.mxu0 %v4495_v25 }
  0x84   :  { %1143 = vmatpush.bf16.msra.mxu1 %v4503_v42 }
  0x87   :  { %1131 = vmatpush.bf16.msra.mxu0 %v4494_v37 }
  0x88   :  { %1144 = vmatpush.bf16.msra.mxu1 %v4502_v56  ;;  %v4519_v56 = vld [vmem:[#allocation10 + $0xd8] sm:$0xff] }
  0x8b   :  { %1132 = vmatpush.bf16.msra.mxu0 %v4493_v47  ;;  %v4510_v47 = vld [vmem:[#allocation10 + $0x90] sm:$0xff] }
  0x8c   :  { %1145 = vmatpush.bf16.msra.mxu1 %v4501_v4 }
  0x8f   :  { %1133 = vmatpush.bf16.msra.mxu0 %v4492_v62 }
  0xcf   :  { %v624_v50 = vpop.f32.mrf.mxu0 }
  0xd0   :  { %v625_v17 = vadd.f32 %v624_v50, %v280_v13  ;;  %v637_v54 = vpop.f32.mrf.mxu1  ;;  %v4500_v13 = vld [vmem:[#allocation10 + $0x40] sm:$0xff] }
  0xd1   :  { %1146 = vmatpush.bf16.msra.mxu1 %v4500_v13 }
  0xd2   :  { %v5275_v20 = vadd.f32 %v637_v54, %v625_v17 }
  0xd4   :  { %v719_v23 = vrot.slane %v5275_v20, 4  ;;  %v754_v24 = vmul.f32 %v5275_v20, %v5275_v20 }
  0xd6   :  { %v720_v27 = vadd.f32 %v719_v23, %v5275_v20  ;;  %v758_v28 = vrot.slane %v754_v24, 4 }
  0xd7   :  { %v650_v29 = vpop.f32.mrf.mxu2  ;;  %v626_v33 = vpop.f32.mrf.mxu0 }
  0xd8   :  { %v651_v31 = vadd.f32 %v650_v29, %v281_v22  ;;  %v663_v32 = vpop.f32.mrf.mxu3  ;;  %v721_v34 = vrot.slane %v720_v27, 2  ;;  %v759_v35 = vadd.f32 %v758_v28, %v754_v24  ;;  %v639_v36 = vpop.f32.mrf.mxu1  ;;  %v4522_v22 = vld [vmem:[#allocation10 + $0xf0] sm:$0xff] }
  0xd9   :  { %1166 = vmatpush.bf16.msra.mxu3 %v4522_v22 }
  0xda   :  { %v5282_v39 = vadd.f32 %v663_v32, %v651_v31  ;;  %v722_v40 = vadd.f32 %v721_v34, %v720_v27  ;;  %v760_v41 = vrot.slane %v759_v35, 2  ;;  %v4512_v27 = vld [vmem:[#allocation10 + $0xa0] sm:$0xff]  ;;  %v283_v32 = vperm.slane %v5272_v10, 3  ;;  %v4511_v34 = vld [vmem:[#allocation10 + $0x98] sm:$0xff] }
  0xdb   :  { %1155 = vmatpush.bf16.msra.mxu2 %v4512_v27 }
  0xdc   :  { %v725_v43 = vrot.slane %v5282_v39, 4  ;;  %v755_v44 = vmul.f32 %v5282_v39, %v5282_v39  ;;  %v723_v45 = vrot.slane %v722_v40, 1  ;;  %v761_v46 = vadd.f32 %v760_v41, %v759_v35 }
  0xdd   :  { %1167 = vmatpush.bf16.msra.mxu3 %v4521_v30 }
  0xde   :  { %v726_v49 = vadd.f32 %v725_v43, %v5282_v39  ;;  %v764_v51 = vrot.slane %v755_v44, 4  ;;  %v724_v52 = vadd.f32 %v723_v45, %v722_v40  ;;  %v762_v53 = vrot.slane %v761_v46, 1  ;;  %v4520_v40 = vld [vmem:[#allocation10 + $0xe0] sm:$0xff] }
  0xdf   :  { %v652_v55 = vpop.f32.mrf.mxu2  ;;  %1156 = vmatpush.bf16.msra.mxu2 %v4511_v34 }
  0xe0   :  { %v727_v57 = vrot.slane %v726_v49, 2  ;;  %v765_v58 = vadd.f32 %v764_v51, %v755_v44  ;;  %v665_v59 = vpop.f32.mrf.mxu3  ;;  %v5291_v60 = vmul.f32 %v5287_v48, %v724_v52  ;;  %v763_v61 = vadd.f32 %v762_v53, %v761_v46 }
  0xe1   :  { %1168 = vmatpush.bf16.msra.mxu3 %v4520_v40 }
  0xe2   :  { %v728_v63 = vadd.f32 %v727_v57, %v726_v49  ;;  %v766_v0 = vrot.slane %v765_v58, 2  ;;  %v782_v2 = vmul.f32 %v763_v61, %v5287_v48  ;;  %v786_v3 = vmul.f32 %v5291_v60, %v5291_v60 }
  0xe3   :  { %1157 = vmatpush.bf16.msra.mxu2 %v4510_v47  ;;  %v798_v1 = vsub.f32 %v5275_v20, %v5291_v60 }
  0xe4   :  { %v729_v5 = vrot.slane %v728_v63, 1  ;;  %v767_v6 = vadd.f32 %v766_v0, %v765_v58  ;;  %v790_v7 = vsub.f32 %v782_v2, %v786_v3  ;;  %v4509_v0 = vld [vmem:[#allocation10 + $0x88] sm:$0xff] }
  0xe5   :  { %1169 = vmatpush.bf16.msra.mxu3 %v4519_v56 }
  0xe6   :  { %v730_v8 = vadd.f32 %v729_v5, %v728_v63  ;;  %v768_v9 = vrot.slane %v767_v6, 1  ;;  %v794_v12 = vmax.f32 %v790_v7, 0.0 }
  0xe7   :  { %1158 = vmatpush.bf16.msra.mxu2 %v4509_v0 }
  0xe8   :  { %v5297_v14 = vmul.f32 %v5287_v48, %v730_v8  ;;  %v769_v15 = vadd.f32 %v768_v9, %v767_v6  ;;  %v802_v50 = vadd.f32 1e-05, %v794_v12  ;;  %v4518_v9 = vld [vmem:[#allocation10 + $0xd0] sm:$0xff] }
  0xe9   :  { %1170 = vmatpush.bf16.msra.mxu3 %v4518_v9 }
  0xea   :  { %v783_v17 = vmul.f32 %v769_v15, %v5287_v48  ;;  %v787_v54 = vmul.f32 %v5297_v14, %v5297_v14  ;;  %4753 = vrsqrt.f32 %v802_v50  ;;  %vm812_vm1 = vweird.f32 %v802_v50 }
  0xeb   :  { %v799_v27 = vsub.f32 %v5282_v39, %v5297_v14 }
  0xec   :  { %v791_v21 = vsub.f32 %v783_v17, %v787_v54 }
  0xee   :  { %v795_v24 = vmax.f32 %v791_v21, 0.0 }
  0xef   :  { %v676_v23 = vpop.f32.mrf.mxu0 }
  0xf0   :  { %v677_v25 = vadd.f32 %v676_v23, %v282_v18  ;;  %v689_v26 = vpop.f32.mrf.mxu1  ;;  %v5303_v28 = vadd.f32 1e-05, %v795_v24  ;;  %v4754_v31 = vpop.eup %4753  ;;  %v4517_v23 = vld [vmem:[#allocation10 + $0xc8] sm:$0xff] }
  0xf1   :  { %v807_v33 = vmul.f32 %v4754_v31, %v802_v50  ;;  %vm813_vm2 = vweird.f32 %v4754_v31  ;;  %v4508_v50 = vld [vmem:[#allocation10 + $0x80] sm:$0xff]  ;;  %1171 = vmatpush.bf16.msra.mxu3 %v4517_v23 }
  0xf2   :  { %v5305_v29 = vadd.f32 %v689_v26, %v677_v25  ;;  %4755 = vrsqrt.f32 %v5303_v28  ;;  %vm814_vm3 = vmor %vm812_vm1, %vm813_vm2  ;;  %vm822_vm4 = vweird.f32 %v5303_v28  ;;  %1159 = vmatpush.bf16.msra.mxu2 %v4508_v50  ;;  %v4531_v50 = vld [vmem:[#allocation13 + $0x38] sm:$0xff] }
  0xf3   :  { %v808_v37 = vmul.f32 %v4754_v31, %v807_v33  ;;  %v4516_v33 = vld [vmem:[#allocation10 + $0xc0] sm:$0xff]  ;;  %1279 = vmatpush.bf16.msrb.mxu0 %v4531_v50  ;;  %v4533_v50 = vld [vmem:[#allocation16 + $0xc] sm:$0xf] }
  0xf4   :  { %v731_v35 = vrot.slane %v5305_v29, 4  ;;  %v756_v36 = vmul.f32 %v5305_v29, %v5305_v29  ;;  %v4527_v23 = vld [vmem:[#allocation13 + $0x18] sm:$0xff] }
  0xf5   :  { %v809_v45 = vmul.f32 0.5, %v808_v37  ;;  %1172 = vmatpush.bf16.msra.mxu3 %v4516_v33 }
  0xf6   :  { %v732_v41 = vadd.f32 %v731_v35, %v5305_v29  ;;  %v770_v42 = vrot.slane %v756_v36, 4 }
  0xf7   :  { %v702_v38 = vpop.f32.mrf.mxu2  ;;  %v678_v10 = vpop.f32.mrf.mxu0  ;;  %v810_v55 = vsub.f32 1.5, %v809_v45 }
  0xf8   :  { %v703_v43 = vadd.f32 %v702_v38, %v283_v32  ;;  %v715_v44 = vpop.f32.mrf.mxu3  ;;  %v691_v46 = vpop.f32.mrf.mxu1  ;;  %v733_v49 = vrot.slane %v732_v41, 2  ;;  %v771_v51 = vadd.f32 %v770_v42, %v756_v36 }
  0xf9   :  { %v4756_v53 = vpop.eup %4755  ;;  %v811_v61 = vmul.f32 %v4754_v31, %v810_v55 }
  0xfa   :  { %v5313_v52 = vadd.f32 %v715_v44, %v703_v43  ;;  %v817_v57 = vmul.f32 %v4756_v53, %v5303_v28  ;;  %v734_v58 = vadd.f32 %v733_v49, %v732_v41  ;;  %v772_v59 = vrot.slane %v771_v51, 2 }
  0xfb   :  { %v815_v5 = vsel %vm814_vm3, %v4754_v31, %v811_v61  ;;  %vm823_vm5 = vweird.f32 %v4756_v53 }
  0xfc   :  { %v737_v62 = vrot.slane %v5313_v52, 4  ;;  %v757_v63 = vmul.f32 %v5313_v52, %v5313_v52  ;;  %v818_v2 = vmul.f32 %v4756_v53, %v817_v57  ;;  %v735_v3 = vrot.slane %v734_v58, 1  ;;  %vm824_vm7 = vmor %vm822_vm4, %vm823_vm5 }
  0xfd   :  { %v773_v4 = vadd.f32 %v772_v59, %v771_v51  ;;  %v846_v11 = vmul.f32 %v815_v5, %v798_v1  ;;  %vm1338_vm4 = vcmask 130048  }
  0xfe   :  { %v738_v6 = vadd.f32 %v737_v62, %v5313_v52  ;;  %v776_v7 = vrot.slane %v757_v63, 4  ;;  %v819_v12 = vmul.f32 0.5, %v818_v2  ;;  %v736_v13 = vadd.f32 %v735_v3, %v734_v58 }
  0xff   :  { %v704_v8 = vpop.f32.mrf.mxu2  ;;  %v774_v15 = vrot.slane %v773_v4, 1  ;;  %vm850_vm6 = vcmp.gt.f32.partialorder %v846_v11, 0.0  ;;  %v854_v22 = vmul.f32 0.01, %v846_v11 }
 0x100   :  { %v717_v16 = vpop.f32.mrf.mxu3  ;;  %v739_v20 = vrot.slane %v738_v6, 2  ;;  %v777_v60 = vadd.f32 %v776_v7, %v757_v63  ;;  %v820_v17 = vsub.f32 1.5, %v819_v12  ;;  %v752_v54 = vmul.f32 %v5287_v48, %v736_v13 }
 0x101   :  { %v775_v18 = vadd.f32 %v774_v15, %v773_v4  ;;  %v858_v32 = vsel %vm850_vm6, %v846_v11, %v854_v22 }
 0x102   :  { %v740_v19 = vadd.f32 %v739_v20, %v738_v6  ;;  %v778_v21 = vrot.slane %v777_v60, 2  ;;  %v821_v24 = vmul.f32 %v4756_v53, %v820_v17  ;;  %v788_v26 = vmul.f32 %v752_v54, %v752_v54  ;;  %v4530_v17 = vld [vmem:[#allocation13 + $0x30] sm:$0xff] }
 0x103   :  { %v784_v25 = vmul.f32 %v775_v18, %v5287_v48  ;;  %v862_v36 = vpack.c.bf16 %v858_v32, %v858_v32  ;;  %v800_v62 = vsub.f32 %v5305_v29, %v752_v54  ;;  %1280 = vmatpush.bf16.msrb.mxu0 %v4530_v17  ;;  %v4749_v54 = vld [vmem:[#allocation11] ss:$0 sm:$0xff] }
 0x104   :  { %v741_v30 = vrot.slane %v740_v19, 1  ;;  %v779_v31 = vadd.f32 %v778_v21, %v777_v60  ;;  %v825_v34 = vsel %vm824_vm7, %v4756_v53, %v821_v24  ;;  %v3648_v17 = vld [vmem:[#allocation16 + $0x18] sm:$0xf0] }
 0x105   :  { %v792_v35 = vsub.f32 %v784_v25, %v788_v26  ;;  %v847_v37 = vmul.f32 %v825_v34, %v799_v27  ;;  %1134 = vmatmul.bf16.vlgmr.msra.gmra.mxu0 %v862_v36 }
 0x106   :  { %v742_v38 = vadd.f32 %v741_v30, %v740_v19  ;;  %v780_v40 = vrot.slane %v779_v31, 1  ;;  %v4528_v19 = vld [vmem:[#allocation13 + $0x20] sm:$0xff]  ;;  %v4526_v30 = vld [vmem:[#allocation13 + $0x10] sm:$0xff] }
 0x107   :  { %v796_v41 = vmax.f32 %v792_v35, 0.0  ;;  %vm851_vm8 = vcmp.gt.f32.partialorder %v847_v37, 0.0  ;;  %v855_v14 = vmul.f32 0.01, %v847_v37  ;;  %v4525_v35 = vld [vmem:[#allocation13 + $0x8] sm:$0xff] }
 0x108   :  { %v753_v42 = vmul.f32 %v5287_v48, %v742_v38  ;;  %v781_v39 = vadd.f32 %v780_v40, %v779_v31 }
 0x109   :  { %v804_v28 = vadd.f32 1e-05, %v796_v41  ;;  %v859_v10 = vsel %vm851_vm8, %v847_v37, %v855_v14 }
 0x10a   :  { %v785_v43 = vmul.f32 %v781_v39, %v5287_v48  ;;  %v789_v44 = vmul.f32 %v753_v42, %v753_v42  ;;  %v863_v45 = vpack.c.bf16 %v859_v10, %v859_v10  ;;  %v801_v7 = vsub.f32 %v5313_v52, %v753_v42  ;;  %v4529_v52 = vld [vmem:[#allocation13 + $0x28] sm:$0xff]  ;;  %v4524_v42 = vld [vmem:[#allocation13] sm:$0xff] }
 0x10b   :  { %4757 = vrsqrt.f32 %v804_v28  ;;  %vm832_vm10 = vweird.f32 %v804_v28  ;;  %1281 = vmatpush.bf16.msrb.mxu0 %v4529_v52  ;;  %v3770_v52 = vld [vmem:[#allocation17 + $0xe0] sm:$0xf] }
 0x10c   :  { %v793_v46 = vsub.f32 %v785_v43, %v789_v44  ;;  %1147 = vmatmul.bf16.vlgmr.msra.gmra.mxu1 %v863_v45 }
 0x10e   :  { %v797_v47 = vmax.f32 %v793_v46, 0.0 }
 0x10f   :  { %1282 = vmatpush.bf16.msrb.mxu0 %v4528_v19  ;;  %v3754_v19 = vld [vmem:[#allocation17 + $0xc0] sm:$0xf] }
 0x110   :  { %v805_v49 = vadd.f32 1e-05, %v797_v47 }
 0x111   :  { %v4758_v51 = vpop.eup %4757 }
 0x112   :  { %v827_v53 = vmul.f32 %v4758_v51, %v804_v28  ;;  %4759 = vrsqrt.f32 %v805_v49  ;;  %vm833_vm9 = vweird.f32 %v4758_v51  ;;  %vm842_vm14 = vweird.f32 %v805_v49 }
 0x113   :  { %vm834_vm11 = vmor %vm832_vm10, %vm833_vm9  ;;  %1283 = vmatpush.bf16.msrb.mxu0 %v4527_v23  ;;  %v3898_v23 = vld [vmem:[#allocation17 + $0x1e0] sm:$0xf] }
 0x114   :  { %v828_v55 = vmul.f32 %v4758_v51, %v827_v53 }
 0x116   :  { %v829_v56 = vmul.f32 0.5, %v828_v55 }
 0x117   :  { %1284 = vmatpush.bf16.msrb.mxu0 %v4526_v30 }
 0x118   :  { %v4760_v57 = vpop.eup %4759  ;;  %v830_v58 = vsub.f32 1.5, %v829_v56 }
 0x119   :  { %v837_v59 = vmul.f32 %v4760_v57, %v805_v49  ;;  %vm843_vm12 = vweird.f32 %v4760_v57 }
 0x11a   :  { %v831_v61 = vmul.f32 %v4758_v51, %v830_v58  ;;  %vm844_vm15 = vmor %vm842_vm14, %vm843_vm12 }
 0x11b   :  { %v838_v63 = vmul.f32 %v4760_v57, %v837_v59  ;;  %1285 = vmatpush.bf16.msrb.mxu0 %v4525_v35 }
 0x11c   :  { %v835_v0 = vsel %vm834_vm11, %v4758_v51, %v831_v61 }
 0x11d   :  { %v848_v1 = vmul.f32 %v835_v0, %v800_v62  ;;  %v839_v2 = vmul.f32 0.5, %v838_v63 }
 0x11f   :  { %v840_v3 = vsub.f32 1.5, %v839_v2  ;;  %vm852_vm13 = vcmp.gt.f32.partialorder %v848_v1, 0.0  ;;  %v856_v4 = vmul.f32 0.01, %v848_v1  ;;  %1286 = vmatpush.bf16.msrb.mxu0 %v4524_v42  ;;  %v4750_v2 = vld [vmem:[#allocation14] ss:$0 sm:$0xff] }
 0x120   :  { %v4594_v42 = vld [vmem:[#allocation17 + $0x1cc] sm:$0xf0] }
 0x121   :  { %v841_v5 = vmul.f32 %v4760_v57, %v840_v3  ;;  %v860_v6 = vsel %vm852_vm13, %v848_v1, %v856_v4 }
 0x122   :  { %v864_v8 = vpack.c.bf16 %v860_v6, %v860_v6 }
 0x123   :  { %v845_v9 = vsel %vm844_vm15, %v4760_v57, %v841_v5 }
 0x124   :  { %v849_v11 = vmul.f32 %v845_v9, %v801_v7  ;;  %1160 = vmatmul.bf16.vlgmr.msra.gmra.mxu2 %v864_v8  ;;  %v3638_v9 = vld [vmem:[#allocation16] sm:$0xf] }
 0x126   :  { %vm853_vm0 = vcmp.gt.f32.partialorder %v849_v11, 0.0  ;;  %v857_v29 = vmul.f32 0.01, %v849_v11 }
 0x128   :  { %v861_v12 = vsel %vm853_vm0, %v849_v11, %v857_v29  ;;  %v4534_v11 = vld [vmem:[#allocation16 + $0xc] sm:$0xf0]  ;;  %v4532_v29 = vld [vmem:[#allocation16 + $0x4] sm:$0xf] }
 0x129   :  { %v865_v13 = vpack.c.bf16 %v861_v12, %v861_v12  ;;  %v3639_v12 = vor.u32 %v4534_v11, %v3638_v9  ;;  %v4658_v9 = vld [vmem:[#allocation17 + $0x3cc] sm:$0xf0] }
 0x12b   :  { %1173 = vmatmul.bf16.vlgmr.msra.gmra.mxu3 %v865_v13  ;;  %v3640_v13 = vld [vmem:[#allocation16 + $0x10] sm:$0xf0]  ;;  %1349 = vmatpush.bf16.msrb.mxu1 %v3639_v12  ;;  %v4582_v12 = vld [vmem:[#allocation17 + $0x16c] sm:$0xf0] }
 0x182   :  { %v1135_v15 = vpop.f32.mrf.mxu0 }
 0x183   :  { %v1136_v21 = vadd.f32 %v4749_v54, %v1135_v15  ;;  %v3646_v15 = vld [vmem:[#allocation16 + $0x8] sm:$0xf]  ;;  %v3651_v54 = vor.u32 %v4533_v50, %v3648_v17  ;;  %v4542_v50 = vld [vmem:[#allocation17 + $0x2c] sm:$0xf0]  ;;  %v4122_v17 = vld [vmem:[#allocation17 + $0x3a0] sm:$0xf] }
 0x185   :  { %1388 = vmatpush.bf16.msra.mxu1 %v3651_v54 }
 0x189   :  { %v1148_v16 = vpop.f32.mrf.mxu1 }
 0x18a   :  { %v1137_v20 = vpop.f32.mrf.mxu0  ;;  %v1149_v22 = vadd.f32 %v1148_v16, %v1136_v21  ;;  %v4535_v16 = vld [vmem:[#allocation16 + $0x14] sm:$0xf0] }
 0x18b   :  { %v3643_v20 = vor.u32 %v4532_v29, %v3640_v13  ;;  %v3834_v29 = vld [vmem:[#allocation17 + $0x160] sm:$0xf] }
 0x18c   :  { %v3962_v13 = vld [vmem:[#allocation17 + $0x260] sm:$0xf] }
 0x18d   :  { %1362 = vmatpush.bf16.msrb.mxu2 %v3643_v20 }
 0x191   :  { %v1150_v60 = vpop.f32.mrf.mxu1 }
 0x192   :  { %v3647_v60 = vor.u32 %v4535_v16, %v3646_v15  ;;  %v3835_v15 = vor.u32 %v4582_v12, %v3834_v29  ;;  %v4614_v16 = vld [vmem:[#allocation17 + $0x26c] sm:$0xf0]  ;;  %v4012_v29 = vld [vmem:[#allocation17 + $0x2d0] sm:$0xf0]  ;;  %v4058_v12 = vld [vmem:[#allocation17 + $0x320] sm:$0xf] }
 0x193   :  { %v3963_v20 = vor.u32 %v4614_v16, %v3962_v13  ;;  %v4638_v13 = vld [vmem:[#allocation17 + $0x32c] sm:$0xf0] }
 0x194   :  { %1375 = vmatpush.bf16.msrb.mxu3 %v3647_v60  ;;  %v3674_v60 = vld [vmem:[#allocation17 + $0x20] sm:$0xf]  ;;  %v4059_v16 = vor.u32 %v4638_v13, %v4058_v12 }
 0x195   :  { %v3675_v54 = vor.u32 %v4542_v50, %v3674_v60  ;;  %v3724_v60 = vld [vmem:[#allocation17 + $0x90] sm:$0xf0] }
 0x1a7   :  { %v1161_v18 = vpop.f32.mrf.mxu2 }
 0x1a8   :  { %v1162_v24 = vadd.f32 %v1161_v18, %v1149_v22  ;;  %v4566_v18 = vld [vmem:[#allocation17 + $0xec] sm:$0xf0] }
 0x1a9   :  { %v3771_v21 = vor.u32 %v4566_v18, %v3770_v52  ;;  %v4562_v22 = vld [vmem:[#allocation17 + $0xcc] sm:$0xf0] }
 0x1aa   :  { %v3755_v30 = vor.u32 %v4562_v22, %v3754_v19  ;;  %v4654_v52 = vld [vmem:[#allocation17 + $0x3ac] sm:$0xf0]  ;;  %v3818_v19 = vld [vmem:[#allocation17 + $0x140] sm:$0xf] }
 0x1ab   :  { %2304 = vmatpush.bf16.msra.mxu2 %v3771_v21  ;;  %v4123_v18 = vor.u32 %v4654_v52, %v4122_v17  ;;  %v4578_v21 = vld [vmem:[#allocation17 + $0x14c] sm:$0xf0]  ;;  %v3946_v22 = vld [vmem:[#allocation17 + $0x240] sm:$0xf] }
 0x1ae   :  { %v1174_v25 = vpop.f32.mrf.mxu3 }
 0x1af   :  { %v1175_v26 = vadd.f32 %v1174_v25, %v1162_v24  ;;  %v1163_v27 = vpop.f32.mrf.mxu2  ;;  %v4598_v24 = vld [vmem:[#allocation17 + $0x1ec] sm:$0xf0]  ;;  %2305 = vmatpush.bf16.msra.mxu2 %v3755_v30  ;;  %v4106_v30 = vld [vmem:[#allocation17 + $0x380] sm:$0xf] }
 0x1b0   :  { %v3899_v25 = vor.u32 %v4598_v24, %v3898_v23  ;;  %v4630_v27 = vld [vmem:[#allocation17 + $0x2ec] sm:$0xf0]  ;;  %v3819_v23 = vor.u32 %v4578_v21, %v3818_v19  ;;  %v3868_v19 = vld [vmem:[#allocation17 + $0x1b0] sm:$0xf0]  ;;  %v4620_v21 = vld [vmem:[#allocation17 + $0x2a4] sm:$0xf] }
 0x1b1   :  { %v1178_v31 = vrot.slane %v1175_v26, 4  ;;  %v1185_v32 = vmul.f32 %v1175_v26, %v1175_v26  ;;  %v4610_v24 = vld [vmem:[#allocation17 + $0x24c] sm:$0xf0] }
 0x1b2   :  { %2317 = vmatpush.bf16.msra.mxu3 %v3899_v25  ;;  %v3947_v25 = vor.u32 %v4610_v24, %v3946_v22  ;;  %v4042_v24 = vld [vmem:[#allocation17 + $0x300] sm:$0xf] }
 0x1b3   :  { %v1179_v33 = vadd.f32 %v1178_v31, %v1175_v26  ;;  %v1186_v34 = vrot.slane %v1185_v32, 4 }
 0x1b5   :  { %v1180_v36 = vrot.slane %v1179_v33, 2  ;;  %v1187_v37 = vadd.f32 %v1186_v34, %v1185_v32  ;;  %v3738_v32 = vld [vmem:[#allocation17 + $0xa0] sm:$0xf]  ;;  %v1293_v34 = vld [vmem:[#allocation5] sm:$0xff] }
 0x1b6   :  { %v1176_v38 = vpop.f32.mrf.mxu3 }
 0x1b7   :  { %v1181_v40 = vadd.f32 %v1180_v36, %v1179_v33  ;;  %v1188_v41 = vrot.slane %v1187_v37, 2  ;;  %v4558_v33 = vld [vmem:[#allocation17 + $0xac] sm:$0xf0] }
 0x1b8   :  { %v3739_v35 = vor.u32 %v4558_v33, %v3738_v32  ;;  %v4650_v32 = vld [vmem:[#allocation17 + $0x38c] sm:$0xf0]  ;;  %v4564_v33 = vld [vmem:[#allocation17 + $0xe4] sm:$0xf] }
 0x1b9   :  { %v1182_v39 = vrot.slane %v1181_v40, 1  ;;  %v1189_v14 = vadd.f32 %v1188_v41, %v1187_v37  ;;  %v3882_v41 = vld [vmem:[#allocation17 + $0x1c0] sm:$0xf] }
 0x1ba   :  { %2306 = vmatpush.bf16.msra.mxu2 %v3739_v35  ;;  %v4107_v35 = vor.u32 %v4650_v32, %v4106_v30  ;;  %v4548_v32 = vld [vmem:[#allocation17 + $0x64] sm:$0xf] }
 0x1bb   :  { %v1183_v28 = vadd.f32 %v1182_v39, %v1181_v40  ;;  %v1190_v43 = vrot.slane %v1189_v14, 1  ;;  %v4010_v39 = vld [vmem:[#allocation17 + $0x2c0] sm:$0xf] }
 0x1bd   :  { %v1184_v44 = vmul.f32 %v1183_v28, %v5287_v48  ;;  %v1191_v10 = vadd.f32 %v1190_v43, %v1189_v14  ;;  %v3883_v14 = vor.u32 %v4594_v42, %v3882_v41  ;;  %v4626_v28 = vld [vmem:[#allocation17 + $0x2cc] sm:$0xf0] }
 0x1be   :  { %v4011_v43 = vor.u32 %v4626_v28, %v4010_v39  ;;  %v4606_v42 = vld [vmem:[#allocation17 + $0x22c] sm:$0xf0] }
 0x1bf   :  { %v1192_v45 = vmul.f32 %v1191_v10, %v5287_v48  ;;  %v1193_v46 = vmul.f32 %v1184_v44, %v1184_v44  ;;  %v1196_v61 = vsub.f32 %v1175_v26, %v1184_v44  ;;  %v4026_v26 = vld [vmem:[#allocation17 + $0x2e0] sm:$0xf]  ;;  %v4554_v10 = vld [vmem:[#allocation17 + $0x8c] sm:$0xf0]  ;;  %2318 = vmatpush.bf16.msra.mxu3 %v3883_v14 }
 0x1c0   :  { %v4027_v31 = vor.u32 %v4630_v27, %v4026_v26  ;;  %v3722_v44 = vld [vmem:[#allocation17 + $0x80] sm:$0xf]  ;;  %v4538_v27 = vld [vmem:[#allocation17 + $0xc] sm:$0xf0] }
 0x1c1   :  { %v1194_v47 = vsub.f32 %v1192_v45, %v1193_v46  ;;  %v3723_v45 = vor.u32 %v4554_v10, %v3722_v44  ;;  %v3866_v46 = vld [vmem:[#allocation17 + $0x1a0] sm:$0xf]  ;;  %v4646_v28 = vld [vmem:[#allocation17 + $0x36c] sm:$0xf0]  ;;  %v4560_v10 = vld [vmem:[#allocation17 + $0xc4] sm:$0xf] }
 0x1c2   :  { %2330 = vmatpush.bf16.msra.mxu0 %v4027_v31  ;;  %v3658_v26 = vld [vmem:[#allocation17] sm:$0xf] }
 0x1c3   :  { %v1195_v49 = vmax.f32 %v1194_v47, 0.0  ;;  %v4590_v47 = vld [vmem:[#allocation17 + $0x1ac] sm:$0xf0]  ;;  %2307 = vmatpush.bf16.msra.mxu2 %v3723_v45  ;;  %v3659_v31 = vor.u32 %v4538_v27, %v3658_v26  ;;  %v4090_v14 = vld [vmem:[#allocation17 + $0x360] sm:$0xf] }
 0x1c4   :  { %v4091_v44 = vor.u32 %v4646_v28, %v4090_v14  ;;  %v3756_v45 = vld [vmem:[#allocation17 + $0xd0] sm:$0xf0] }
 0x1c5   :  { %v1197_v51 = vadd.f32 1e-05, %v1195_v49  ;;  %v3994_v49 = vld [vmem:[#allocation17 + $0x2a0] sm:$0xf] }
 0x1c6   :  { %2331 = vmatpush.bf16.msra.mxu0 %v4011_v43  ;;  %v5339_v43 = vld [vmem:[%s5550_s9] sm:$0xf] }
 0x1c7   :  { %4761 = vrsqrt.f32 %v1197_v51  ;;  %vm1204_vm2 = vweird.f32 %v1197_v51  ;;  %v1311_v17 = vperm.slane %v5339_v43, 1 }
 0x1cd   :  { %v4762_v53 = vpop.eup %4761 }
 0x1ce   :  { %v1199_v55 = vmul.f32 %v4762_v53, %v1197_v51  ;;  %vm1205_vm1 = vweird.f32 %v4762_v53  ;;  %v3867_v51 = vor.u32 %v4590_v47, %v3866_v46  ;;  %v3759_v46 = vor.u32 %v4560_v10, %v3756_v45  ;;  %v3786_v47 = vld [vmem:[#allocation17 + $0x100] sm:$0xf]  ;;  %v3980_v10 = vld [vmem:[#allocation17 + $0x290] sm:$0xf0] }
 0x1cf   :  { %vm1206_vm3 = vmor %vm1204_vm2, %vm1205_vm1 }
 0x1d0   :  { %v1200_v56 = vmul.f32 %v4762_v53, %v1199_v55  ;;  %2319 = vmatpush.bf16.msra.mxu3 %v3867_v51  ;;  %v3914_v51 = vld [vmem:[#allocation17 + $0x200] sm:$0xf] }
 0x1d2   :  { %v1201_v57 = vmul.f32 0.5, %v1200_v56  ;;  %v3706_v56 = vld [vmem:[#allocation17 + $0x60] sm:$0xf] }
 0x1d4   :  { %v1202_v58 = vsub.f32 1.5, %v1201_v57  ;;  %v4550_v57 = vld [vmem:[#allocation17 + $0x6c] sm:$0xf0] }
 0x1d6   :  { %v1203_v59 = vmul.f32 %v4762_v53, %v1202_v58  ;;  %v3707_v58 = vor.u32 %v4550_v57, %v3706_v56  ;;  %v4596_v56 = vld [vmem:[#allocation17 + $0x1e4] sm:$0xf]  ;;  %v3900_v57 = vld [vmem:[#allocation17 + $0x1f0] sm:$0xf0] }
 0x1d8   :  { %v1207_v62 = vsel %vm1206_vm3, %v4762_v53, %v1203_v59  ;;  %v4622_v53 = vld [vmem:[#allocation17 + $0x2ac] sm:$0xf0]  ;;  %v4154_v59 = vld [vmem:[#allocation17 + $0x3e0] sm:$0xf]  ;;  %2308 = vmatpush.bf16.msra.mxu2 %v3707_v58 }
 0x1d9   :  { %v1208_v63 = vmul.f32 %v1207_v62, %v1196_v61  ;;  %v3995_v55 = vor.u32 %v4622_v53, %v3994_v49  ;;  %v4662_v61 = vld [vmem:[#allocation17 + $0x3ec] sm:$0xf0] }
 0x1da   :  { %v4155_v62 = vor.u32 %v4662_v61, %v4154_v59  ;;  %v4570_v49 = vld [vmem:[#allocation17 + $0x10c] sm:$0xf0]  ;;  %v3903_v59 = vor.u32 %v4596_v56, %v3900_v57  ;;  %v4628_v61 = vld [vmem:[#allocation17 + $0x2e4] sm:$0xf] }
 0x1db   :  { %v1209_v0 = vmax.f32 %v1208_v63, 0.0  ;;  %2332 = vmatpush.bf16.msra.mxu0 %v3995_v55  ;;  %v3850_v63 = vld [vmem:[#allocation17 + $0x180] sm:$0xf]  ;;  %v3787_v53 = vor.u32 %v4570_v49, %v3786_v47  ;;  %v4602_v55 = vld [vmem:[#allocation17 + $0x20c] sm:$0xf0] }
 0x1dc   :  { %v3915_v58 = vor.u32 %v4602_v55, %v3914_v51  ;;  %v3692_v55 = vld [vmem:[#allocation17 + $0x50] sm:$0xf0] }
 0x1dd   :  { %v1210_v1 = vpack.c.bf16 %v1209_v0, %v1209_v0  ;;  %v4586_v0 = vld [vmem:[#allocation17 + $0x18c] sm:$0xf0] }
 0x1df   :  { %1287 = vmatmul.bf16.vlgmr.msrb.gmra.mxu0 %v1210_v1  ;;  %v3978_v1 = vld [vmem:[#allocation17 + $0x280] sm:$0xf] }
 0x25c   :  { %v1288_v3 = vpop.f32.mrf.mxu0 }
 0x25d   :  { %v1289_v4 = vadd.f32 %v4750_v2, %v1288_v3  ;;  %v3851_v2 = vor.u32 %v4586_v0, %v3850_v63  ;;  %v4618_v3 = vld [vmem:[#allocation17 + $0x28c] sm:$0xf0]  ;;  %v4074_v63 = vld [vmem:[#allocation17 + $0x340] sm:$0xf] }
 0x25f   :  { %1292 = vst [vmem:[#allocation21] sm:$0xff] %v1289_v4  ;;  %v1294_v5 = vmul.f32 1.442695, %v1289_v4  ;;  %2320 = vmatpush.bf16.msra.mxu3 %v3851_v2  ;;  %v4556_v2 = vld [vmem:[#allocation17 + $0xa4] sm:$0xf] }
 0x261   :  { %4763 = vpow2.f32 %v1294_v5  ;;  %v3690_v5 = vld [vmem:[#allocation17 + $0x40] sm:$0xf] }
 0x263   :  { %2321 = vmatpush.bf16.msra.mxu3 %v3835_v15 }
 0x264   :  { %v1290_v6 = vpop.f32.mrf.mxu0 }
 0x265   :  { %v4546_v6 = vld [vmem:[#allocation17 + $0x4c] sm:$0xf0] }
 0x267   :  { %v4764_v7 = vpop.eup %4763  ;;  %2322 = vmatpush.bf16.msra.mxu3 %v3819_v23  ;;  %v3996_v23 = vld [vmem:[#allocation17 + $0x2b0] sm:$0xf0] }
 0x268   :  { %v1296_v8 = vmul.f32 0.5, %v4764_v7  ;;  %v4138_v7 = vld [vmem:[#allocation17 + $0x3c0] sm:$0xf]  ;;  %v3999_v30 = vor.u32 %v4620_v21, %v3996_v23 }
 0x269   :  { %v4139_v11 = vor.u32 %v4658_v9, %v4138_v7  ;;  %v4592_v7 = vld [vmem:[#allocation17 + $0x1c4] sm:$0xf] }
 0x26a   :  { %1298 = vrot.lane.b32.xlu0 %v1296_v8, %s5135_s8  ;;  %v3691_v8 = vor.u32 %v4546_v6, %v3690_v5  ;;  %v4624_v9 = vld [vmem:[#allocation17 + $0x2c4] sm:$0xf] }
 0x26b   :  { %v4015_v15 = vor.u32 %v4624_v9, %v4012_v29  ;;  %v4612_v9 = vld [vmem:[#allocation17 + $0x264] sm:$0xf] }
 0x26c   :  { %2309 = vmatpush.bf16.msra.mxu2 %v3691_v8  ;;  %v3884_v8 = vld [vmem:[#allocation17 + $0x1d0] sm:$0xf0] }
 0x270   :  { %2310 = vmatpush.bf16.msra.mxu2 %v3675_v54 }
 0x274   :  { %2311 = vmatpush.bf16.msra.mxu2 %v3659_v31 }
 0x2dc   :  { %v1299_v36 = vpop.permute.xlu0 %1298 }
 0x2dd   :  { %v1301_v37 = vmul.f32 %v1299_v36, %v1293_v34  ;;  %v3772_v34 = vld [vmem:[#allocation17 + $0xf0] sm:$0xf0] }
 0x2de   :  { %v3775_v36 = vor.u32 %v4564_v33, %v3772_v34  ;;  %v3708_v33 = vld [vmem:[#allocation17 + $0x70] sm:$0xf0]  ;;  %v1312_v34 = vperm.slane %v5339_v43, 2 }
 0x2df   :  { %v1302_v38 = vadd.f32 %v1301_v37, %v1289_v4  ;;  %v3979_v4 = vor.u32 %v4618_v3, %v3978_v1  ;;  %v3802_v37 = vld [vmem:[#allocation17 + $0x120] sm:$0xf]  ;;  %v4642_v1 = vld [vmem:[#allocation17 + $0x34c] sm:$0xf0]  ;;  %v3740_v3 = vld [vmem:[#allocation17 + $0xb0] sm:$0xf0] }
 0x2e0   :  { %v4075_v5 = vor.u32 %v4642_v1, %v4074_v63  ;;  %v3743_v6 = vor.u32 %v4556_v2, %v3740_v3  ;;  %v4580_v3 = vld [vmem:[#allocation17 + $0x164] sm:$0xf] }
 0x2e1   :  { %v1303_v40 = vpack.c.bf16 %v1302_v38, %v1302_v38  ;;  %2333 = vmatpush.bf16.msra.mxu0 %v3979_v4  ;;  %v4574_v38 = vld [vmem:[#allocation17 + $0x12c] sm:$0xf0]  ;;  %v1310_v4 = vperm.slane %v5339_v43, 0 }
 0x2e2   :  { %v3803_v41 = vor.u32 %v4574_v38, %v3802_v37  ;;  %v4156_v37 = vld [vmem:[#allocation17 + $0x3f0] sm:$0xf0] }
 0x2e3   :  { %3652 = vmatmul.msk.bf16.vlgmr.msrb.gmra.mxu1 %vm1338_vm4, %v1303_v40  ;;  %3653 = vmatmul.msk.bf16.vlgmr.msrb.gmra.mxu2 %vm1338_vm4, %v1303_v40 }
 0x2e4   :  { %3654 = vmatmul.msk.bf16.vlgmr.msrb.gmra.mxu3 %vm1338_vm4, %v1303_v40  ;;  %2343 = vmatpush.bf16.msrb.mxu1 %v4155_v62  ;;  %v4028_v62 = vld [vmem:[#allocation17 + $0x2f0] sm:$0xf0] }
 0x2e5   :  { %2334 = vmatpush.bf16.msra.mxu0 %v3963_v20  ;;  %2356 = vmatpush.bf16.msrb.mxu2 %v3775_v36  ;;  %v4031_v0 = vor.u32 %v4628_v61, %v4028_v62  ;;  %v4552_v20 = vld [vmem:[#allocation17 + $0x84] sm:$0xf]  ;;  %v4140_v62 = vld [vmem:[#allocation17 + $0x3d0] sm:$0xf0] }
 0x2e6   :  { %2323 = vmatpush.bf16.msra.mxu3 %v3803_v41  ;;  %v3727_v54 = vor.u32 %v4552_v20, %v3724_v60  ;;  %v4660_v36 = vld [vmem:[#allocation17 + $0x3e4] sm:$0xf]  ;;  %v3676_v20 = vld [vmem:[#allocation17 + $0x30] sm:$0xf0] }
 0x2e7   :  { %v4159_v41 = vor.u32 %v4660_v36, %v4156_v37  ;;  %v4656_v61 = vld [vmem:[#allocation17 + $0x3c4] sm:$0xf] }
 0x2e8   :  { %2344 = vmatpush.bf16.msrb.mxu1 %v4139_v11  ;;  %v3887_v11 = vor.u32 %v4592_v7, %v3884_v8  ;;  %v4143_v7 = vor.u32 %v4656_v61, %v4140_v62 }
 0x2e9   :  { %2335 = vmatpush.bf16.msra.mxu0 %v3947_v25  ;;  %2357 = vmatpush.bf16.msrb.mxu2 %v3759_v46  ;;  %v4634_v25 = vld [vmem:[#allocation17 + $0x30c] sm:$0xf0] }
 0x2ea   :  { %2324 = vmatpush.bf16.msra.mxu3 %v3787_v53  ;;  %v4043_v31 = vor.u32 %v4634_v25, %v4042_v24  ;;  %v4544_v53 = vld [vmem:[#allocation17 + $0x44] sm:$0xf] }
 0x2eb   :  { %v4576_v25 = vld [vmem:[#allocation17 + $0x144] sm:$0xf] }
 0x2ec   :  { %2345 = vmatpush.bf16.msrb.mxu1 %v4123_v18  ;;  %v4588_v18 = vld [vmem:[#allocation17 + $0x1a4] sm:$0xf] }
 0x2ed   :  { %2358 = vmatpush.bf16.msrb.mxu2 %v3743_v6  ;;  %v3871_v22 = vor.u32 %v4588_v18, %v3868_v19  ;;  %v4652_v18 = vld [vmem:[#allocation17 + $0x3a4] sm:$0xf]  ;;  %v4124_v19 = vld [vmem:[#allocation17 + $0x3b0] sm:$0xf0] }
 0x2ee   :  { %2369 = vmatpush.bf16.msrb.mxu3 %v3903_v59  ;;  %v3695_v59 = vor.u32 %v4544_v53, %v3692_v55 }
 0x2f0   :  { %2346 = vmatpush.bf16.msrb.mxu1 %v4107_v35  ;;  %v3711_v35 = vor.u32 %v4548_v32, %v3708_v33  ;;  %v4127_v32 = vor.u32 %v4652_v18, %v4124_v19 }
 0x2f1   :  { %2359 = vmatpush.bf16.msrb.mxu2 %v3727_v54 }
 0x2f2   :  { %2370 = vmatpush.bf16.msrb.mxu3 %v3887_v11  ;;  %v3964_v11 = vld [vmem:[#allocation17 + $0x270] sm:$0xf0] }
 0x2f3   :  { %3655 = vmatmul.msk.bf16.vlgmr.msra.gmra.mxu1 %vm1338_vm4, %v1303_v40  ;;  %v3930_v40 = vld [vmem:[#allocation17 + $0x220] sm:$0xf] }
 0x2f4   :  { %v3931_v39 = vor.u32 %v4606_v42, %v3930_v40  ;;  %2347 = vmatpush.bf16.msrb.mxu1 %v4091_v44  ;;  %v4584_v42 = vld [vmem:[#allocation17 + $0x184] sm:$0xf] }
 0x2f5   :  { %2360 = vmatpush.bf16.msrb.mxu2 %v3711_v35  ;;  %v4616_v44 = vld [vmem:[#allocation17 + $0x284] sm:$0xf]  ;;  %v3948_v35 = vld [vmem:[#allocation17 + $0x250] sm:$0xf0] }
 0x2f6   :  { %2336 = vmatpush.bf16.msra.mxu0 %v3931_v39  ;;  %2371 = vmatpush.bf16.msrb.mxu3 %v3871_v22  ;;  %v3852_v39 = vld [vmem:[#allocation17 + $0x190] sm:$0xf0]  ;;  %v3983_v51 = vor.u32 %v4616_v44, %v3980_v10 }
 0x2f7   :  { %v3855_v28 = vor.u32 %v4584_v42, %v3852_v39  ;;  %v4536_v42 = vld [vmem:[#allocation17 + $0x4] sm:$0xf]  ;;  %v3660_v39 = vld [vmem:[#allocation17 + $0x10] sm:$0xf0] }
 0x2f8   :  { %2348 = vmatpush.bf16.msrb.mxu1 %v4075_v5 }
 0x2f9   :  { %2361 = vmatpush.bf16.msrb.mxu2 %v3695_v59 }
 0x2fa   :  { %2337 = vmatpush.bf16.msra.mxu0 %v3915_v58  ;;  %v1313_v58 = vperm.slane %v5339_v43, 3  ;;  %2372 = vmatpush.bf16.msrb.mxu3 %v3855_v28 }
 0x2fc   :  { %2349 = vmatpush.bf16.msrb.mxu1 %v4059_v16  ;;  %v4540_v16 = vld [vmem:[#allocation17 + $0x24] sm:$0xf] }
 0x2fd   :  { %v3679_v54 = vor.u32 %v4540_v16, %v3676_v20  ;;  %v3932_v16 = vld [vmem:[#allocation17 + $0x230] sm:$0xf0]  ;;  %v4644_v20 = vld [vmem:[#allocation17 + $0x364] sm:$0xf] }
 0x2fe   :  { %2382 = vmatpush.bf16.msrb.mxu0 %v4031_v0 }
 0x2ff   :  { %2362 = vmatpush.bf16.msrb.mxu2 %v3679_v54  ;;  %v4092_v54 = vld [vmem:[#allocation17 + $0x370] sm:$0xf0] }
 0x300   :  { %2350 = vmatpush.bf16.msrb.mxu1 %v4043_v31 }
 0x302   :  { %2383 = vmatpush.bf16.msrb.mxu0 %v4015_v15 }
 0x304   :  { %2395 = vmatpush.bf16.msra.mxu1 %v4159_v41 }
 0x306   :  { %2384 = vmatpush.bf16.msrb.mxu0 %v3999_v30 }
 0x308   :  { %2396 = vmatpush.bf16.msra.mxu1 %v4143_v7 }
 0x30a   :  { %2385 = vmatpush.bf16.msrb.mxu0 %v3983_v51 }
 0x30c   :  { %2397 = vmatpush.bf16.msra.mxu1 %v4127_v32 }
 0x360   :  { %v1351_v50 = vpop.f32.mrf.mxu1 }
 0x361   :  { %v5343_v52 = vadd.f32 %v1351_v50, %v1310_v4  ;;  %v3836_v4 = vld [vmem:[#allocation17 + $0x170] sm:$0xf0] }
 0x362   :  { %v3839_v8 = vor.u32 %v4580_v3, %v3836_v4 }
 0x363   :  { %v1394_v26 = vrot.slane %v5343_v52, 4  ;;  %v1422_v27 = vmul.f32 %v5343_v52, %v5343_v52 }
 0x364   :  { %2373 = vmatpush.bf16.msrb.mxu3 %v3839_v8 }
 0x365   :  { %v1395_v38 = vadd.f32 %v1394_v26, %v5343_v52  ;;  %v1426_v40 = vrot.slane %v1422_v27, 4  ;;  %v3820_v26 = vld [vmem:[#allocation17 + $0x150] sm:$0xf0] }
 0x366   :  { %v1364_v14 = vpop.f32.mrf.mxu2  ;;  %v3823_v33 = vor.u32 %v4576_v25, %v3820_v26 }
 0x367   :  { %v1396_v45 = vrot.slane %v1395_v38, 2  ;;  %v1427_v46 = vadd.f32 %v1426_v40, %v1422_v27  ;;  %v5350_v47 = vadd.f32 %v1364_v14, %v1311_v17  ;;  %v1377_v49 = vpop.f32.mrf.mxu3  ;;  %v3967_v17 = vor.u32 %v4612_v9, %v3964_v11 }
 0x368   :  { %v5352_v56 = vadd.f32 %v1377_v49, %v1312_v34  ;;  %v1353_v57 = vpop.f32.mrf.mxu1  ;;  %v4608_v34 = vld [vmem:[#allocation17 + $0x244] sm:$0xf]  ;;  %2374 = vmatpush.bf16.msrb.mxu3 %v3823_v33  ;;  %v4108_v49 = vld [vmem:[#allocation17 + $0x390] sm:$0xf0] }
 0x369   :  { %v1397_v63 = vadd.f32 %v1396_v45, %v1395_v38  ;;  %v1428_v0 = vrot.slane %v1427_v46, 2  ;;  %v1400_v1 = vrot.slane %v5350_v47, 4  ;;  %v1423_v2 = vmul.f32 %v5350_v47, %v5350_v47  ;;  %2386 = vmatpush.bf16.msrb.mxu0 %v3967_v17 }
 0x36a   :  { %v1406_v5 = vrot.slane %v5352_v56, 4  ;;  %v1424_v6 = vmul.f32 %v5352_v56, %v5352_v56  ;;  %v3951_v10 = vor.u32 %v4608_v34, %v3948_v35  ;;  %v3663_v45 = vor.u32 %v4536_v42, %v3660_v39  ;;  %v4640_v35 = vld [vmem:[#allocation17 + $0x344] sm:$0xf] }
 0x36b   :  { %v1398_v29 = vrot.slane %v1397_v63, 1  ;;  %v1429_v12 = vadd.f32 %v1428_v0, %v1427_v46  ;;  %v1401_v13 = vadd.f32 %v1400_v1, %v5350_v47  ;;  %v1432_v15 = vrot.slane %v1423_v2, 4  ;;  %v4648_v46 = vld [vmem:[#allocation17 + $0x384] sm:$0xf]  ;;  %v3804_v0 = vld [vmem:[#allocation17 + $0x130] sm:$0xf0] }
 0x36c   :  { %v1407_v60 = vadd.f32 %v1406_v5, %v5352_v56  ;;  %v1438_v50 = vrot.slane %v1424_v6, 4  ;;  %2363 = vmatpush.bf16.msrb.mxu2 %v3663_v45  ;;  %v4111_v3 = vor.u32 %v4648_v46, %v4108_v49  ;;  %v4095_v34 = vor.u32 %v4644_v20, %v4092_v54  ;;  %v4636_v45 = vld [vmem:[#allocation17 + $0x324] sm:$0xf]  ;;  %v4060_v46 = vld [vmem:[#allocation17 + $0x330] sm:$0xf0] }
 0x36d   :  { %v1399_v21 = vadd.f32 %v1398_v29, %v1397_v63  ;;  %v1430_v22 = vrot.slane %v1429_v12, 1  ;;  %v1402_v23 = vrot.slane %v1401_v13, 2  ;;  %v1433_v24 = vadd.f32 %v1432_v15, %v1423_v2  ;;  %2387 = vmatpush.bf16.msrb.mxu0 %v3951_v10  ;;  %v4572_v63 = vld [vmem:[#allocation17 + $0x124] sm:$0xf] }
 0x36e   :  { %v1408_v27 = vrot.slane %v1407_v60, 2  ;;  %v1439_v30 = vadd.f32 %v1438_v50, %v1424_v6  ;;  %v1366_v31 = vpop.f32.mrf.mxu2  ;;  %2398 = vmatpush.bf16.msra.mxu1 %v4111_v3  ;;  %v4604_v15 = vld [vmem:[#allocation17 + $0x224] sm:$0xf] }
 0x36f   :  { %v5364_v36 = vmul.f32 %v1399_v21, %v5287_v48  ;;  %v1431_v37 = vadd.f32 %v1430_v22, %v1429_v12  ;;  %v1403_v38 = vadd.f32 %v1402_v23, %v1401_v13  ;;  %v1434_v40 = vrot.slane %v1433_v24, 2  ;;  %v1379_v41 = vpop.f32.mrf.mxu3  ;;  %v4568_v23 = vld [vmem:[#allocation17 + $0x104] sm:$0xf] }
 0x370   :  { %v1409_v14 = vadd.f32 %v1408_v27, %v1407_v60  ;;  %v1440_v28 = vrot.slane %v1439_v30, 2  ;;  %v1390_v44 = vpop.f32.mrf.mxu1  ;;  %v4600_v27 = vld [vmem:[#allocation17 + $0x204] sm:$0xf]  ;;  %v3935_v33 = vor.u32 %v4604_v15, %v3932_v16 }
 0x371   :  { %v1450_v51 = vmul.f32 %v1431_v37, %v5287_v48  ;;  %v1454_v53 = vmul.f32 %v5364_v36, %v5364_v36  ;;  %v1404_v55 = vrot.slane %v1403_v38, 1  ;;  %v1435_v57 = vadd.f32 %v1434_v40, %v1433_v24  ;;  %v3788_v24 = vld [vmem:[#allocation17 + $0x110] sm:$0xf0] }
 0x372   :  { %v1410_v59 = vrot.slane %v1409_v14, 1  ;;  %v1441_v61 = vadd.f32 %v1440_v28, %v1439_v30  ;;  %v5371_v62 = vadd.f32 %v1390_v44, %v1313_v58  ;;  %v3807_v58 = vor.u32 %v4572_v63, %v3804_v0  ;;  %v3916_v30 = vld [vmem:[#allocation17 + $0x210] sm:$0xf0]  ;;  %2388 = vmatpush.bf16.msrb.mxu0 %v3935_v33  ;;  %2399 = vmatpush.bf16.msra.mxu1 %v4095_v34 }
 0x373   :  { %v1458_v1 = vsub.f32 %v1450_v51, %v1454_v53  ;;  %v1405_v2 = vadd.f32 %v1404_v55, %v1403_v38  ;;  %v1436_v4 = vrot.slane %v1435_v57, 1  ;;  %v4076_v37 = vld [vmem:[#allocation17 + $0x350] sm:$0xf0]  ;;  %v3791_v41 = vor.u32 %v4568_v23, %v3788_v24 }
 0x374   :  { %v1411_v5 = vadd.f32 %v1410_v59, %v1409_v14  ;;  %v1442_v6 = vrot.slane %v1441_v61, 1  ;;  %v1412_v7 = vrot.slane %v5371_v62, 4  ;;  %v1425_v43 = vmul.f32 %v5371_v62, %v5371_v62  ;;  %2375 = vmatpush.bf16.msrb.mxu3 %v3807_v58 }
 0x375   :  { %v1462_v8 = vmax.f32 %v1458_v1, 0.0  ;;  %v5375_v9 = vmul.f32 %v1405_v2, %v5287_v48  ;;  %v1437_v11 = vadd.f32 %v1436_v4, %v1435_v57  ;;  %v3919_v14 = vor.u32 %v4600_v27, %v3916_v30  ;;  %v4632_v1 = vld [vmem:[#allocation17 + $0x304] sm:$0xf]  ;;  %v4044_v2 = vld [vmem:[#allocation17 + $0x310] sm:$0xf0] }
 0x376   :  { %v5380_v29 = vmul.f32 %v1411_v5, %v5287_v48  ;;  %v1443_v12 = vadd.f32 %v1442_v6, %v1441_v61  ;;  %v1413_v13 = vadd.f32 %v1412_v7, %v5371_v62  ;;  %v1444_v17 = vrot.slane %v1425_v43, 4  ;;  %v4563_v30 = vld [vmem:[#allocation17 + $0xd4] sm:$0xf0] }
 0x377   :  { %v5383_v60 = vadd.f32 1e-05, %v1462_v8  ;;  %v1455_v50 = vmul.f32 %v5375_v9, %v5375_v9  ;;  %v1451_v18 = vmul.f32 %v1437_v11, %v5287_v48  ;;  %v4079_v10 = vor.u32 %v4640_v35, %v4076_v37  ;;  %2389 = vmatpush.bf16.msrb.mxu0 %v3919_v14  ;;  %v4034_v14 = vld [vmem:[#allocation17 + $0x2e8] sm:$0xf] }
 0x378   :  { %v1452_v19 = vmul.f32 %v1443_v12, %v5287_v48  ;;  %v1456_v21 = vmul.f32 %v5380_v29, %v5380_v29  ;;  %v1392_v22 = vpop.f32.mrf.mxu1  ;;  %v1414_v25 = vrot.slane %v1413_v13, 2  ;;  %v1445_v26 = vadd.f32 %v1444_v17, %v1425_v43  ;;  %2376 = vmatpush.bf16.msrb.mxu3 %v3791_v41 }
 0x379   :  { %4765 = vrsqrt.f32 %v5383_v60  ;;  %v1459_v31 = vsub.f32 %v1451_v18, %v1455_v50  ;;  %2400 = vmatpush.bf16.msra.mxu1 %v4079_v10  ;;  %v4063_v61 = vor.u32 %v4636_v45, %v4060_v46  ;;  %v4047_v7 = vor.u32 %v4632_v1, %v4044_v2  ;;  %v4567_v22 = vld [vmem:[#allocation17 + $0xf4] sm:$0xf0]  ;;  %v3730_v2 = vld [vmem:[#allocation17 + $0x88] sm:$0xf] }
 0x37a   :  { %v1460_v32 = vsub.f32 %v1452_v19, %v1456_v21  ;;  %v1415_v38 = vadd.f32 %v1414_v25, %v1413_v13  ;;  %v1446_v40 = vrot.slane %v1445_v26, 2  ;;  %vm1480_vm6 = vweird.f32 %v5383_v60  ;;  %v3778_v21 = vld [vmem:[#allocation17 + $0xe8] sm:$0xf]  ;;  %v4559_v10 = vld [vmem:[#allocation17 + $0xb4] sm:$0xf0] }
 0x37b   :  { %v1463_v42 = vmax.f32 %v1459_v31, 0.0  ;;  %v1466_v20 = vsub.f32 %v5343_v52, %v5364_v36  ;;  %v3762_v36 = vld [vmem:[#allocation17 + $0xc8] sm:$0xf]  ;;  %v1468_v35 = vsub.f32 %v5352_v56, %v5380_v29  ;;  %v4627_v1 = vld [vmem:[#allocation17 + $0x2d4] sm:$0xf0] }
 0x37c   :  { %v1464_v39 = vmax.f32 %v1460_v32, 0.0  ;;  %v1416_v28 = vrot.slane %v1415_v38, 1  ;;  %v1447_v44 = vadd.f32 %v1446_v40, %v1445_v26  ;;  %v3779_v26 = vor.u32 %v4567_v22, %v3778_v21  ;;  %v3858_v21 = vld [vmem:[#allocation17 + $0x188] sm:$0xf] }
 0x37d   :  { %v1471_v49 = vadd.f32 1e-05, %v1463_v42  ;;  %2401 = vmatpush.bf16.msra.mxu1 %v4063_v61  ;;  %v1467_v32 = vsub.f32 %v5350_v47, %v5375_v9  ;;  %v3906_v42 = vld [vmem:[#allocation17 + $0x1e8] sm:$0xf] }
 0x37e   :  { %v5392_v51 = vadd.f32 1e-05, %v1464_v39  ;;  %v1417_v55 = vadd.f32 %v1416_v28, %v1415_v38  ;;  %v1448_v57 = vrot.slane %v1447_v44, 1  ;;  %v3763_v38 = vor.u32 %v4563_v30, %v3762_v36  ;;  %v4599_v39 = vld [vmem:[#allocation17 + $0x1f4] sm:$0xf0] }
 0x37f   :  { %v4766_v53 = vpop.eup %4765  ;;  %4767 = vrsqrt.f32 %v1471_v49  ;;  %vm1490_vm10 = vweird.f32 %v1471_v49  ;;  %v4631_v28 = vld [vmem:[#allocation17 + $0x2f4] sm:$0xf0]  ;;  %v3907_v29 = vor.u32 %v4599_v39, %v3906_v42  ;;  %v4146_v30 = vld [vmem:[#allocation17 + $0x3c8] sm:$0xf] }
 0x380   :  { %v1475_v59 = vmul.f32 %v4766_v53, %v5383_v60  ;;  %4769 = vrsqrt.f32 %v5392_v51  ;;  %v5397_v63 = vmul.f32 %v1417_v55, %v5287_v48  ;;  %v1449_v0 = vadd.f32 %v1448_v57, %v1447_v44  ;;  %v3746_v44 = vld [vmem:[#allocation17 + $0xa8] sm:$0xf]  ;;  %v4595_v57 = vld [vmem:[#allocation17 + $0x1d4] sm:$0xf0] }
 0x381   :  { %vm1481_vm5 = vweird.f32 %v4766_v53  ;;  %2402 = vmatpush.bf16.msra.mxu1 %v4047_v7  ;;  %vm1500_vm12 = vweird.f32 %v5392_v51  ;;  %v3747_v55 = vor.u32 %v4559_v10, %v3746_v44  ;;  %v3826_v44 = vld [vmem:[#allocation17 + $0x148] sm:$0xf]  ;;  %v4579_v10 = vld [vmem:[#allocation17 + $0x154] sm:$0xf0] }
 0x382   :  { %v1476_v3 = vmul.f32 %v4766_v53, %v1475_v59  ;;  %v1453_v4 = vmul.f32 %v1449_v0, %v5287_v48  ;;  %v1457_v5 = vmul.f32 %v5397_v63, %v5397_v63  ;;  %vm1482_vm7 = vmor %vm1480_vm6, %vm1481_vm5  ;;  %v4018_v59 = vld [vmem:[#allocation17 + $0x2c8] sm:$0xf] }
 0x383   :  { %v4019_v7 = vor.u32 %v4627_v1, %v4018_v59  ;;  %v4114_v59 = vld [vmem:[#allocation17 + $0x388] sm:$0xf] }
 0x384   :  { %v1477_v6 = vmul.f32 0.5, %v1476_v3  ;;  %v1461_v8 = vsub.f32 %v1453_v4, %v1457_v5  ;;  %v4555_v3 = vld [vmem:[#allocation17 + $0x94] sm:$0xf0] }
 0x385   :  { %v4768_v43 = vpop.eup %4767 }
 0x386   :  { %v1478_v58 = vsub.f32 1.5, %v1477_v6  ;;  %v4770_v11 = vpop.eup %4769  ;;  %v1465_v12 = vmax.f32 %v1461_v8, 0.0  ;;  %v1485_v13 = vmul.f32 %v4768_v43, %v1471_v49  ;;  %vm1491_vm8 = vweird.f32 %v4768_v43  ;;  %v3890_v49 = vld [vmem:[#allocation17 + $0x1c8] sm:$0xf] }
 0x387   :  { %v1495_v16 = vmul.f32 %v4770_v11, %v5392_v51  ;;  %vm1501_vm9 = vweird.f32 %v4770_v11  ;;  %vm1492_vm11 = vmor %vm1490_vm10, %vm1491_vm8  ;;  %v3891_v5 = vor.u32 %v4595_v57, %v3890_v49  ;;  %v3874_v6 = vld [vmem:[#allocation17 + $0x1a8] sm:$0xf]  ;;  %v3731_v8 = vor.u32 %v4555_v3, %v3730_v2 }
 0x388   :  { %v1479_v15 = vmul.f32 %v4766_v53, %v1478_v58  ;;  %v5406_v50 = vadd.f32 1e-05, %v1465_v12  ;;  %v1486_v17 = vmul.f32 %v4768_v43, %v1485_v13  ;;  %vm1502_vm13 = vmor %vm1500_vm12, %vm1501_vm9  ;;  %v4002_v58 = vld [vmem:[#allocation17 + $0x2a8] sm:$0xf]  ;;  %v1469_v13 = vsub.f32 %v5371_v62, %v5397_v63  ;;  %v4547_v63 = vld [vmem:[#allocation17 + $0x54] sm:$0xf0] }
 0x389   :  { %v1496_v18 = vmul.f32 %v4770_v11, %v1495_v16  ;;  %v4551_v16 = vld [vmem:[#allocation17 + $0x74] sm:$0xf0]  ;;  %v3698_v62 = vld [vmem:[#allocation17 + $0x48] sm:$0xf]  ;;  %v3827_v57 = vor.u32 %v4579_v10, %v3826_v44  ;;  %v4621_v44 = vld [vmem:[#allocation17 + $0x2ac] sm:$0xf] }
 0x38a   :  { %v1483_v54 = vsel %vm1482_vm7, %v4766_v53, %v1479_v15  ;;  %4771 = vrsqrt.f32 %v5406_v50  ;;  %v1487_v23 = vmul.f32 0.5, %v1486_v17  ;;  %v4035_v53 = vor.u32 %v4631_v28, %v4034_v14  ;;  %v3714_v15 = vld [vmem:[#allocation17 + $0x68] sm:$0xf] }
 0x38b   :  { %v1514_v19 = vmul.f32 %v1483_v54, %v1466_v20  ;;  %v1497_v24 = vmul.f32 0.5, %v1496_v18  ;;  %vm1510_vm15 = vweird.f32 %v5406_v50  ;;  %v4162_v18 = vld [vmem:[#allocation17 + $0x3e8] sm:$0xf] }
 0x38c   :  { %v1488_v25 = vsub.f32 1.5, %v1487_v23  ;;  %v3715_v23 = vor.u32 %v4551_v16, %v3714_v15  ;;  %v4130_v14 = vld [vmem:[#allocation17 + $0x3a8] sm:$0xf] }
 0x38d   :  { %v1518_v60 = vmax.f32 %v1514_v19, 0.0  ;;  %v1498_v27 = vsub.f32 1.5, %v1497_v24  ;;  %v4663_v19 = vld [vmem:[#allocation17 + $0x3f4] sm:$0xf0]  ;;  %v3810_v3 = vld [vmem:[#allocation17 + $0x128] sm:$0xf] }
 0x38e   :  { %v1489_v31 = vmul.f32 %v4768_v43, %v1488_v25  ;;  %v4587_v24 = vld [vmem:[#allocation17 + $0x194] sm:$0xf0]  ;;  %v3794_v15 = vld [vmem:[#allocation17 + $0x108] sm:$0xf] }
 0x38f   :  { %v5409_v52 = vpack.c.bf16 %v1518_v60, %v1518_v60  ;;  %v1499_v33 = vmul.f32 %v4770_v11, %v1498_v27  ;;  %v4619_v60 = vld [vmem:[#allocation17 + $0x294] sm:$0xf0]  ;;  %v3859_v36 = vor.u32 %v4587_v24, %v3858_v21  ;;  %v3908_v21 = vld [vmem:[#allocation17 + $0x1f8] sm:$0xf0] }
 0x390   :  { %v4772_v34 = vpop.eup %4771  ;;  %v1493_v37 = vsel %vm1492_vm11, %v4768_v43, %v1489_v31  ;;  %v4591_v43 = vld [vmem:[#allocation17 + $0x1b4] sm:$0xf0]  ;;  %v4036_v24 = vld [vmem:[#allocation17 + $0x2f8] sm:$0xf0] }
 0x391   :  { %2312 = vmatmul.bf16.vlgmr.msra.gmra.mxu2 %v5409_v52  ;;  %v1515_v40 = vmul.f32 %v1493_v37, %v1467_v32  ;;  %v1503_v41 = vsel %vm1502_vm13, %v4770_v11, %v1499_v33  ;;  %v1505_v47 = vmul.f32 %v4772_v34, %v5406_v50  ;;  %vm1511_vm14 = vweird.f32 %v4772_v34  ;;  %v4623_v11 = vld [vmem:[#allocation17 + $0x2b4] sm:$0xf0]  ;;  %v3986_v50 = vld [vmem:[#allocation17 + $0x288] sm:$0xf] }
 0x392   :  { %2408 = vmatpush.bf16.msra.mxu2 %v3779_v26  ;;  %v1516_v9 = vmul.f32 %v1503_v41, %v1468_v35  ;;  %vm1512_vm0 = vmor %vm1510_vm15, %vm1511_vm14  ;;  %v3875_v17 = vor.u32 %v4591_v43, %v3874_v6  ;;  %v4003_v22 = vor.u32 %v4623_v11, %v4002_v58  ;;  %v4163_v26 = vor.u32 %v4663_v19, %v4162_v18  ;;  %v4659_v31 = vld [vmem:[#allocation17 + $0x3d4] sm:$0xf0]  ;;  %v3970_v37 = vld [vmem:[#allocation17 + $0x268] sm:$0xf] }
 0x393   :  { %v1519_v45 = vmax.f32 %v1515_v40, 0.0  ;;  %v1506_v46 = vmul.f32 %v4772_v34, %v1505_v47  ;;  %v3987_v32 = vor.u32 %v4619_v60, %v3986_v50  ;;  %v3699_v33 = vor.u32 %v4547_v63, %v3698_v62  ;;  %v4583_v35 = vld [vmem:[#allocation17 + $0x174] sm:$0xf0]  ;;  %v3682_v40 = vld [vmem:[#allocation17 + $0x28] sm:$0xf] }
 0x394   :  { %v1520_v56 = vmax.f32 %v1516_v9, 0.0  ;;  %v4543_v41 = vld [vmem:[#allocation17 + $0x34] sm:$0xf0]  ;;  %v4147_v42 = vor.u32 %v4659_v31, %v4146_v30  ;;  %v3938_v6 = vld [vmem:[#allocation17 + $0x228] sm:$0xf] }
 0x395   :  { %v5418_v51 = vpack.c.bf16 %v1519_v45, %v1519_v45  ;;  %v1507_v61 = vmul.f32 0.5, %v1506_v46  ;;  %v4655_v47 = vld [vmem:[#allocation17 + $0x3b4] sm:$0xf0]  ;;  %v3683_v28 = vor.u32 %v4543_v41, %v3682_v40  ;;  %v3954_v45 = vld [vmem:[#allocation17 + $0x248] sm:$0xf] }
 0x396   :  { %2409 = vmatpush.bf16.msra.mxu2 %v3763_v38  ;;  %v5420_v0 = vpack.c.bf16 %v1520_v56, %v1520_v56  ;;  %v4615_v38 = vld [vmem:[#allocation17 + $0x274] sm:$0xf0]  ;;  %v3666_v56 = vld [vmem:[#allocation17 + $0x8] sm:$0xf]  ;;  %v4131_v49 = vor.u32 %v4655_v47, %v4130_v14  ;;  %v4561_v43 = vld [vmem:[#allocation17 + $0xcc] sm:$0xf] }
 0x397   :  { %2325 = vmatmul.bf16.vlgmr.msra.gmra.mxu3 %v5418_v51  ;;  %v1508_v4 = vsub.f32 1.5, %v1507_v61  ;;  %v3971_v9 = vor.u32 %v4615_v38, %v3970_v37  ;;  %v4611_v46 = vld [vmem:[#allocation17 + $0x254] sm:$0xf0]  ;;  %v3764_v58 = vld [vmem:[#allocation17 + $0xd8] sm:$0xf0] }
 0x398   :  { %2338 = vmatmul.bf16.vlgmr.msra.gmra.mxu0 %v5420_v0  ;;  %2421 = vmatpush.bf16.msra.mxu3 %v3907_v29  ;;  %v4539_v29 = vld [vmem:[#allocation17 + $0x14] sm:$0xf0]  ;;  %v3955_v1 = vor.u32 %v4611_v46, %v3954_v45  ;;  %v3767_v18 = vor.u32 %v4561_v43, %v3764_v58  ;;  %v4597_v19 = vld [vmem:[#allocation17 + $0x1ec] sm:$0xf]  ;;  %v3748_v60 = vld [vmem:[#allocation17 + $0xb8] sm:$0xf0] }
 0x399   :  { %2434 = vmatpush.bf16.msra.mxu0 %v4035_v53  ;;  %v1509_v12 = vmul.f32 %v4772_v34, %v1508_v4  ;;  %v4565_v53 = vld [vmem:[#allocation17 + $0xec] sm:$0xf]  ;;  %v4651_v61 = vld [vmem:[#allocation17 + $0x394] sm:$0xf0]  ;;  %v3667_v2 = vor.u32 %v4539_v29, %v3666_v56  ;;  %v4082_v62 = vld [vmem:[#allocation17 + $0x348] sm:$0xf] }
 0x39a   :  { %2410 = vmatpush.bf16.msra.mxu2 %v3747_v55  ;;  %v3780_v55 = vld [vmem:[#allocation17 + $0xf8] sm:$0xf0]  ;;  %v4575_v4 = vld [vmem:[#allocation17 + $0x134] sm:$0xf0]  ;;  %v4557_v50 = vld [vmem:[#allocation17 + $0xac] sm:$0xf] }
 0x39b   :  { %v1513_v20 = vsel %vm1512_vm0, %v4772_v34, %v1509_v12  ;;  %v3842_v34 = vld [vmem:[#allocation17 + $0x168] sm:$0xf]  ;;  %v3811_v11 = vor.u32 %v4575_v4, %v3810_v3  ;;  %v4643_v63 = vld [vmem:[#allocation17 + $0x354] sm:$0xf0]  ;;  %v3751_v31 = vor.u32 %v4557_v50, %v3748_v60  ;;  %v4020_v37 = vld [vmem:[#allocation17 + $0x2d8] sm:$0xf0] }
 0x39c   :  { %2422 = vmatpush.bf16.msra.mxu3 %v3891_v5  ;;  %v1517_v54 = vmul.f32 %v1513_v20, %v1469_v13  ;;  %v3843_v39 = vor.u32 %v4583_v35, %v3842_v34  ;;  %v3783_v5 = vor.u32 %v4565_v53, %v3780_v55  ;;  %v4098_v12 = vld [vmem:[#allocation17 + $0x368] sm:$0xf]  ;;  %v4647_v13 = vld [vmem:[#allocation17 + $0x374] sm:$0xf0]  ;;  %v4625_v34 = vld [vmem:[#allocation17 + $0x2cc] sm:$0xf]  ;;  %v4083_v35 = vor.u32 %v4643_v63, %v4082_v62 }
 0x39d   :  { %2435 = vmatpush.bf16.msra.mxu0 %v4019_v7  ;;  %v4607_v7 = vld [vmem:[#allocation17 + $0x234] sm:$0xf0]  ;;  %v4553_v38 = vld [vmem:[#allocation17 + $0x8c] sm:$0xf]  ;;  %v3732_v40 = vld [vmem:[#allocation17 + $0x98] sm:$0xf0]  ;;  %v4023_v14 = vor.u32 %v4625_v34, %v4020_v37 }
 0x39e   :  { %2411 = vmatpush.bf16.msra.mxu2 %v3731_v8  ;;  %v1521_v25 = vmax.f32 %v1517_v54, 0.0  ;;  %v4115_v8 = vor.u32 %v4651_v61, %v4114_v59  ;;  %v3939_v16 = vor.u32 %v4607_v7, %v3938_v6  ;;  %v4571_v20 = vld [vmem:[#allocation17 + $0x114] sm:$0xf0]  ;;  %v4066_v41 = vld [vmem:[#allocation17 + $0x328] sm:$0xf]  ;;  %v3735_v47 = vor.u32 %v4553_v38, %v3732_v40 }
 0x39f   :  { %v4603_v54 = vld [vmem:[#allocation17 + $0x214] sm:$0xf0]  ;;  %v4004_v45 = vld [vmem:[#allocation17 + $0x2b8] sm:$0xf0]  ;;  %v4549_v46 = vld [vmem:[#allocation17 + $0x6c] sm:$0xf] }
 0x3a0   :  { %2423 = vmatpush.bf16.msra.mxu3 %v3875_v17  ;;  %v5428_v27 = vpack.c.bf16 %v1521_v25, %v1521_v25  ;;  %v3922_v17 = vld [vmem:[#allocation17 + $0x208] sm:$0xf]  ;;  %v3795_v25 = vor.u32 %v4571_v20, %v3794_v15  ;;  %v3716_v56 = vld [vmem:[#allocation17 + $0x78] sm:$0xf0]  ;;  %v4661_v55 = vld [vmem:[#allocation17 + $0x3ec] sm:$0xf]  ;;  %v4007_v59 = vor.u32 %v4621_v44, %v4004_v45 }
 0x3a1   :  { %2364 = vmatmul.bf16.vlgmr.msrb.gmra.mxu2 %v5409_v52  ;;  %2436 = vmatpush.bf16.msra.mxu0 %v4003_v22  ;;  %v4629_v22 = vld [vmem:[#allocation17 + $0x2ec] sm:$0xf]  ;;  %v4050_v29 = vld [vmem:[#allocation17 + $0x308] sm:$0xf]  ;;  %v3719_v61 = vor.u32 %v4549_v46, %v3716_v56  ;;  %v3844_v15 = vld [vmem:[#allocation17 + $0x178] sm:$0xf0] }
 0x3a2   :  { %2412 = vmatpush.bf16.msra.mxu2 %v3715_v23  ;;  %2351 = vmatmul.bf16.vlgmr.msrb.gmra.mxu1 %v5428_v27  ;;  %v4099_v23 = vor.u32 %v4647_v13, %v4098_v12  ;;  %v4039_v30 = vor.u32 %v4629_v22, %v4036_v24  ;;  %v4617_v4 = vld [vmem:[#allocation17 + $0x28c] sm:$0xf]  ;;  %v3828_v60 = vld [vmem:[#allocation17 + $0x158] sm:$0xf0] }
 0x3a3   :  { %2447 = vmatpush.bf16.msrb.mxu1 %v4163_v26  ;;  %v3923_v26 = vor.u32 %v4603_v54, %v3922_v17  ;;  %v4545_v7 = vld [vmem:[#allocation17 + $0x4c] sm:$0xf]  ;;  %v3972_v17 = vld [vmem:[#allocation17 + $0x278] sm:$0xf0] }
 0x3a4   :  { %2424 = vmatpush.bf16.msra.mxu3 %v3859_v36  ;;  %v3911_v36 = vor.u32 %v4597_v19, %v3908_v21  ;;  %v4657_v58 = vld [vmem:[#allocation17 + $0x3cc] sm:$0xf]  ;;  %v3684_v19 = vld [vmem:[#allocation17 + $0x38] sm:$0xf0] }
 0x3a5   :  { %2437 = vmatpush.bf16.msra.mxu0 %v3987_v32  ;;  %v4593_v32 = vld [vmem:[#allocation17 + $0x1cc] sm:$0xf]  ;;  %v3956_v63 = vld [vmem:[#allocation17 + $0x258] sm:$0xf0] }
 0x3a6   :  { %2413 = vmatpush.bf16.msra.mxu2 %v3699_v33  ;;  %v3892_v33 = vld [vmem:[#allocation17 + $0x1d8] sm:$0xf0]  ;;  %v4581_v13 = vld [vmem:[#allocation17 + $0x16c] sm:$0xf] }
 0x3a7   :  { %2448 = vmatpush.bf16.msrb.mxu1 %v4147_v42  ;;  %2377 = vmatmul.bf16.vlgmr.msrb.gmra.mxu3 %v5418_v51  ;;  %v4639_v42 = vld [vmem:[#allocation17 + $0x334] sm:$0xf0]  ;;  %v4613_v20 = vld [vmem:[#allocation17 + $0x26c] sm:$0xf]  ;;  %v3847_v21 = vor.u32 %v4581_v13, %v3844_v15  ;;  %v3812_v37 = vld [vmem:[#allocation17 + $0x138] sm:$0xf0] }
 0x3a8   :  { %2390 = vmatmul.bf16.vlgmr.msrb.gmra.mxu0 %v5420_v0  ;;  %2425 = vmatpush.bf16.msra.mxu3 %v3843_v39  ;;  %v3895_v39 = vor.u32 %v4593_v32, %v3892_v33  ;;  %v4067_v10 = vor.u32 %v4639_v42, %v4066_v41  ;;  %v4653_v22 = vld [vmem:[#allocation17 + $0x3ac] sm:$0xf]  ;;  %v3975_v24 = vor.u32 %v4613_v20, %v3972_v17  ;;  %v4116_v33 = vld [vmem:[#allocation17 + $0x398] sm:$0xf0]  ;;  %v5446_v13 = vld [vmem:[%s5552_s11] sm:$0xf] }
 0x3a9   :  { %2438 = vmatpush.bf16.msra.mxu0 %v3971_v9  ;;  %v4589_v9 = vld [vmem:[#allocation17 + $0x1ac] sm:$0xf]  ;;  %v3940_v41 = vld [vmem:[#allocation17 + $0x238] sm:$0xf0]  ;;  %v4671_v15 = vld [vmem:[#allocation19 + $0x34] sm:$0xf0] }
 0x3aa   :  { %2414 = vmatpush.bf16.msra.mxu2 %v3683_v28  ;;  %v3876_v28 = vld [vmem:[#allocation17 + $0x1b8] sm:$0xf0]  ;;  %v4577_v50 = vld [vmem:[#allocation17 + $0x14c] sm:$0xf]  ;;  %s5136_s11 = smov [#allocation21]  }
 0x3ab   :  { %2449 = vmatpush.bf16.msrb.mxu1 %v4131_v49  ;;  %v4635_v49 = vld [vmem:[#allocation17 + $0x314] sm:$0xf0]  ;;  %v3879_v53 = vor.u32 %v4589_v9, %v3876_v28  ;;  %v4609_v62 = vld [vmem:[#allocation17 + $0x24c] sm:$0xf]  ;;  %v3796_v44 = vld [vmem:[#allocation17 + $0x118] sm:$0xf0] }
 0x3ac   :  { %2426 = vmatpush.bf16.msra.mxu3 %v3827_v57  ;;  %v4164_v57 = vld [vmem:[#allocation17 + $0x3f8] sm:$0xf0]  ;;  %v4051_v3 = vor.u32 %v4635_v49, %v4050_v29  ;;  %v4649_v32 = vld [vmem:[#allocation17 + $0x38c] sm:$0xf]  ;;  %v3959_v34 = vor.u32 %v4609_v62, %v3956_v63  ;;  %s3198_s3 = sshll.u32 %s5136_s11, 4  ;;  %s3199_s3 = int_to_ptr.vmem [resolvable:$true] %s3198_s3 }
 0x3ad   :  { %2439 = vmatpush.bf16.msra.mxu0 %v3955_v1  ;;  %v4585_v1 = vld [vmem:[#allocation17 + $0x18c] sm:$0xf]  ;;  %v4167_v6 = vor.u32 %v4661_v55, %v4164_v57  ;;  %v4119_v42 = vor.u32 %v4649_v32, %v4116_v33  ;;  %v3924_v45 = vld [vmem:[#allocation17 + $0x218] sm:$0xf0]  ;;  %3203 = dma.vmem_to_hbm [thread:$0]  %s3199_s3, 128, %s3201_s22, [#allocation22]  }
 0x3ae   :  { %2415 = vmatpush.bf16.msra.mxu2 %v3667_v2  ;;  %v3860_v2 = vld [vmem:[#allocation17 + $0x198] sm:$0xf0]  ;;  %v4605_v40 = vld [vmem:[#allocation17 + $0x22c] sm:$0xf] }
 0x3af   :  { %2450 = vmatpush.bf16.msrb.mxu1 %v4115_v8  ;;  %v3700_v8 = vld [vmem:[#allocation17 + $0x58] sm:$0xf0]  ;;  %v3863_v43 = vor.u32 %v4585_v1, %v3860_v2  ;;  %v3943_v9 = vor.u32 %v4605_v40, %v3940_v41  ;;  %v4569_v28 = vld [vmem:[#allocation17 + $0x10c] sm:$0xf]  ;;  %v4170_v40 = vld [vmem:[#allocation19] sm:$0xf] }
 0x3b0   :  { %2427 = vmatpush.bf16.msra.mxu3 %v3811_v11  ;;  %v4148_v11 = vld [vmem:[#allocation17 + $0x3d8] sm:$0xf0]  ;;  %v3799_v56 = vor.u32 %v4569_v28, %v3796_v44  ;;  %v4641_v29 = vld [vmem:[#allocation17 + $0x34c] sm:$0xf]  ;;  %v4665_v41 = vld [vmem:[#allocation19 + $0x4] sm:$0xf0] }
 0x3b1   :  { %2416 = vmatmul.bf16.vlgmr.msra.gmra.mxu2 %v5409_v52  ;;  %2440 = vmatpush.bf16.msra.mxu0 %v3939_v16  ;;  %v3703_v16 = vor.u32 %v4545_v7, %v3700_v8  ;;  %v4151_v54 = vor.u32 %v4657_v58, %v4148_v11  ;;  %v4084_v49 = vld [vmem:[#allocation17 + $0x358] sm:$0xf0]  ;;  %v4637_v57 = vld [vmem:[#allocation17 + $0x32c] sm:$0xf]  ;;  %v4677_v7 = vld [vmem:[#allocation19 + $0x64] sm:$0xf0] }
 0x3b2   :  { %2460 = vmatpush.bf16.msrb.mxu2 %v3783_v5  ;;  %2403 = vmatmul.bf16.vlgmr.msra.gmra.mxu1 %v5428_v27  ;;  %v3988_v5 = vld [vmem:[#allocation17 + $0x298] sm:$0xf0]  ;;  %v4087_v55 = vor.u32 %v4641_v29, %v4084_v49  ;;  %v4633_v1 = vld [vmem:[#allocation17 + $0x30c] sm:$0xf]  ;;  %v4673_v11 = vld [vmem:[#allocation19 + $0x44] sm:$0xf0] }
 0x3b3   :  { %2451 = vmatpush.bf16.msrb.mxu1 %v4099_v23  ;;  %v3991_v12 = vor.u32 %v4617_v4, %v3988_v5  ;;  %v4132_v23 = vld [vmem:[#allocation17 + $0x3b8] sm:$0xf0]  ;;  %v4679_v4 = vld [vmem:[#allocation19 + $0x74] sm:$0xf0]  ;;  %v4258_v49 = vld [vmem:[#allocation19 + $0xb0] sm:$0xf] }
 0x3b4   :  { %2428 = vmatpush.bf16.msra.mxu3 %v3795_v25  ;;  %v4052_v2 = vld [vmem:[#allocation17 + $0x318] sm:$0xf0] }
 0x3b5   :  { %2441 = vmatpush.bf16.msra.mxu0 %v3923_v26  ;;  %v4135_v26 = vor.u32 %v4653_v22, %v4132_v23  ;;  %v4186_v22 = vld [vmem:[#allocation19 + $0x20] sm:$0xf]  ;;  %v4669_v23 = vld [vmem:[#allocation19 + $0x24] sm:$0xf0]  ;;  %v4228_v28 = vld [vmem:[#allocation19 + $0x78] sm:$0xf0] }
 0x3b6   :  { %2461 = vmatpush.bf16.msrb.mxu2 %v3767_v18  ;;  %v4541_v18 = vld [vmem:[#allocation17 + $0x2c] sm:$0xf] }
 0x3b7   :  { %2452 = vmatpush.bf16.msrb.mxu1 %v4083_v35  ;;  %2429 = vmatmul.bf16.vlgmr.msra.gmra.mxu3 %v5418_v51  ;;  %v3687_v25 = vor.u32 %v4541_v18, %v3684_v19  ;;  %v4573_v35 = vld [vmem:[#allocation17 + $0x12c] sm:$0xf]  ;;  %v1656_v19 = vperm.slane %v5446_v13, 0 }
 0x3b8   :  { %2473 = vmatpush.bf16.msrb.mxu3 %v3911_v36  ;;  %2442 = vmatmul.bf16.vlgmr.msra.gmra.mxu0 %v5420_v0  ;;  %v4537_v36 = vld [vmem:[#allocation17 + $0xc] sm:$0xf] }
 0x3b9   :  { %2486 = vmatpush.bf16.msrb.mxu0 %v4039_v30  ;;  %v3668_v30 = vld [vmem:[#allocation17 + $0x18] sm:$0xf0] }
 0x3ba   :  { %2462 = vmatpush.bf16.msrb.mxu2 %v3751_v31  ;;  %v3831_v31 = vor.u32 %v4577_v50, %v3828_v60  ;;  %v3671_v38 = vor.u32 %v4537_v36, %v3668_v30  ;;  %v4187_v50 = vor.u32 %v4669_v23, %v4186_v22  ;;  %v4693_v60 = vld [vmem:[#allocation19 + $0xe4] sm:$0xf0]  ;;  %v4667_v36 = vld [vmem:[#allocation19 + $0x14] sm:$0xf0]  ;;  %v4274_v30 = vld [vmem:[#allocation19 + $0xd0] sm:$0xf] }
 0x3bb   :  { %2453 = vmatpush.bf16.msrb.mxu1 %v4067_v10  ;;  %v4601_v10 = vld [vmem:[#allocation17 + $0x20c] sm:$0xf] }
 0x3bc   :  { %2474 = vmatpush.bf16.msrb.mxu3 %v3895_v39  ;;  %v3815_v39 = vor.u32 %v4573_v35, %v3812_v37 }
 0x3bd   :  { %2487 = vmatpush.bf16.msrb.mxu0 %v4023_v14  ;;  %v4645_v14 = vld [vmem:[#allocation17 + $0x36c] sm:$0xf] }
 0x3be   :  { %2463 = vmatpush.bf16.msrb.mxu2 %v3735_v47  ;;  %v4100_v47 = vld [vmem:[#allocation17 + $0x378] sm:$0xf0] }
 0x3bf   :  { %2454 = vmatpush.bf16.msrb.mxu1 %v4051_v3  ;;  %v4103_v46 = vor.u32 %v4645_v14, %v4100_v47  ;;  %v4055_v3 = vor.u32 %v4633_v1, %v4052_v2  ;;  %v4171_v14 = vor.u32 %v4665_v41, %v4170_v40  ;;  %v4689_v47 = vld [vmem:[#allocation19 + $0xc4] sm:$0xf0]  ;;  %v4676_v1 = vld [vmem:[#allocation19 + $0x64] sm:$0xf]  ;;  %v4234_v41 = vld [vmem:[#allocation19 + $0x80] sm:$0xf] }
 0x3c0   :  { %2475 = vmatpush.bf16.msrb.mxu3 %v3879_v53  ;;  %v3927_v53 = vor.u32 %v4601_v10, %v3924_v45 }
 0x3c1   :  { %2488 = vmatpush.bf16.msrb.mxu0 %v4007_v59  ;;  %v4068_v59 = vld [vmem:[#allocation17 + $0x338] sm:$0xf0] }
 0x3c2   :  { %2464 = vmatpush.bf16.msrb.mxu2 %v3719_v61  ;;  %2455 = vmatmul.bf16.vlgmr.msrb.gmra.mxu1 %v5428_v27  ;;  %v4071_v61 = vor.u32 %v4637_v57, %v4068_v59  ;;  %v4354_v59 = vld [vmem:[#allocation19 + $0x170] sm:$0xf] }
 0x3c3   :  { %2499 = vmatpush.bf16.msra.mxu1 %v4167_v6  ;;  %v4218_v6 = vld [vmem:[#allocation19 + $0x60] sm:$0xf] }
 0x3c4   :  { %2476 = vmatpush.bf16.msrb.mxu3 %v3863_v43  ;;  %v4219_v8 = vor.u32 %v4677_v7, %v4218_v6  ;;  %v4210_v43 = vld [vmem:[#allocation19 + $0x50] sm:$0xf] }
 0x3c5   :  { %2489 = vmatpush.bf16.msrb.mxu0 %v3991_v12 }
 0x3c6   :  { %2465 = vmatpush.bf16.msrb.mxu2 %v3703_v16  ;;  %v4290_v16 = vld [vmem:[#allocation19 + $0xf0] sm:$0xf] }
 0x3c7   :  { %2500 = vmatpush.bf16.msra.mxu1 %v4151_v54  ;;  %v4695_v54 = vld [vmem:[#allocation19 + $0xf4] sm:$0xf0] }
 0x3c8   :  { %2477 = vmatpush.bf16.msrb.mxu3 %v3847_v21  ;;  %v4291_v18 = vor.u32 %v4695_v54, %v4290_v16  ;;  %v4212_v54 = vld [vmem:[#allocation19 + $0x58] sm:$0xf0] }
 0x3c9   :  { %2490 = vmatpush.bf16.msrb.mxu0 %v3975_v24  ;;  %v4282_v24 = vld [vmem:[#allocation19 + $0xe0] sm:$0xf] }
 0x3ca   :  { %2466 = vmatpush.bf16.msrb.mxu2 %v3687_v25  ;;  %v4283_v25 = vor.u32 %v4693_v60, %v4282_v24  ;;  %v4242_v24 = vld [vmem:[#allocation19 + $0x90] sm:$0xf] }
 0x3cb   :  { %2501 = vmatpush.bf16.msra.mxu1 %v4135_v26  ;;  %v4178_v26 = vld [vmem:[#allocation19 + $0x10] sm:$0xf] }
 0x3cc   :  { %2478 = vmatpush.bf16.msrb.mxu3 %v3831_v31  ;;  %v4179_v33 = vor.u32 %v4667_v36, %v4178_v26  ;;  %v4707_v26 = vld [vmem:[#allocation19 + $0x154] sm:$0xf0]  ;;  %v4672_v36 = vld [vmem:[#allocation19 + $0x44] sm:$0xf] }
 0x3cd   :  { %2491 = vmatpush.bf16.msrb.mxu0 %v3959_v34  ;;  %v4691_v34 = vld [vmem:[#allocation19 + $0xd4] sm:$0xf0] }
 0x3ce   :  { %2467 = vmatpush.bf16.msrb.mxu2 %v3671_v38  ;;  %v4275_v35 = vor.u32 %v4691_v34, %v4274_v30 }
 0x3cf   :  { %2502 = vmatpush.bf16.msra.mxu1 %v4119_v42  ;;  %v4266_v42 = vld [vmem:[#allocation19 + $0xc0] sm:$0xf] }
 0x3d0   :  { %2479 = vmatpush.bf16.msrb.mxu3 %v3815_v39  ;;  %v4267_v10 = vor.u32 %v4689_v47, %v4266_v42  ;;  %v4681_v42 = vld [vmem:[#allocation19 + $0x84] sm:$0xf0] }
 0x3d1   :  { %2492 = vmatpush.bf16.msrb.mxu0 %v3943_v9  ;;  %2468 = vmatmul.bf16.vlgmr.msrb.gmra.mxu2 %v5409_v52  ;;  %v4226_v52 = vld [vmem:[#allocation19 + $0x70] sm:$0xf]  ;;  %v4678_v9 = vld [vmem:[#allocation19 + $0x74] sm:$0xf]  ;;  %v4235_v47 = vor.u32 %v4681_v42, %v4234_v41  ;;  %v4172_v41 = vld [vmem:[#allocation19 + $0x8] sm:$0xf0] }
 0x3d2   :  { %v4227_v5 = vor.u32 %v4679_v4, %v4226_v52  ;;  %v4231_v45 = vor.u32 %v4678_v9, %v4228_v28  ;;  %v4220_v4 = vld [vmem:[#allocation19 + $0x68] sm:$0xf0]  ;;  %v4705_v9 = vld [vmem:[#allocation19 + $0x144] sm:$0xf0]  ;;  %v4670_v28 = vld [vmem:[#allocation19 + $0x34] sm:$0xf] }
 0x3d3   :  { %2503 = vmatpush.bf16.msra.mxu1 %v4103_v46  ;;  %v4223_v7 = vor.u32 %v4676_v1, %v4220_v4  ;;  %v4688_v42 = vld [vmem:[#allocation19 + $0xc4] sm:$0xf] }
 0x3d4   :  { %2480 = vmatpush.bf16.msrb.mxu3 %v3799_v56  ;;  %3034 = vmatpush.bf16.msra.mxu2 %v4227_v5  ;;  %v1657_v5 = vperm.slane %v5446_v13, 1 }
 0x3d5   :  { %2493 = vmatpush.bf16.msrb.mxu0 %v3927_v53  ;;  %v4687_v53 = vld [vmem:[#allocation19 + $0xb4] sm:$0xf0] }
 0x3d6   :  { %v4259_v57 = vor.u32 %v4687_v53, %v4258_v49  ;;  %v4292_v49 = vld [vmem:[#allocation19 + $0xf8] sm:$0xf0] }
 0x3d7   :  { %2504 = vmatpush.bf16.msra.mxu1 %v4087_v55  ;;  %2481 = vmatmul.bf16.vlgmr.msrb.gmra.mxu3 %v5418_v51  ;;  %v4675_v51 = vld [vmem:[#allocation19 + $0x54] sm:$0xf0] }
 0x3d8   :  { %2494 = vmatmul.bf16.vlgmr.msrb.gmra.mxu0 %v5420_v0  ;;  %3035 = vmatpush.bf16.msra.mxu2 %v4219_v8  ;;  %v4211_v58 = vor.u32 %v4675_v51, %v4210_v43  ;;  %v4202_v0 = vld [vmem:[#allocation19 + $0x40] sm:$0xf] }
 0x3d9   :  { %v4203_v12 = vor.u32 %v4673_v11, %v4202_v0  ;;  %3047 = vmatpush.bf16.msra.mxu3 %v4291_v18  ;;  %v4250_v51 = vld [vmem:[#allocation19 + $0xa0] sm:$0xf] }
 0x3db   :  { %2505 = vmatpush.bf16.msra.mxu1 %v4071_v61  ;;  %v4711_v61 = vld [vmem:[#allocation19 + $0x174] sm:$0xf0] }
 0x3dc   :  { %3036 = vmatpush.bf16.msra.mxu2 %v4211_v58  ;;  %v4355_v52 = vor.u32 %v4711_v61, %v4354_v59  ;;  %v4685_v58 = vld [vmem:[#allocation19 + $0xa4] sm:$0xf0] }
 0x3dd   :  { %3048 = vmatpush.bf16.msra.mxu3 %v4283_v25  ;;  %v4251_v11 = vor.u32 %v4685_v58, %v4250_v51 }
 0x3de   :  { %3060 = vmatpush.bf16.msra.mxu0 %v4355_v52  ;;  %v4703_v52 = vld [vmem:[#allocation19 + $0x134] sm:$0xf0] }
 0x3df   :  { %2506 = vmatpush.bf16.msra.mxu1 %v4055_v3 }
 0x3e0   :  { %3037 = vmatpush.bf16.msra.mxu2 %v4203_v12  ;;  %v4346_v12 = vld [vmem:[#allocation19 + $0x160] sm:$0xf] }
 0x3e1   :  { %3049 = vmatpush.bf16.msra.mxu3 %v4275_v35 }
 0x3e2   :  { %2507 = vmatmul.bf16.vlgmr.msra.gmra.mxu1 %v5428_v27  ;;  %v4194_v27 = vld [vmem:[#allocation19 + $0x30] sm:$0xf] }
 0x3e3   :  { %v4195_v17 = vor.u32 %v4671_v15, %v4194_v27  ;;  %v4709_v27 = vld [vmem:[#allocation19 + $0x164] sm:$0xf0]  ;;  %v4674_v15 = vld [vmem:[#allocation19 + $0x54] sm:$0xf] }
 0x3e5   :  { %3038 = vmatpush.bf16.msra.mxu2 %v4195_v17  ;;  %3050 = vmatpush.bf16.msra.mxu3 %v4267_v10  ;;  %v4347_v17 = vor.u32 %v4709_v27, %v4346_v12  ;;  %v4196_v10 = vld [vmem:[#allocation19 + $0x38] sm:$0xf0] }
 0x3e7   :  { %3061 = vmatpush.bf16.msra.mxu0 %v4347_v17 }
 0x3e9   :  { %3039 = vmatpush.bf16.msra.mxu2 %v4187_v50  ;;  %3051 = vmatpush.bf16.msra.mxu3 %v4259_v57  ;;  %v4683_v50 = vld [vmem:[#allocation19 + $0x94] sm:$0xf0] }
 0x3ed   :  { %3040 = vmatpush.bf16.msra.mxu2 %v4179_v33  ;;  %3052 = vmatpush.bf16.msra.mxu3 %v4251_v11  ;;  %v4204_v33 = vld [vmem:[#allocation19 + $0x48] sm:$0xf0]  ;;  %v1658_v11 = vperm.slane %v5446_v13, 2 }
 0x3f1   :  { %3041 = vmatpush.bf16.msra.mxu2 %v4171_v14 }
 0x3f5   :  { %3086 = vmatpush.bf16.msrb.mxu2 %v4231_v45 }
 0x3f9   :  { %3087 = vmatpush.bf16.msrb.mxu2 %v4223_v7  ;;  %v4188_v7 = vld [vmem:[#allocation19 + $0x28] sm:$0xf0] }
 0x414   :  { %v2313_v20 = vpop.f32.mrf.mxu2 }
 0x415   :  { %v2339_v21 = vpop.f32.mrf.mxu0  ;;  %v2314_v62 = vadd.f32 %v2313_v20, %v1656_v19  ;;  %v4215_v19 = vor.u32 %v4674_v15, %v4212_v54  ;;  %v4314_v54 = vld [vmem:[#allocation19 + $0x120] sm:$0xf] }
 0x417   :  { %3088 = vmatpush.bf16.msrb.mxu2 %v4215_v19  ;;  %v4701_v19 = vld [vmem:[#allocation19 + $0x124] sm:$0xf0] }
 0x41a   :  { %v2326_v63 = vpop.f32.mrf.mxu3 }
 0x41b   :  { %v2327_v31 = vadd.f32 %v2326_v63, %v2314_v62  ;;  %v4243_v62 = vor.u32 %v4683_v50, %v4242_v24  ;;  %v4338_v63 = vld [vmem:[#allocation19 + $0x150] sm:$0xf]  ;;  %v4690_v50 = vld [vmem:[#allocation19 + $0xd4] sm:$0xf] }
 0x41c   :  { %v2315_v32 = vpop.f32.mrf.mxu2 }
 0x41d   :  { %v2341_v37 = vpop.f32.mrf.mxu0  ;;  %v2340_v38 = vadd.f32 %v2339_v21, %v2327_v31  ;;  %v4339_v32 = vor.u32 %v4707_v26, %v4338_v63  ;;  %3053 = vmatpush.bf16.msra.mxu3 %v4243_v62  ;;  %v4315_v62 = vor.u32 %v4701_v19, %v4314_v54  ;;  %v4684_v19 = vld [vmem:[#allocation19 + $0xa4] sm:$0xf] }
 0x41e   :  { %v4207_v37 = vor.u32 %v4672_v36, %v4204_v33  ;;  %v4699_v33 = vld [vmem:[#allocation19 + $0x114] sm:$0xf0] }
 0x41f   :  { %v2352_v39 = vpop.f32.mrf.mxu1  ;;  %3062 = vmatpush.bf16.msra.mxu0 %v4339_v32  ;;  %v4306_v32 = vld [vmem:[#allocation19 + $0x110] sm:$0xf] }
 0x420   :  { %v5449_v44 = vadd.f32 %v2352_v39, %v2340_v38  ;;  %v4330_v39 = vld [vmem:[#allocation19 + $0x140] sm:$0xf]  ;;  %3089 = vmatpush.bf16.msrb.mxu2 %v4207_v37  ;;  %v4307_v37 = vor.u32 %v4699_v33, %v4306_v32 }
 0x421   :  { %v4331_v53 = vor.u32 %v4705_v9, %v4330_v39  ;;  %3054 = vmatpush.bf16.msra.mxu3 %v4235_v47  ;;  %v4268_v9 = vld [vmem:[#allocation19 + $0xc8] sm:$0xf0] }
 0x422   :  { %v2512_v46 = vrot.slane %v5449_v44, 4  ;;  %v2540_v56 = vmul.f32 %v5449_v44, %v5449_v44  ;;  %v2328_v29 = vpop.f32.mrf.mxu3 }
 0x423   :  { %v4694_v29 = vld [vmem:[#allocation19 + $0xf4] sm:$0xf]  ;;  %3063 = vmatpush.bf16.msra.mxu0 %v4331_v53  ;;  %v4298_v53 = vld [vmem:[#allocation19 + $0x100] sm:$0xf] }
 0x424   :  { %v2365_v55 = vpop.f32.mrf.mxu2  ;;  %v2513_v2 = vadd.f32 %v2512_v46, %v5449_v44  ;;  %v2544_v3 = vrot.slane %v2540_v56, 4  ;;  %v4295_v57 = vor.u32 %v4694_v29, %v4292_v49 }
 0x425   :  { %v2391_v6 = vpop.f32.mrf.mxu0  ;;  %v2366_v18 = vadd.f32 %v2365_v55, %v1657_v5  ;;  %v4199_v55 = vor.u32 %v4670_v28, %v4196_v10 }
 0x426   :  { %v2514_v8 = vrot.slane %v2513_v2, 2  ;;  %v2545_v43 = vadd.f32 %v2544_v3, %v2540_v56  ;;  %v4322_v3 = vld [vmem:[#allocation19 + $0x130] sm:$0xf]  ;;  %3099 = vmatpush.bf16.msrb.mxu3 %v4295_v57 }
 0x427   :  { %v2354_v0 = vpop.f32.mrf.mxu1  ;;  %3090 = vmatpush.bf16.msrb.mxu2 %v4199_v55  ;;  %v4323_v5 = vor.u32 %v4703_v52, %v4322_v3  ;;  %v4697_v55 = vld [vmem:[#allocation19 + $0x104] sm:$0xf0]  ;;  %v4418_v57 = vld [vmem:[#allocation19 + $0x1f0] sm:$0xf]  ;;  %v4686_v3 = vld [vmem:[#allocation19 + $0xb4] sm:$0xf] }
 0x428   :  { %v2515_v16 = vadd.f32 %v2514_v8, %v2513_v2  ;;  %v2546_v20 = vrot.slane %v2545_v43, 2  ;;  %v4692_v8 = vld [vmem:[#allocation19 + $0xe4] sm:$0xf]  ;;  %v4284_v0 = vld [vmem:[#allocation19 + $0xe8] sm:$0xf0] }
 0x429   :  { %v4287_v15 = vor.u32 %v4692_v8, %v4284_v0  ;;  %3064 = vmatpush.bf16.msra.mxu0 %v4323_v5  ;;  %v4260_v52 = vld [vmem:[#allocation19 + $0xb8] sm:$0xf0] }
 0x42a   :  { %v2516_v21 = vrot.slane %v2515_v16, 1  ;;  %v2547_v22 = vadd.f32 %v2546_v20, %v2545_v43  ;;  %v2378_v23 = vpop.f32.mrf.mxu3  ;;  %v4356_v8 = vld [vmem:[#allocation19 + $0x178] sm:$0xf0] }
 0x42b   :  { %v2379_v60 = vadd.f32 %v2378_v23, %v2366_v18  ;;  %3100 = vmatpush.bf16.msrb.mxu3 %v4287_v15 }
 0x42c   :  { %v2367_v25 = vpop.f32.mrf.mxu2  ;;  %v2517_v30 = vadd.f32 %v2516_v21, %v2515_v16  ;;  %v2548_v31 = vrot.slane %v2547_v22, 1  ;;  %v4666_v21 = vld [vmem:[#allocation19 + $0x14] sm:$0xf] }
 0x42d   :  { %v2393_v34 = vpop.f32.mrf.mxu0  ;;  %v2392_v35 = vadd.f32 %v2391_v6, %v2379_v60  ;;  %v4668_v6 = vld [vmem:[#allocation19 + $0x24] sm:$0xf]  ;;  %v4276_v60 = vld [vmem:[#allocation19 + $0xd8] sm:$0xf0]  ;;  %3065 = vmatpush.bf16.msra.mxu0 %v4315_v62 }
 0x42e   :  { %v5457_v38 = vmul.f32 %v2517_v30, %v5287_v48  ;;  %v2549_v40 = vadd.f32 %v2548_v31, %v2547_v22  ;;  %v4191_v27 = vor.u32 %v4668_v6, %v4188_v7  ;;  %v4180_v22 = vld [vmem:[#allocation19 + $0x18] sm:$0xf0]  ;;  %v4279_v26 = vor.u32 %v4690_v50, %v4276_v60  ;;  %v4710_v7 = vld [vmem:[#allocation19 + $0x174] sm:$0xf]  ;;  %v4708_v60 = vld [vmem:[#allocation19 + $0x164] sm:$0xf] }
 0x42f   :  { %v2404_v14 = vpop.f32.mrf.mxu1  ;;  %v4183_v63 = vor.u32 %v4666_v21, %v4180_v22  ;;  %v4359_v0 = vor.u32 %v4710_v7, %v4356_v8  ;;  %v4252_v21 = vld [vmem:[#allocation19 + $0xa8] sm:$0xf0] }
 0x430   :  { %v2568_v45 = vmul.f32 %v2549_v40, %v5287_v48  ;;  %v2572_v46 = vmul.f32 %v5457_v38, %v5457_v38  ;;  %v5462_v56 = vadd.f32 %v2404_v14, %v2392_v35  ;;  %3091 = vmatpush.bf16.msrb.mxu2 %v4191_v27  ;;  %v4664_v40 = vld [vmem:[#allocation19 + $0x4] sm:$0xf]  ;;  %3101 = vmatpush.bf16.msrb.mxu3 %v4279_v26 }
 0x431   :  { %v4175_v47 = vor.u32 %v4664_v40, %v4172_v41  ;;  %3066 = vmatpush.bf16.msra.mxu0 %v4307_v37  ;;  %v4255_v50 = vor.u32 %v4684_v19, %v4252_v21  ;;  %v4244_v37 = vld [vmem:[#allocation19 + $0x98] sm:$0xf0]  ;;  %v2584_v40 = vsub.f32 %v5449_v44, %v5457_v38  ;;  %v4394_v44 = vld [vmem:[#allocation19 + $0x1c0] sm:$0xf]  ;;  %v4721_v38 = vld [vmem:[#allocation19 + $0x1c4] sm:$0xf0] }
 0x432   :  { %v2576_v59 = vsub.f32 %v2568_v45, %v2572_v46  ;;  %v2518_v61 = vrot.slane %v5462_v56, 4  ;;  %v2541_v1 = vmul.f32 %v5462_v56, %v5462_v56  ;;  %v2380_v2 = vpop.f32.mrf.mxu3  ;;  %v4271_v45 = vor.u32 %v4688_v42, %v4268_v9 }
 0x433   :  { %v4727_v2 = vld [vmem:[#allocation19 + $0x1f4] sm:$0xf0]  ;;  %v1659_v19 = vperm.slane %v5446_v13, 3  ;;  %v4308_v13 = vld [vmem:[#allocation19 + $0x118] sm:$0xf0] }
 0x434   :  { %v2417_v4 = vpop.f32.mrf.mxu2  ;;  %v2580_v43 = vmax.f32 %v2576_v59, 0.0  ;;  %v2519_v51 = vadd.f32 %v2518_v61, %v5462_v56  ;;  %v2550_v58 = vrot.slane %v2541_v1, 4  ;;  %3092 = vmatpush.bf16.msrb.mxu2 %v4183_v63  ;;  %3102 = vmatpush.bf16.msrb.mxu3 %v4271_v45 }
 0x435   :  { %v2443_v12 = vpop.f32.mrf.mxu0  ;;  %v2418_v25 = vadd.f32 %v2417_v4, %v1658_v11 }
 0x436   :  { %v5469_v16 = vadd.f32 1e-05, %v2580_v43  ;;  %v2520_v20 = vrot.slane %v2519_v51, 2  ;;  %v2551_v17 = vadd.f32 %v2550_v58, %v2541_v1  ;;  %v4299_v1 = vor.u32 %v4697_v55, %v4298_v53  ;;  %v4680_v55 = vld [vmem:[#allocation19 + $0x84] sm:$0xf] }
 0x437   :  { %v2406_v18 = vpop.f32.mrf.mxu1  ;;  %v4263_v58 = vor.u32 %v4686_v3, %v4260_v52  ;;  %v4395_v53 = vor.u32 %v4721_v38, %v4394_v44  ;;  %v4726_v44 = vld [vmem:[#allocation19 + $0x1f4] sm:$0xf]  ;;  %v4420_v38 = vld [vmem:[#allocation19 + $0x1f8] sm:$0xf0] }
 0x438   :  { %4773 = vrsqrt.f32 %v5469_v16  ;;  %v2521_v23 = vadd.f32 %v2520_v20, %v2519_v51  ;;  %v2552_v24 = vrot.slane %v2551_v17, 2  ;;  %3093 = vmatpush.bf16.msrb.mxu2 %v4175_v47  ;;  %v4419_v51 = vor.u32 %v4727_v2, %v4418_v57  ;;  %v4410_v20 = vld [vmem:[#allocation19 + $0x1e0] sm:$0xf]  ;;  %3067 = vmatpush.bf16.msra.mxu0 %v4299_v1  ;;  %v4236_v57 = vld [vmem:[#allocation19 + $0x88] sm:$0xf0] }
 0x439   :  { %3103 = vmatpush.bf16.msrb.mxu3 %v4263_v58  ;;  %vm2598_vm2 = vweird.f32 %v5469_v16  ;;  %v4239_v3 = vor.u32 %v4680_v55, %v4236_v57 }
 0x43a   :  { %v2522_v36 = vrot.slane %v2521_v23, 1  ;;  %v2553_v30 = vadd.f32 %v2552_v24, %v2551_v17  ;;  %v2430_v31 = vpop.f32.mrf.mxu3  ;;  %v4725_v17 = vld [vmem:[#allocation19 + $0x1e4] sm:$0xf0]  ;;  %3073 = vmatpush.bf16.msrb.mxu1 %v4419_v51  ;;  %v4719_v51 = vld [vmem:[#allocation19 + $0x1b4] sm:$0xf0] }
 0x43b   :  { %v2431_v34 = vadd.f32 %v2430_v31, %v2418_v25  ;;  %v4411_v18 = vor.u32 %v4725_v17, %v4410_v20  ;;  %v4348_v25 = vld [vmem:[#allocation19 + $0x168] sm:$0xf0]  ;;  %v4402_v31 = vld [vmem:[#allocation19 + $0x1d0] sm:$0xf] }
 0x43c   :  { %v2419_v35 = vpop.f32.mrf.mxu2  ;;  %v2523_v39 = vadd.f32 %v2522_v36, %v2521_v23  ;;  %v2554_v14 = vrot.slane %v2553_v30, 1  ;;  %3112 = vmatpush.bf16.msrb.mxu0 %v4359_v0  ;;  %v4351_v63 = vor.u32 %v4708_v60, %v4348_v25  ;;  %v4700_v60 = vld [vmem:[#allocation19 + $0x124] sm:$0xf]  ;;  %v4316_v25 = vld [vmem:[#allocation19 + $0x128] sm:$0xf0] }
 0x43d   :  { %v2445_v28 = vpop.f32.mrf.mxu0  ;;  %v2444_v10 = vadd.f32 %v2443_v12, %v2431_v34  ;;  %v4723_v34 = vld [vmem:[#allocation19 + $0x1d4] sm:$0xf0]  ;;  %v4682_v35 = vld [vmem:[#allocation19 + $0x94] sm:$0xf]  ;;  %3104 = vmatpush.bf16.msrb.mxu3 %v4255_v50 }
 0x43e   :  { %v5472_v46 = vpop.eup %4773  ;;  %v5475_v29 = vmul.f32 %v2523_v39, %v5287_v48  ;;  %v2555_v49 = vadd.f32 %v2554_v14, %v2553_v30  ;;  %3074 = vmatpush.bf16.msrb.mxu1 %v4411_v18  ;;  %v4706_v39 = vld [vmem:[#allocation19 + $0x154] sm:$0xf]  ;;  %v4340_v14 = vld [vmem:[#allocation19 + $0x158] sm:$0xf0]  ;;  %v4403_v47 = vor.u32 %v4723_v34, %v4402_v31  ;;  %v4247_v9 = vor.u32 %v4682_v35, %v4244_v37  ;;  %v4715_v31 = vld [vmem:[#allocation19 + $0x194] sm:$0xf0] }
 0x43f   :  { %v2456_v59 = vpop.f32.mrf.mxu1  ;;  %v2593_v61 = vmul.f32 %v5472_v46, %v5469_v16  ;;  %vm2599_vm1 = vweird.f32 %v5472_v46  ;;  %v4343_v28 = vor.u32 %v4706_v39, %v4340_v14  ;;  %v4698_v34 = vld [vmem:[#allocation19 + $0x114] sm:$0xf]  ;;  %v4362_v39 = vld [vmem:[#allocation19 + $0x180] sm:$0xf]  ;;  %v4713_v14 = vld [vmem:[#allocation19 + $0x184] sm:$0xf0] }
 0x440   :  { %v2569_v4 = vmul.f32 %v2555_v49, %v5287_v48  ;;  %v2573_v5 = vmul.f32 %v5475_v29, %v5475_v29  ;;  %v5482_v6 = vadd.f32 %v2456_v59, %v2444_v10  ;;  %vm2600_vm3 = vmor %vm2598_vm2, %vm2599_vm1  ;;  %3113 = vmatpush.bf16.msrb.mxu0 %v4351_v63  ;;  %v4704_v59 = vld [vmem:[#allocation19 + $0x144] sm:$0xf] }
 0x441   :  { %v2594_v43 = vmul.f32 %v5472_v46, %v2593_v61  ;;  %3105 = vmatpush.bf16.msrb.mxu3 %v4247_v9  ;;  %v4311_v9 = vor.u32 %v4698_v34, %v4308_v13  ;;  %v4718_v34 = vld [vmem:[#allocation19 + $0x1b4] sm:$0xf]  ;;  %v4388_v13 = vld [vmem:[#allocation19 + $0x1b8] sm:$0xf0] }
 0x442   :  { %v2577_v11 = vsub.f32 %v2569_v4, %v2573_v5  ;;  %v2524_v12 = vrot.slane %v5482_v6, 4  ;;  %v2542_v27 = vmul.f32 %v5482_v6, %v5482_v6  ;;  %v2432_v15 = vpop.f32.mrf.mxu3  ;;  %3075 = vmatpush.bf16.msrb.mxu1 %v4403_v47 }
 0x443   :  { %v2595_v54 = vmul.f32 0.5, %v2594_v43  ;;  %v4386_v43 = vld [vmem:[#allocation19 + $0x1b0] sm:$0xf] }
 0x444   :  { %v2581_v22 = vmax.f32 %v2577_v11, 0.0  ;;  %v2525_v23 = vadd.f32 %v2524_v12, %v5482_v6  ;;  %v2556_v24 = vrot.slane %v2542_v27, 4  ;;  %3114 = vmatpush.bf16.msrb.mxu0 %v4343_v28  ;;  %v4387_v0 = vor.u32 %v4719_v51, %v4386_v43  ;;  %v4702_v11 = vld [vmem:[#allocation19 + $0x134] sm:$0xf]  ;;  %v4324_v12 = vld [vmem:[#allocation19 + $0x138] sm:$0xf0] }
 0x445   :  { %v2596_v62 = vsub.f32 1.5, %v2595_v54  ;;  %3106 = vmatpush.bf16.msrb.mxu3 %v4239_v3  ;;  %v4327_v54 = vor.u32 %v4702_v11, %v4324_v12  ;;  %v4696_v28 = vld [vmem:[#allocation19 + $0x104] sm:$0xf]  ;;  %v4722_v11 = vld [vmem:[#allocation19 + $0x1d4] sm:$0xf] }
 0x446   :  { %v5490_v26 = vadd.f32 1e-05, %v2581_v22  ;;  %v2526_v36 = vrot.slane %v2525_v23, 2  ;;  %v2557_v30 = vadd.f32 %v2556_v24, %v2542_v27  ;;  %3076 = vmatpush.bf16.msrb.mxu1 %v4395_v53  ;;  %v4378_v22 = vld [vmem:[#allocation19 + $0x1a0] sm:$0xf] }
 0x447   :  { %v2458_v32 = vpop.f32.mrf.mxu1  ;;  %v2597_v33 = vmul.f32 %v5472_v46, %v2596_v62  ;;  %v4404_v12 = vld [vmem:[#allocation19 + $0x1d8] sm:$0xf0] }
 0x448   :  { %4775 = vrsqrt.f32 %v5490_v26  ;;  %v2527_v41 = vadd.f32 %v2526_v36, %v2525_v23  ;;  %v2558_v42 = vrot.slane %v2557_v30, 2  ;;  %v4717_v23 = vld [vmem:[#allocation19 + $0x1a4] sm:$0xf0]  ;;  %v4319_v36 = vor.u32 %v4700_v60, %v4316_v25 }
 0x449   :  { %v2601_v16 = vsel %vm2600_vm3, %v5472_v46, %v2597_v33  ;;  %v4332_v46 = vld [vmem:[#allocation19 + $0x148] sm:$0xf0]  ;;  %v4379_v50 = vor.u32 %v4717_v23, %v4378_v22  ;;  %vm2608_vm5 = vweird.f32 %v5490_v26 }
 0x44a   :  { %v2528_v10 = vrot.slane %v2527_v41, 1  ;;  %v2559_v45 = vadd.f32 %v2558_v42, %v2557_v30  ;;  %v2632_v49 = vmul.f32 %v2601_v16, %v2584_v40  ;;  %v4335_v52 = vor.u32 %v4704_v59, %v4332_v46  ;;  %3077 = vmatpush.bf16.msrb.mxu1 %v4387_v0  ;;  %v4370_v30 = vld [vmem:[#allocation19 + $0x190] sm:$0xf]  ;;  %v4396_v22 = vld [vmem:[#allocation19 + $0x1c8] sm:$0xf0] }
 0x44b   :  { %v4371_v40 = vor.u32 %v4715_v31, %v4370_v30  ;;  %v4423_v59 = vor.u32 %v4726_v44, %v4420_v38 }
 0x44c   :  { %v2529_v61 = vadd.f32 %v2528_v10, %v2527_v41  ;;  %v2560_v1 = vrot.slane %v2559_v45, 1  ;;  %v2636_v2 = vmax.f32 %v2632_v49, 0.0  ;;  %3115 = vmatpush.bf16.msrb.mxu0 %v4335_v52  ;;  %v2585_v41 = vsub.f32 %v5462_v56, %v5475_v29  ;;  %v4300_v49 = vld [vmem:[#allocation19 + $0x108] sm:$0xf0] }
 0x44d   :  { %v4363_v56 = vor.u32 %v4713_v14, %v4362_v39  ;;  %v4303_v57 = vor.u32 %v4696_v28, %v4300_v49 }
 0x44e   :  { %v4776_v4 = vpop.eup %4775  ;;  %v5501_v5 = vmul.f32 %v2529_v61, %v5287_v48  ;;  %v2561_v7 = vadd.f32 %v2560_v1, %v2559_v45  ;;  %v5503_v8 = vpack.c.bf16 %v2636_v2, %v2636_v2  ;;  %3078 = vmatpush.bf16.msrb.mxu1 %v4379_v50 }
 0x44f   :  { %v2603_v58 = vmul.f32 %v4776_v4, %v5490_v26  ;;  %vm2609_vm4 = vweird.f32 %v4776_v4 }
 0x450   :  { %v2570_v27 = vmul.f32 %v2561_v7, %v5287_v48  ;;  %v2574_v15 = vmul.f32 %v5501_v5, %v5501_v5  ;;  %3042 = vmatmul.bf16.vlgmr.msra.gmra.mxu2 %v5503_v8  ;;  %3116 = vmatpush.bf16.msrb.mxu0 %v4327_v54  ;;  %vm2610_vm6 = vmor %vm2608_vm5, %vm2609_vm4  ;;  %v4412_v7 = vld [vmem:[#allocation19 + $0x1e8] sm:$0xf0]  ;;  %v2586_v60 = vsub.f32 %v5482_v6, %v5501_v5  ;;  %v4716_v6 = vld [vmem:[#allocation19 + $0x1a4] sm:$0xf] }
 0x451   :  { %v2604_v17 = vmul.f32 %v4776_v4, %v2603_v58  ;;  %v4380_v5 = vld [vmem:[#allocation19 + $0x1a8] sm:$0xf0] }
 0x452   :  { %v2578_v18 = vsub.f32 %v2570_v27, %v2574_v15  ;;  %3079 = vmatpush.bf16.msrb.mxu1 %v4371_v40  ;;  %v4383_v14 = vor.u32 %v4716_v6, %v4380_v5 }
 0x453   :  { %v2605_v24 = vmul.f32 0.5, %v2604_v17 }
 0x454   :  { %v2469_v20 = vpop.f32.mrf.mxu2  ;;  %v2582_v62 = vmax.f32 %v2578_v18, 0.0  ;;  %3117 = vmatpush.bf16.msrb.mxu0 %v4319_v36 }
 0x455   :  { %v2495_v21 = vpop.f32.mrf.mxu0  ;;  %v2606_v63 = vsub.f32 1.5, %v2605_v24  ;;  %v2470_v33 = vadd.f32 %v2469_v20, %v1659_v19 }
 0x456   :  { %v5511_v32 = vadd.f32 1e-05, %v2582_v62  ;;  %3080 = vmatpush.bf16.msrb.mxu1 %v4363_v56 }
 0x457   :  { %v2607_v37 = vmul.f32 %v4776_v4, %v2606_v63 }
 0x458   :  { %4777 = vrsqrt.f32 %v5511_v32  ;;  %3118 = vmatpush.bf16.msrb.mxu0 %v4311_v9  ;;  %vm2618_vm8 = vweird.f32 %v5511_v32 }
 0x459   :  { %v2611_v47 = vsel %vm2610_vm6, %v4776_v4, %v2607_v37  ;;  %v4724_v4 = vld [vmem:[#allocation19 + $0x1e4] sm:$0xf] }
 0x45a   :  { %v2482_v35 = vpop.f32.mrf.mxu3  ;;  %v2633_v26 = vmul.f32 %v2611_v47, %v2585_v41  ;;  %3125 = vmatpush.bf16.msra.mxu1 %v4423_v59  ;;  %v4415_v0 = vor.u32 %v4724_v4, %v4412_v7  ;;  %v4372_v47 = vld [vmem:[#allocation19 + $0x198] sm:$0xf0] }
 0x45b   :  { %v2483_v42 = vadd.f32 %v2482_v35, %v2470_v33 }
 0x45c   :  { %v2471_v16 = vpop.f32.mrf.mxu2  ;;  %v2637_v53 = vmax.f32 %v2633_v26, 0.0  ;;  %3119 = vmatpush.bf16.msrb.mxu0 %v4303_v57 }
 0x45d   :  { %v2497_v10 = vpop.f32.mrf.mxu0  ;;  %v2496_v45 = vadd.f32 %v2495_v21, %v2483_v42  ;;  %v4407_v21 = vor.u32 %v4722_v11, %v4404_v12  ;;  %v4714_v16 = vld [vmem:[#allocation19 + $0x194] sm:$0xf]  ;;  %v2708_v11 = vld [vmem:[%s5554_s13] sm:$0x3]  ;;  %s5137_s13 = smov [#allocation20]  }
 0x45e   :  { %v4778_v61 = vpop.eup %4777  ;;  %v2641_v1 = vpack.c.bf16 %v2637_v53, %v2637_v53  ;;  %3126 = vmatpush.bf16.msra.mxu1 %v4415_v0  ;;  %v4375_v28 = vor.u32 %v4714_v16, %v4372_v47  ;;  %v4712_v10 = vld [vmem:[#allocation19 + $0x184] sm:$0xf]  ;;  %v2710_v12 = vperm.slane %v2708_v11, 0  ;;  %s3187_s15 = sshll.u32 %s5137_s13, 4  ;;  %s3188_s15 = int_to_ptr.vmem [resolvable:$true] %s3187_s15 }
 0x45f   :  { %v2508_v29 = vpop.f32.mrf.mxu1  ;;  %v2613_v52 = vmul.f32 %v4778_v61, %v5511_v32  ;;  %vm2619_vm7 = vweird.f32 %v4778_v61  ;;  %v4391_v32 = vor.u32 %v4718_v34, %v4388_v13 }
 0x460   :  { %v5518_v55 = vadd.f32 %v2508_v29, %v2496_v45  ;;  %3055 = vmatmul.bf16.vlgmr.msra.gmra.mxu3 %v2641_v1  ;;  %3094 = vmatmul.bf16.vlgmr.msrb.gmra.mxu2 %v5503_v8  ;;  %v4720_v8 = vld [vmem:[#allocation19 + $0x1c4] sm:$0xf]  ;;  %vm2620_vm9 = vmor %vm2618_vm8, %vm2619_vm7 }
 0x461   :  { %v2614_v58 = vmul.f32 %v4778_v61, %v2613_v52  ;;  %v4399_v36 = vor.u32 %v4720_v8, %v4396_v22 }
 0x462   :  { %v2530_v2 = vrot.slane %v5518_v55, 4  ;;  %v2543_v3 = vmul.f32 %v5518_v55, %v5518_v55  ;;  %v2484_v46 = vpop.f32.mrf.mxu3  ;;  %3127 = vmatpush.bf16.msra.mxu1 %v4407_v21  ;;  %v2711_v21 = vperm.slane %v2708_v11, 1 }
 0x463   :  { %v2615_v20 = vmul.f32 0.5, %v2614_v58 }
 0x464   :  { %v2531_v43 = vadd.f32 %v2530_v2, %v5518_v55  ;;  %v2562_v51 = vrot.slane %v2543_v3, 4 }
 0x465   :  { %v2616_v19 = vsub.f32 1.5, %v2615_v20 }
 0x466   :  { %v2532_v27 = vrot.slane %v2531_v43, 2  ;;  %v2563_v15 = vadd.f32 %v2562_v51, %v2543_v3  ;;  %3128 = vmatpush.bf16.msra.mxu1 %v4399_v36 }
 0x467   :  { %v2510_v17 = vpop.f32.mrf.mxu1  ;;  %v2617_v50 = vmul.f32 %v4778_v61, %v2616_v19 }
 0x468   :  { %v2533_v54 = vadd.f32 %v2532_v27, %v2531_v43  ;;  %v2564_v18 = vrot.slane %v2563_v15, 2 }
 0x469   :  { %v2621_v63 = vsel %vm2620_vm9, %v4778_v61, %v2617_v50 }
 0x46a   :  { %v2534_v23 = vrot.slane %v2533_v54, 1  ;;  %v2565_v24 = vadd.f32 %v2564_v18, %v2563_v15  ;;  %v2634_v30 = vmul.f32 %v2621_v63, %v2586_v60  ;;  %3129 = vmatpush.bf16.msra.mxu1 %v4391_v32 }
 0x46c   :  { %v2535_v25 = vadd.f32 %v2534_v23, %v2533_v54  ;;  %v2566_v62 = vrot.slane %v2565_v24, 1  ;;  %v2638_v35 = vmax.f32 %v2634_v30, 0.0 }
 0x46e   :  { %v2539_v31 = vmul.f32 %v2535_v25, %v5287_v48  ;;  %v2567_v33 = vadd.f32 %v2566_v62, %v2565_v24  ;;  %v2642_v41 = vpack.c.bf16 %v2638_v35, %v2638_v35  ;;  %3130 = vmatpush.bf16.msra.mxu1 %v4383_v14 }
 0x470   :  { %v2571_v37 = vmul.f32 %v2567_v33, %v5287_v48  ;;  %v2575_v40 = vmul.f32 %v2539_v31, %v2539_v31  ;;  %3068 = vmatmul.bf16.vlgmr.msra.gmra.mxu0 %v2642_v41  ;;  %3107 = vmatmul.bf16.vlgmr.msrb.gmra.mxu3 %v2641_v1  ;;  %v4364_v48 = vld [vmem:[#allocation19 + $0x188] sm:$0xf0]  ;;  %v2587_v53 = vsub.f32 %v5518_v55, %v2539_v31 }
 0x471   :  { %v4367_v45 = vor.u32 %v4712_v10, %v4364_v48 }
 0x472   :  { %v2579_v42 = vsub.f32 %v2571_v37, %v2575_v40  ;;  %3131 = vmatpush.bf16.msra.mxu1 %v4375_v28 }
 0x474   :  { %v2583_v39 = vmax.f32 %v2579_v42, 0.0 }
 0x476   :  { %v2591_v9 = vadd.f32 1e-05, %v2583_v39  ;;  %3132 = vmatpush.bf16.msra.mxu1 %v4367_v45 }
 0x478   :  { %4779 = vrsqrt.f32 %v2591_v9  ;;  %vm2628_vm11 = vweird.f32 %v2591_v9 }
 0x47e   :  { %v4780_v26 = vpop.eup %4779 }
 0x47f   :  { %v2623_v49 = vmul.f32 %v4780_v26, %v2591_v9  ;;  %vm2629_vm10 = vweird.f32 %v4780_v26 }
 0x480   :  { %3120 = vmatmul.bf16.vlgmr.msrb.gmra.mxu0 %v2642_v41  ;;  %vm2630_vm12 = vmor %vm2628_vm11, %vm2629_vm10 }
 0x481   :  { %v2624_v44 = vmul.f32 %v4780_v26, %v2623_v49 }
 0x483   :  { %v2625_v38 = vmul.f32 0.5, %v2624_v44 }
 0x485   :  { %v2626_v56 = vsub.f32 1.5, %v2625_v38 }
 0x487   :  { %v2627_v29 = vmul.f32 %v4780_v26, %v2626_v56 }
 0x489   :  { %v2631_v57 = vsel %vm2630_vm12, %v4780_v26, %v2627_v29 }
 0x48a   :  { %v2635_v59 = vmul.f32 %v2631_v57, %v2587_v53 }
 0x48c   :  { %v2639_v61 = vmax.f32 %v2635_v59, 0.0 }
 0x48e   :  { %v2643_v1 = vpack.c.bf16 %v2639_v61, %v2639_v61 }
 0x490   :  { %3081 = vmatmul.bf16.vlgmr.msrb.gmra.mxu1 %v2643_v1 }
 0x4a0   :  { %3133 = vmatmul.bf16.vlgmr.msra.gmra.mxu1 %v2643_v1 }
 0x4d3   :  { %v3043_v2 = vpop.f32.mrf.mxu2 }
 0x4d4   :  { %v3044_v27 = vadd.f32 %v3043_v2, %v2710_v12 }
 0x4db   :  { %v3045_v3 = vpop.f32.mrf.mxu2 }
 0x4e3   :  { %v3056_v46 = vpop.f32.mrf.mxu3  ;;  %v3095_v55 = vpop.f32.mrf.mxu2 }
 0x4e4   :  { %v3057_v20 = vadd.f32 %v3056_v46, %v3044_v27  ;;  %v3096_v23 = vadd.f32 %v3095_v55, %v2711_v21 }
 0x4eb   :  { %v3058_v52 = vpop.f32.mrf.mxu3  ;;  %v3097_v4 = vpop.f32.mrf.mxu2 }
 0x4ed   :  { %v3069_v7 = vpop.f32.mrf.mxu0 }
 0x4ee   :  { %v3070_v17 = vadd.f32 %v3069_v7, %v3057_v20 }
 0x4f3   :  { %v3108_v43 = vpop.f32.mrf.mxu3 }
 0x4f4   :  { %v3109_v50 = vadd.f32 %v3108_v43, %v3096_v23 }
 0x4f5   :  { %v3071_v51 = vpop.f32.mrf.mxu0 }
 0x4fb   :  { %v3110_v58 = vpop.f32.mrf.mxu3 }
 0x4fd   :  { %v3121_v0 = vpop.f32.mrf.mxu0 }
 0x4fe   :  { %v3122_v60 = vadd.f32 %v3121_v0, %v3109_v50 }
 0x505   :  { %v3123_v15 = vpop.f32.mrf.mxu0 }
 0x50d   :  { %v3082_v54 = vpop.f32.mrf.mxu1 }
 0x50e   :  { %v3083_v18 = vadd.f32 %v3082_v54, %v3070_v17 }
 0x510   :  { %v4424_v19 = vmul.f32 -1.442695, %v3083_v18 }
 0x512   :  { %4781 = vpow2.f32 %v4424_v19 }
 0x515   :  { %v3084_v8 = vpop.f32.mrf.mxu1 }
 0x518   :  { %v4782_v22 = vpop.eup %4781 }
 0x519   :  { %v3144_v24 = vadd.f32 1.0, %v4782_v22 }
 0x51b   :  { %4783 = vrcp.f32 %v3144_v24  ;;  %v3157_v34 = vand.u32 2147483648, %v3144_v24  ;;  %v3155_v35 = vand.u32 2147483647, %v3144_v24  ;;  %vm3151_vm14 = vweird.f32 %v3144_v24 }
 0x51d   :  { %v3134_v25 = vpop.f32.mrf.mxu1  ;;  %v3158_v41 = vor.u32 1.1754944e-38, %v3157_v34  ;;  %vm3156_vm0 = vcmp.eq.f32.partialorder %v3155_v35, 8.507059e+37 }
 0x51e   :  { %v3135_v62 = vadd.f32 %v3134_v25, %v3122_v60 }
 0x520   :  { %v4425_v63 = vmul.f32 -1.442695, %v3135_v62 }
 0x521   :  { %v4784_v36 = vpop.eup %4783 }
 0x522   :  { %v3147_v30 = vmul.f32 %v4784_v36, %v3144_v24  ;;  %4785 = vpow2.f32 %v4425_v63  ;;  %vm3152_vm13 = vweird.f32 %v4784_v36 }
 0x523   :  { %vm3153_vm15 = vmor %vm3151_vm14, %vm3152_vm13 }
 0x524   :  { %v3148_v31 = vsub.f32 1.0, %v3147_v30 }
 0x525   :  { %v3136_v33 = vpop.f32.mrf.mxu1 }
 0x526   :  { %v3149_v13 = vmul.f32 %v4784_v36, %v3148_v31 }
 0x528   :  { %v4786_v37 = vpop.eup %4785  ;;  %v3150_v40 = vadd.f32 %v4784_v36, %v3149_v13 }
 0x529   :  { %v3145_v32 = vadd.f32 1.0, %v4786_v37 }
 0x52a   :  { %v3154_v6 = vsel %vm3153_vm15, %v4784_v36, %v3150_v40 }
 0x52b   :  { %4787 = vrcp.f32 %v3145_v32  ;;  %v3159_v5 = vsel %vm3156_vm0, %v3158_v41, %v3154_v6  ;;  %v3172_v9 = vand.u32 2147483648, %v3145_v32  ;;  %v3170_v10 = vand.u32 2147483647, %v3145_v32 }
 0x52c   :  { %v4426_v42 = vadd.f32 -0.1307, %v3159_v5  ;;  %vm3166_vm2 = vweird.f32 %v3145_v32 }
 0x52d   :  { %v3173_v45 = vor.u32 1.1754944e-38, %v3172_v9  ;;  %vm3171_vm4 = vcmp.eq.f32.partialorder %v3170_v10, 8.507059e+37 }
 0x52e   :  { %v3178_v39 = vmul.f32 3.2456994, %v4426_v42 }
 0x530   :  { %3180 = vst [vmem:[#allocation20] sm:$0xff] %v3178_v39 }
 0x531   :  { %v4788_v14 = vpop.eup %4787 }
 0x532   :  { %v3162_v16 = vmul.f32 %v4788_v14, %v3145_v32  ;;  %vm3167_vm1 = vweird.f32 %v4788_v14 }
 0x533   :  { %vm3168_vm3 = vmor %vm3166_vm2, %vm3167_vm1 }
 0x534   :  { %v3163_v47 = vsub.f32 1.0, %v3162_v16 }
 0x536   :  { %v3164_v28 = vmul.f32 %v4788_v14, %v3163_v47 }
 0x538   :  { %v3165_v48 = vadd.f32 %v4788_v14, %v3164_v28 }
 0x53a   :  { %v3169_v26 = vsel %vm3168_vm3, %v4788_v14, %v3165_v48 }
 0x53b   :  { %v3174_v49 = vsel %vm3171_vm4, %v3173_v45, %v3169_v26 }
 0x53c   :  { %v4427_v44 = vadd.f32 -0.1307, %v3174_v49 }
 0x53e   :  { %v3179_v38 = vmul.f32 3.2456994, %v4427_v44 }
 0x540   :  { %3181 = vst [vmem:[#allocation20 + $0x8] sm:$0xff] %v3179_v38 }
 0x541   :  { %3192 = dma.vmem_to_hbm [thread:$0]  %s3188_s15, 256, %s3190_s4, [#allocation4]  }
 0x542   :  { %5113 = dma.done.wait [#allocation4], 256  }
 0x543   :  { %5114 = vsyncadd [#allocation4], 4294967040 }
 0x544   :  { %5115 = dma.done.wait [#allocation22], 128  }
 0x545   :  { %5116 = vsyncadd [#allocation22], 4294967168 }
 0x546   :  { %3212 = vsyncpa [#allocation3], 1 }
 0x547   :  { %3213 = vsyncpa [#allocation6], 1 }
 0x548   :  { %3214 = vsyncpa [#allocation9], 1 }
 0x549   :  { %3215 = vsyncpa [#allocation12], 1 }
 0x54a   :  { %3216 = vsyncpa [#allocation15], 1 }
 0x54b   :  { %3217 = vsyncpa [#allocation18], 1 }
 0x54c   :  { %3218 = vsyncpa [#allocation4], 1 }
 0x54d   :  { %3219 = vsyncpa [#allocation22], 1 }

</bundles_post_ra>
